<compile_context>
chip_gen: v6e
topology: v6e:2x2x1
jax: 0.10.0
libtpu: 0.0.40
codegen_flags: <defaults>
</compile_context>

<pallas_src>
import math

import jax
import jax.numpy as jnp
from jax.experimental import pallas as pl
from jax.experimental.pallas import tpu as pltpu


# ----------------------------------------------------------------------------
# Fused Conv3x3 + bias + ReLU + MaxPool2d(2) kernel
# ----------------------------------------------------------------------------
def _conv3x3_relu_pool_kernel(x_ref, w_ref, b_ref, o_ref):
    # x_ref: (1, H+2, W+2, Cin)  padded input tile for one batch element (bf16)
    # w_ref: (3, 3, Cin, TC)     one Cout tile of the weights (bf16)
    # b_ref: (1, TC)             bias tile (f32)
    # o_ref: (1, H//2, W//2, TC) pooled output tile (bf16)
    H = x_ref.shape[1] - 2
    W = x_ref.shape[2] - 2
    Cin = x_ref.shape[3]
    TC = o_ref.shape[3]

    acc = jnp.zeros((H * W, TC), jnp.float32)
    # 9 taps of the 3x3 kernel: shifted-window matmuls, f32 accumulation.
    for dy in range(3):
        for dx in range(3):
            patch = x_ref[0, dy:dy + H, dx:dx + W, :].reshape(H * W, Cin)
            acc = acc + jnp.dot(patch, w_ref[dy, dx],
                                preferred_element_type=jnp.float32)

    # bias + ReLU on the f32 accumulator (keeps v5e epilogue in f32).
    acc = jnp.maximum(acc + b_ref[...], 0.0)

    # fused 2x2 max pool (stride 2) -- elementwise max of the 4 window taps.
    Ho, Wo = H // 2, W // 2
    t = acc.reshape(Ho, 2, Wo, 2, TC)
    r = jnp.maximum(t[:, 0], t[:, 1])          # (Ho, Wo, 2, TC)
    p = jnp.maximum(r[:, :, 0], r[:, :, 1])    # (Ho, Wo, TC)
    o_ref[0] = p.astype(o_ref.dtype)


def conv3x3_relu_pool(x, w, b, *, tile_cout=256):
    """Conv2d(3x3, pad=1) + ReLU + MaxPool2d(2) on NHWC input.

    x: (N, H, W, Cin)  w: (3, 3, Cin, Cout)  b: (Cout,)  ->  (N, H/2, W/2, Cout)
    """
    N, H, W, Cin = x.shape
    Cout = w.shape[-1]
    tc = min(tile_cout, Cout)
    assert Cout % tc == 0
    Ho, Wo = H // 2, W // 2

    xp = jnp.pad(x, ((0, 0), (1, 1), (1, 1), (0, 0))).astype(jnp.bfloat16)
    wb = w.astype(jnp.bfloat16)
    b2 = b.reshape(1, Cout).astype(jnp.float32)

    return pl.pallas_call(
        _conv3x3_relu_pool_kernel,
        out_shape=jax.ShapeDtypeStruct((N, Ho, Wo, Cout), jnp.bfloat16),
        grid=(N, Cout // tc),
        in_specs=[
            pl.BlockSpec((1, H + 2, W + 2, Cin), lambda n, co: (n, 0, 0, 0)),
            pl.BlockSpec((3, 3, Cin, tc), lambda n, co: (0, 0, 0, co)),
            pl.BlockSpec((1, tc), lambda n, co: (0, co)),
        ],
        out_specs=pl.BlockSpec((1, Ho, Wo, tc), lambda n, co: (n, 0, 0, co)),
        compiler_params=pltpu.CompilerParams(
            dimension_semantics=("parallel", "parallel")),
    )(xp, wb, b2)


# ----------------------------------------------------------------------------
# Fused classifier kernel: Linear+ReLU -> Linear+ReLU -> Linear
# ----------------------------------------------------------------------------
def _classifier_kernel(x_ref, w0_ref, b0_ref, w1_ref, b1_ref, w2_ref, b2_ref,
                       o_ref):
    h = jnp.dot(x_ref[...], w0_ref[...], preferred_element_type=jnp.float32)
    h = jnp.maximum(h + b0_ref[...], 0.0).astype(jnp.bfloat16)
    h = jnp.dot(h, w1_ref[...], preferred_element_type=jnp.float32)
    h = jnp.maximum(h + b1_ref[...], 0.0).astype(jnp.bfloat16)
    h = jnp.dot(h, w2_ref[...], preferred_element_type=jnp.float32)
    o_ref[...] = (h + b2_ref[...]).astype(o_ref.dtype)


def classifier(x, params, *, pad_lanes=128):
    """Fused Dropout(id)->Linear+ReLU->Dropout(id)->Linear+ReLU->Linear."""
    B, D = x.shape
    Nout = params["fc2_w"].shape[1]
    Mp = max(8, ((B + 7) // 8) * 8)          # pad rows to a sublane multiple
    Np = max(pad_lanes, Nout)                # pad head to 128 lanes

    xp = jnp.zeros((Mp, D), jnp.bfloat16).at[:B].set(x.astype(jnp.bfloat16))
    w0 = params["fc0_w"].astype(jnp.bfloat16)
    b0 = params["fc0_b"].reshape(1, -1).astype(jnp.float32)
    w1 = params["fc1_w"].astype(jnp.bfloat16)
    b1 = params["fc1_b"].reshape(1, -1).astype(jnp.float32)
    w2 = jnp.zeros((D, Np), jnp.bfloat16).at[:, :Nout].set(
        params["fc2_w"].astype(jnp.bfloat16))
    b2 = jnp.zeros((1, Np), jnp.float32).at[0, :Nout].set(
        params["fc2_b"].astype(jnp.float32))

    out = pl.pallas_call(
        _classifier_kernel,
        out_shape=jax.ShapeDtypeStruct((Mp, Np), jnp.float32),
        grid=(1,),
        in_specs=[
            pl.BlockSpec((Mp, D), lambda i: (0, 0)),
            pl.BlockSpec((D, D), lambda i: (0, 0)),
            pl.BlockSpec((1, D), lambda i: (0, 0)),
            pl.BlockSpec((D, D), lambda i: (0, 0)),
            pl.BlockSpec((1, D), lambda i: (0, 0)),
            pl.BlockSpec((D, Np), lambda i: (0, 0)),
            pl.BlockSpec((1, Np), lambda i: (0, 0)),
        ],
        out_specs=pl.BlockSpec((Mp, Np), lambda i: (0, 0)),
        compiler_params=pltpu.CompilerParams(
            dimension_semantics=("arbitrary",)),
    )(xp, w0, b0, w1, b1, w2, b2)
    return out[:B, :Nout]


# ----------------------------------------------------------------------------
# Parameter initialization (deterministic, mirrors the PyTorch module)
# ----------------------------------------------------------------------------
# features: [Conv(3->64)+ReLU, MaxPool, Conv(64->128)+ReLU, MaxPool,
#            Conv(128->512)+ReLU, MaxPool]  -> flattens to 512 for 8x8 inputs.
CONV_CFG = [(3, 64), (64, 128), (128, 512)]
FC_CFG = [(512, 512), (512, 512), (512, 10)]


def init_params(key):
    params = {}
    keys = jax.random.split(key, len(CONV_CFG) + 2 * len(FC_CFG))
    ki = 0
    for i, (cin, cout) in enumerate(CONV_CFG):
        # PyTorch: weight ~ N(0, sqrt(2 / (kh*kw*out_channels))); bias zero.
        n = 3 * 3 * cout
        std = math.sqrt(2.0 / n)
        w_oihw = std * jax.random.normal(keys[ki], (cout, cin, 3, 3), jnp.float32)
        ki += 1
        params[f"conv{i}_w"] = jnp.transpose(w_oihw, (2, 3, 1, 0))  # (3,3,Cin,Cout)
        params[f"conv{i}_b"] = jnp.zeros((cout,), jnp.float32)
    for i, (fan_in, fan_out) in enumerate(FC_CFG):
        # PyTorch nn.Linear default init: U(-1/sqrt(fan_in), 1/sqrt(fan_in)).
        bound = 1.0 / math.sqrt(fan_in)
        w_oi = jax.random.uniform(keys[ki], (fan_out, fan_in), jnp.float32,
                                  minval=-bound, maxval=bound)
        ki += 1
        b = jax.random.uniform(keys[ki], (fan_out,), jnp.float32,
                               minval=-bound, maxval=bound)
        ki += 1
        params[f"fc{i}_w"] = jnp.transpose(w_oi)  # (fan_in, fan_out)
        params[f"fc{i}_b"] = b
    return params


# ----------------------------------------------------------------------------
# Forward pass (matches VGG.forward: features -> flatten -> classifier)
# ----------------------------------------------------------------------------
def vgg_forward(params, x_nchw):
    x = jnp.transpose(x_nchw.astype(jnp.float32), (0, 2, 3, 1))  # NCHW -> NHWC
    for i in range(len(CONV_CFG)):
        x = conv3x3_relu_pool(x, params[f"conv{i}_w"], params[f"conv{i}_b"])
    # x.view(N, -1): spatial is 1x1 here, so the NHWC flatten equals the
    # PyTorch NCHW flatten (just the 512 channels).
    N = x.shape[0]
    x = x.reshape(N, -1)
    # classifier: Dropout(id) -> Linear+ReLU -> Dropout(id) -> Linear+ReLU -> Linear
    return classifier(x, params)


if __name__ == "__main__":
    key = jax.random.PRNGKey(0)
    pkey, xkey = jax.random.split(key)
    params = init_params(pkey)
    # Small input consistent with the module: NCHW, 3 channels, 8x8 spatial
    # (three 2x2 maxpools -> 1x1x512 -> flatten 512 for the classifier).
    x = jax.random.normal(xkey, (2, 3, 8, 8), jnp.float32)
    out = jax.jit(vgg_forward)(params, x)
    out = jax.block_until_ready(out)
    assert out.shape == (2, 10), out.shape
    assert jnp.all(jnp.isfinite(out))
    print("KERNEL_OK")
</pallas_src>

<mosaic_0001>
module attributes {stable_mosaic.version = 11 : i64} {
  func.func @_conv3x3_relu_pool_kernel(%arg0: i32, %arg1: i32, %arg2: memref<1x6x6x64xbf16, #tpu.memory_space<vmem>>, %arg3: memref<3x3x64x128xbf16, #tpu.memory_space<vmem>>, %arg4: memref<1x128xf32, #tpu.memory_space<vmem>>, %arg5: memref<1x2x2x128xbf16, #tpu.memory_space<vmem>>) attributes {dimension_semantics = [#tpu.dimension_semantics<parallel>, #tpu.dimension_semantics<parallel>], iteration_bounds = array<i64: 2, 1>, scalar_prefetch = 0 : i64, scratch_operands = 0 : i64, tpu.core_type = #tpu.core_type<tc>, window_params = [{transform_indices = @transform_0, window_bounds = array<i64: 1, 6, 6, 64>}, {transform_indices = @transform_1, window_bounds = array<i64: 3, 3, 64, 128>}, {transform_indices = @transform_2, window_bounds = array<i64: 1, 128>}, {transform_indices = @transform_3, window_bounds = array<i64: 1, 2, 2, 128>}]} {
    %cst = arith.constant 0.000000e+00 : f32
    %0 = vector.broadcast %cst : f32 to vector<16x128xf32>
    %c0 = arith.constant 0 : index
    %c0_0 = arith.constant 0 : index
    %c0_1 = arith.constant 0 : index
    %c0_2 = arith.constant 0 : index
    %1 = vector.load %arg2[%c0, %c0_0, %c0_1, %c0_2] : memref<1x6x6x64xbf16, #tpu.memory_space<vmem>>, vector<1x4x4x64xbf16>
    %2 = vector.shape_cast %1 : vector<1x4x4x64xbf16> to vector<4x4x64xbf16>
    %3 = vector.shape_cast %2 : vector<4x4x64xbf16> to vector<16x64xbf16>
    %c0_3 = arith.constant 0 : index
    %c0_4 = arith.constant 0 : index
    %c0_5 = arith.constant 0 : index
    %c0_6 = arith.constant 0 : index
    %4 = vector.load %arg3[%c0_3, %c0_4, %c0_5, %c0_6] : memref<3x3x64x128xbf16, #tpu.memory_space<vmem>>, vector<1x1x64x128xbf16>
    %5 = vector.shape_cast %4 : vector<1x1x64x128xbf16> to vector<64x128xbf16>
    %cst_7 = arith.constant dense<0.000000e+00> : vector<16x128xf32>
    %6 = tpu.matmul %3, %5, %cst_7 {dimension_numbers = #tpu.dot_dimension_numbers<[1], [0], [0], [1], [0, 0, 1, 1], [], []>} : vector<16x64xbf16>, vector<64x128xbf16>, vector<16x128xf32> -> vector<16x128xf32>
    %7 = arith.addf %0, %6 : vector<16x128xf32>
    %c0_8 = arith.constant 0 : index
    %c0_9 = arith.constant 0 : index
    %c1 = arith.constant 1 : index
    %c0_10 = arith.constant 0 : index
    %8 = vector.load %arg2[%c0_8, %c0_9, %c1, %c0_10] : memref<1x6x6x64xbf16, #tpu.memory_space<vmem>>, vector<1x4x4x64xbf16>
    %9 = vector.shape_cast %8 : vector<1x4x4x64xbf16> to vector<4x4x64xbf16>
    %10 = vector.shape_cast %9 : vector<4x4x64xbf16> to vector<16x64xbf16>
    %c0_11 = arith.constant 0 : index
    %c1_12 = arith.constant 1 : index
    %c0_13 = arith.constant 0 : index
    %c0_14 = arith.constant 0 : index
    %11 = vector.load %arg3[%c0_11, %c1_12, %c0_13, %c0_14] : memref<3x3x64x128xbf16, #tpu.memory_space<vmem>>, vector<1x1x64x128xbf16>
    %12 = vector.shape_cast %11 : vector<1x1x64x128xbf16> to vector<64x128xbf16>
    %cst_15 = arith.constant dense<0.000000e+00> : vector<16x128xf32>
    %13 = tpu.matmul %10, %12, %cst_15 {dimension_numbers = #tpu.dot_dimension_numbers<[1], [0], [0], [1], [0, 0, 1, 1], [], []>} : vector<16x64xbf16>, vector<64x128xbf16>, vector<16x128xf32> -> vector<16x128xf32>
    %14 = arith.addf %7, %13 : vector<16x128xf32>
    %c0_16 = arith.constant 0 : index
    %c0_17 = arith.constant 0 : index
    %c2 = arith.constant 2 : index
    %c0_18 = arith.constant 0 : index
    %15 = vector.load %arg2[%c0_16, %c0_17, %c2, %c0_18] : memref<1x6x6x64xbf16, #tpu.memory_space<vmem>>, vector<1x4x4x64xbf16>
    %16 = vector.shape_cast %15 : vector<1x4x4x64xbf16> to vector<4x4x64xbf16>
    %17 = vector.shape_cast %16 : vector<4x4x64xbf16> to vector<16x64xbf16>
    %c0_19 = arith.constant 0 : index
    %c2_20 = arith.constant 2 : index
    %c0_21 = arith.constant 0 : index
    %c0_22 = arith.constant 0 : index
    %18 = vector.load %arg3[%c0_19, %c2_20, %c0_21, %c0_22] : memref<3x3x64x128xbf16, #tpu.memory_space<vmem>>, vector<1x1x64x128xbf16>
    %19 = vector.shape_cast %18 : vector<1x1x64x128xbf16> to vector<64x128xbf16>
    %cst_23 = arith.constant dense<0.000000e+00> : vector<16x128xf32>
    %20 = tpu.matmul %17, %19, %cst_23 {dimension_numbers = #tpu.dot_dimension_numbers<[1], [0], [0], [1], [0, 0, 1, 1], [], []>} : vector<16x64xbf16>, vector<64x128xbf16>, vector<16x128xf32> -> vector<16x128xf32>
    %21 = arith.addf %14, %20 : vector<16x128xf32>
    %c0_24 = arith.constant 0 : index
    %c1_25 = arith.constant 1 : index
    %c0_26 = arith.constant 0 : index
    %c0_27 = arith.constant 0 : index
    %22 = vector.load %arg2[%c0_24, %c1_25, %c0_26, %c0_27] : memref<1x6x6x64xbf16, #tpu.memory_space<vmem>>, vector<1x4x4x64xbf16>
    %23 = vector.shape_cast %22 : vector<1x4x4x64xbf16> to vector<4x4x64xbf16>
    %24 = vector.shape_cast %23 : vector<4x4x64xbf16> to vector<16x64xbf16>
    %c1_28 = arith.constant 1 : index
    %c0_29 = arith.constant 0 : index
    %c0_30 = arith.constant 0 : index
    %c0_31 = arith.constant 0 : index
    %25 = vector.load %arg3[%c1_28, %c0_29, %c0_30, %c0_31] : memref<3x3x64x128xbf16, #tpu.memory_space<vmem>>, vector<1x1x64x128xbf16>
    %26 = vector.shape_cast %25 : vector<1x1x64x128xbf16> to vector<64x128xbf16>
    %cst_32 = arith.constant dense<0.000000e+00> : vector<16x128xf32>
    %27 = tpu.matmul %24, %26, %cst_32 {dimension_numbers = #tpu.dot_dimension_numbers<[1], [0], [0], [1], [0, 0, 1, 1], [], []>} : vector<16x64xbf16>, vector<64x128xbf16>, vector<16x128xf32> -> vector<16x128xf32>
    %28 = arith.addf %21, %27 : vector<16x128xf32>
    %c0_33 = arith.constant 0 : index
    %c1_34 = arith.constant 1 : index
    %c1_35 = arith.constant 1 : index
    %c0_36 = arith.constant 0 : index
    %29 = vector.load %arg2[%c0_33, %c1_34, %c1_35, %c0_36] : memref<1x6x6x64xbf16, #tpu.memory_space<vmem>>, vector<1x4x4x64xbf16>
    %30 = vector.shape_cast %29 : vector<1x4x4x64xbf16> to vector<4x4x64xbf16>
    %31 = vector.shape_cast %30 : vector<4x4x64xbf16> to vector<16x64xbf16>
    %c1_37 = arith.constant 1 : index
    %c1_38 = arith.constant 1 : index
    %c0_39 = arith.constant 0 : index
    %c0_40 = arith.constant 0 : index
    %32 = vector.load %arg3[%c1_37, %c1_38, %c0_39, %c0_40] : memref<3x3x64x128xbf16, #tpu.memory_space<vmem>>, vector<1x1x64x128xbf16>
    %33 = vector.shape_cast %32 : vector<1x1x64x128xbf16> to vector<64x128xbf16>
    %cst_41 = arith.constant dense<0.000000e+00> : vector<16x128xf32>
    %34 = tpu.matmul %31, %33, %cst_41 {dimension_numbers = #tpu.dot_dimension_numbers<[1], [0], [0], [1], [0, 0, 1, 1], [], []>} : vector<16x64xbf16>, vector<64x128xbf16>, vector<16x128xf32> -> vector<16x128xf32>
    %35 = arith.addf %28, %34 : vector<16x128xf32>
    %c0_42 = arith.constant 0 : index
    %c1_43 = arith.constant 1 : index
    %c2_44 = arith.constant 2 : index
    %c0_45 = arith.constant 0 : index
    %36 = vector.load %arg2[%c0_42, %c1_43, %c2_44, %c0_45] : memref<1x6x6x64xbf16, #tpu.memory_space<vmem>>, vector<1x4x4x64xbf16>
    %37 = vector.shape_cast %36 : vector<1x4x4x64xbf16> to vector<4x4x64xbf16>
    %38 = vector.shape_cast %37 : vector<4x4x64xbf16> to vector<16x64xbf16>
    %c1_46 = arith.constant 1 : index
    %c2_47 = arith.constant 2 : index
    %c0_48 = arith.constant 0 : index
    %c0_49 = arith.constant 0 : index
    %39 = vector.load %arg3[%c1_46, %c2_47, %c0_48, %c0_49] : memref<3x3x64x128xbf16, #tpu.memory_space<vmem>>, vector<1x1x64x128xbf16>
    %40 = vector.shape_cast %39 : vector<1x1x64x128xbf16> to vector<64x128xbf16>
    %cst_50 = arith.constant dense<0.000000e+00> : vector<16x128xf32>
    %41 = tpu.matmul %38, %40, %cst_50 {dimension_numbers = #tpu.dot_dimension_numbers<[1], [0], [0], [1], [0, 0, 1, 1], [], []>} : vector<16x64xbf16>, vector<64x128xbf16>, vector<16x128xf32> -> vector<16x128xf32>
    %42 = arith.addf %35, %41 : vector<16x128xf32>
    %c0_51 = arith.constant 0 : index
    %c2_52 = arith.constant 2 : index
    %c0_53 = arith.constant 0 : index
    %c0_54 = arith.constant 0 : index
    %43 = vector.load %arg2[%c0_51, %c2_52, %c0_53, %c0_54] : memref<1x6x6x64xbf16, #tpu.memory_space<vmem>>, vector<1x4x4x64xbf16>
    %44 = vector.shape_cast %43 : vector<1x4x4x64xbf16> to vector<4x4x64xbf16>
    %45 = vector.shape_cast %44 : vector<4x4x64xbf16> to vector<16x64xbf16>
    %c2_55 = arith.constant 2 : index
    %c0_56 = arith.constant 0 : index
    %c0_57 = arith.constant 0 : index
    %c0_58 = arith.constant 0 : index
    %46 = vector.load %arg3[%c2_55, %c0_56, %c0_57, %c0_58] : memref<3x3x64x128xbf16, #tpu.memory_space<vmem>>, vector<1x1x64x128xbf16>
    %47 = vector.shape_cast %46 : vector<1x1x64x128xbf16> to vector<64x128xbf16>
    %cst_59 = arith.constant dense<0.000000e+00> : vector<16x128xf32>
    %48 = tpu.matmul %45, %47, %cst_59 {dimension_numbers = #tpu.dot_dimension_numbers<[1], [0], [0], [1], [0, 0, 1, 1], [], []>} : vector<16x64xbf16>, vector<64x128xbf16>, vector<16x128xf32> -> vector<16x128xf32>
    %49 = arith.addf %42, %48 : vector<16x128xf32>
    %c0_60 = arith.constant 0 : index
    %c2_61 = arith.constant 2 : index
    %c1_62 = arith.constant 1 : index
    %c0_63 = arith.constant 0 : index
    %50 = vector.load %arg2[%c0_60, %c2_61, %c1_62, %c0_63] : memref<1x6x6x64xbf16, #tpu.memory_space<vmem>>, vector<1x4x4x64xbf16>
    %51 = vector.shape_cast %50 : vector<1x4x4x64xbf16> to vector<4x4x64xbf16>
    %52 = vector.shape_cast %51 : vector<4x4x64xbf16> to vector<16x64xbf16>
    %c2_64 = arith.constant 2 : index
    %c1_65 = arith.constant 1 : index
    %c0_66 = arith.constant 0 : index
    %c0_67 = arith.constant 0 : index
    %53 = vector.load %arg3[%c2_64, %c1_65, %c0_66, %c0_67] : memref<3x3x64x128xbf16, #tpu.memory_space<vmem>>, vector<1x1x64x128xbf16>
    %54 = vector.shape_cast %53 : vector<1x1x64x128xbf16> to vector<64x128xbf16>
    %cst_68 = arith.constant dense<0.000000e+00> : vector<16x128xf32>
    %55 = tpu.matmul %52, %54, %cst_68 {dimension_numbers = #tpu.dot_dimension_numbers<[1], [0], [0], [1], [0, 0, 1, 1], [], []>} : vector<16x64xbf16>, vector<64x128xbf16>, vector<16x128xf32> -> vector<16x128xf32>
    %56 = arith.addf %49, %55 : vector<16x128xf32>
    %c0_69 = arith.constant 0 : index
    %c2_70 = arith.constant 2 : index
    %c2_71 = arith.constant 2 : index
    %c0_72 = arith.constant 0 : index
    %57 = vector.load %arg2[%c0_69, %c2_70, %c2_71, %c0_72] : memref<1x6x6x64xbf16, #tpu.memory_space<vmem>>, vector<1x4x4x64xbf16>
    %58 = vector.shape_cast %57 : vector<1x4x4x64xbf16> to vector<4x4x64xbf16>
    %59 = vector.shape_cast %58 : vector<4x4x64xbf16> to vector<16x64xbf16>
    %c2_73 = arith.constant 2 : index
    %c2_74 = arith.constant 2 : index
    %c0_75 = arith.constant 0 : index
    %c0_76 = arith.constant 0 : index
    %60 = vector.load %arg3[%c2_73, %c2_74, %c0_75, %c0_76] : memref<3x3x64x128xbf16, #tpu.memory_space<vmem>>, vector<1x1x64x128xbf16>
    %61 = vector.shape_cast %60 : vector<1x1x64x128xbf16> to vector<64x128xbf16>
    %cst_77 = arith.constant dense<0.000000e+00> : vector<16x128xf32>
    %62 = tpu.matmul %59, %61, %cst_77 {dimension_numbers = #tpu.dot_dimension_numbers<[1], [0], [0], [1], [0, 0, 1, 1], [], []>} : vector<16x64xbf16>, vector<64x128xbf16>, vector<16x128xf32> -> vector<16x128xf32>
    %63 = arith.addf %56, %62 : vector<16x128xf32>
    %c0_78 = arith.constant 0 : index
    %c0_79 = arith.constant 0 : index
    %64 = vector.load %arg4[%c0_78, %c0_79] : memref<1x128xf32, #tpu.memory_space<vmem>>, vector<1x128xf32>
    %65 = vector.broadcast %64 : vector<1x128xf32> to vector<16x128xf32>
    %66 = arith.addf %63, %65 : vector<16x128xf32>
    %cst_80 = arith.constant 0.000000e+00 : f32
    %67 = vector.broadcast %cst_80 : f32 to vector<16x128xf32>
    %68 = arith.maximumf %66, %67 : vector<16x128xf32>
    %69 = vector.shape_cast %68 : vector<16x128xf32> to vector<2x2x2x2x128xf32>
    %70 = vector.extract_strided_slice %69 {offsets = [0, 0, 0, 0, 0], sizes = [2, 1, 2, 2, 128], strides = [1, 1, 1, 1, 1]} : vector<2x2x2x2x128xf32> to vector<2x1x2x2x128xf32>
    %71 = vector.shape_cast %70 : vector<2x1x2x2x128xf32> to vector<2x2x2x128xf32>
    %72 = vector.extract_strided_slice %69 {offsets = [0, 1, 0, 0, 0], sizes = [2, 1, 2, 2, 128], strides = [1, 1, 1, 1, 1]} : vector<2x2x2x2x128xf32> to vector<2x1x2x2x128xf32>
    %73 = vector.shape_cast %72 : vector<2x1x2x2x128xf32> to vector<2x2x2x128xf32>
    %74 = arith.maximumf %71, %73 : vector<2x2x2x128xf32>
    %75 = vector.extract_strided_slice %74 {offsets = [0, 0, 0, 0], sizes = [2, 2, 1, 128], strides = [1, 1, 1, 1]} : vector<2x2x2x128xf32> to vector<2x2x1x128xf32>
    %76 = vector.shape_cast %75 : vector<2x2x1x128xf32> to vector<2x2x128xf32>
    %77 = vector.extract_strided_slice %74 {offsets = [0, 0, 1, 0], sizes = [2, 2, 1, 128], strides = [1, 1, 1, 1]} : vector<2x2x2x128xf32> to vector<2x2x1x128xf32>
    %78 = vector.shape_cast %77 : vector<2x2x1x128xf32> to vector<2x2x128xf32>
    %79 = arith.maximumf %76, %78 : vector<2x2x128xf32>
    %80 = arith.truncf %79 : vector<2x2x128xf32> to vector<2x2x128xbf16>
    %c0_81 = arith.constant 0 : index
    %c0_82 = arith.constant 0 : index
    %c0_83 = arith.constant 0 : index
    %c0_84 = arith.constant 0 : index
    %81 = vector.load %arg5[%c0_81, %c0_82, %c0_83, %c0_84] : memref<1x2x2x128xbf16, #tpu.memory_space<vmem>>, vector<1x2x2x128xbf16>
    %82 = vector.shape_cast %81 : vector<1x2x2x128xbf16> to vector<2x2x128xbf16>
    %83 = vector.shape_cast %80 : vector<2x2x128xbf16> to vector<1x2x2x128xbf16>
    tpu.vector_store %arg5[%c0_81, %c0_82, %c0_83, %c0_84], %83 {strides = array<i32>} : memref<1x2x2x128xbf16, #tpu.memory_space<vmem>>, vector<1x2x2x128xbf16>,
    return
  }
  func.func @transform_0(%arg0: i32, %arg1: i32) -> (i32, i32, i32, i32) {
    %c0_i32 = arith.constant 0 : i32
    %c0_i32_0 = arith.constant 0 : i32
    %c0_i32_1 = arith.constant 0 : i32
    %c0_i32_2 = arith.constant 0 : i32
    return %arg0, %c0_i32, %c0_i32_0, %c0_i32_1 : i32, i32, i32, i32
  }
  func.func @transform_1(%arg0: i32, %arg1: i32) -> (i32, i32, i32, i32) {
    %c0_i32 = arith.constant 0 : i32
    %c0_i32_0 = arith.constant 0 : i32
    %c0_i32_1 = arith.constant 0 : i32
    %c0_i32_2 = arith.constant 0 : i32
    return %c0_i32, %c0_i32_0, %c0_i32_1, %arg1 : i32, i32, i32, i32
  }
  func.func @transform_2(%arg0: i32, %arg1: i32) -> (i32, i32) {
    %c0_i32 = arith.constant 0 : i32
    %c0_i32_0 = arith.constant 0 : i32
    return %c0_i32, %arg1 : i32, i32
  }
  func.func @transform_3(%arg0: i32, %arg1: i32) -> (i32, i32, i32, i32) {
    %c0_i32 = arith.constant 0 : i32
    %c0_i32_0 = arith.constant 0 : i32
    %c0_i32_1 = arith.constant 0 : i32
    return %arg0, %c0_i32, %c0_i32_0, %arg1 : i32, i32, i32, i32
  }
}

module attributes {stable_mosaic.version = 11 : i64} {
  func.func @_conv3x3_relu_pool_kernel(%arg0: i32, %arg1: i32, %arg2: memref<1x10x10x3xbf16, #tpu.memory_space<vmem>>, %arg3: memref<3x3x3x64xbf16, #tpu.memory_space<vmem>>, %arg4: memref<1x64xf32, #tpu.memory_space<vmem>>, %arg5: memref<1x4x4x64xbf16, #tpu.memory_space<vmem>>) attributes {dimension_semantics = [#tpu.dimension_semantics<parallel>, #tpu.dimension_semantics<parallel>], iteration_bounds = array<i64: 2, 1>, scalar_prefetch = 0 : i64, scratch_operands = 0 : i64, tpu.core_type = #tpu.core_type<tc>, window_params = [{transform_indices = @transform_0, window_bounds = array<i64: 1, 10, 10, 3>}, {transform_indices = @transform_1, window_bounds = array<i64: 3, 3, 3, 64>}, {transform_indices = @transform_2, window_bounds = array<i64: 1, 64>}, {transform_indices = @transform_3, window_bounds = array<i64: 1, 4, 4, 64>}]} {
    %cst = arith.constant 0.000000e+00 : f32
    %0 = vector.broadcast %cst : f32 to vector<64x64xf32>
    %c0 = arith.constant 0 : index
    %c0_0 = arith.constant 0 : index
    %c0_1 = arith.constant 0 : index
    %c0_2 = arith.constant 0 : index
    %1 = vector.load %arg2[%c0, %c0_0, %c0_1, %c0_2] : memref<1x10x10x3xbf16, #tpu.memory_space<vmem>>, vector<1x8x8x3xbf16>
    %2 = vector.shape_cast %1 : vector<1x8x8x3xbf16> to vector<8x8x3xbf16>
    %3 = vector.shape_cast %2 : vector<8x8x3xbf16> to vector<64x3xbf16>
    %c0_3 = arith.constant 0 : index
    %c0_4 = arith.constant 0 : index
    %c0_5 = arith.constant 0 : index
    %c0_6 = arith.constant 0 : index
    %4 = vector.load %arg3[%c0_3, %c0_4, %c0_5, %c0_6] : memref<3x3x3x64xbf16, #tpu.memory_space<vmem>>, vector<1x1x3x64xbf16>
    %5 = vector.shape_cast %4 : vector<1x1x3x64xbf16> to vector<3x64xbf16>
    %cst_7 = arith.constant dense<0.000000e+00> : vector<64x64xf32>
    %6 = tpu.matmul %3, %5, %cst_7 {dimension_numbers = #tpu.dot_dimension_numbers<[1], [0], [0], [1], [0, 0, 1, 1], [], []>} : vector<64x3xbf16>, vector<3x64xbf16>, vector<64x64xf32> -> vector<64x64xf32>
    %7 = arith.addf %0, %6 : vector<64x64xf32>
    %c0_8 = arith.constant 0 : index
    %c0_9 = arith.constant 0 : index
    %c1 = arith.constant 1 : index
    %c0_10 = arith.constant 0 : index
    %8 = vector.load %arg2[%c0_8, %c0_9, %c1, %c0_10] : memref<1x10x10x3xbf16, #tpu.memory_space<vmem>>, vector<1x8x8x3xbf16>
    %9 = vector.shape_cast %8 : vector<1x8x8x3xbf16> to vector<8x8x3xbf16>
    %10 = vector.shape_cast %9 : vector<8x8x3xbf16> to vector<64x3xbf16>
    %c0_11 = arith.constant 0 : index
    %c1_12 = arith.constant 1 : index
    %c0_13 = arith.constant 0 : index
    %c0_14 = arith.constant 0 : index
    %11 = vector.load %arg3[%c0_11, %c1_12, %c0_13, %c0_14] : memref<3x3x3x64xbf16, #tpu.memory_space<vmem>>, vector<1x1x3x64xbf16>
    %12 = vector.shape_cast %11 : vector<1x1x3x64xbf16> to vector<3x64xbf16>
    %cst_15 = arith.constant dense<0.000000e+00> : vector<64x64xf32>
    %13 = tpu.matmul %10, %12, %cst_15 {dimension_numbers = #tpu.dot_dimension_numbers<[1], [0], [0], [1], [0, 0, 1, 1], [], []>} : vector<64x3xbf16>, vector<3x64xbf16>, vector<64x64xf32> -> vector<64x64xf32>
    %14 = arith.addf %7, %13 : vector<64x64xf32>
    %c0_16 = arith.constant 0 : index
    %c0_17 = arith.constant 0 : index
    %c2 = arith.constant 2 : index
    %c0_18 = arith.constant 0 : index
    %15 = vector.load %arg2[%c0_16, %c0_17, %c2, %c0_18] : memref<1x10x10x3xbf16, #tpu.memory_space<vmem>>, vector<1x8x8x3xbf16>
    %16 = vector.shape_cast %15 : vector<1x8x8x3xbf16> to vector<8x8x3xbf16>
    %17 = vector.shape_cast %16 : vector<8x8x3xbf16> to vector<64x3xbf16>
    %c0_19 = arith.constant 0 : index
    %c2_20 = arith.constant 2 : index
    %c0_21 = arith.constant 0 : index
    %c0_22 = arith.constant 0 : index
    %18 = vector.load %arg3[%c0_19, %c2_20, %c0_21, %c0_22] : memref<3x3x3x64xbf16, #tpu.memory_space<vmem>>, vector<1x1x3x64xbf16>
    %19 = vector.shape_cast %18 : vector<1x1x3x64xbf16> to vector<3x64xbf16>
    %cst_23 = arith.constant dense<0.000000e+00> : vector<64x64xf32>
    %20 = tpu.matmul %17, %19, %cst_23 {dimension_numbers = #tpu.dot_dimension_numbers<[1], [0], [0], [1], [0, 0, 1, 1], [], []>} : vector<64x3xbf16>, vector<3x64xbf16>, vector<64x64xf32> -> vector<64x64xf32>
    %21 = arith.addf %14, %20 : vector<64x64xf32>
    %c0_24 = arith.constant 0 : index
    %c1_25 = arith.constant 1 : index
    %c0_26 = arith.constant 0 : index
    %c0_27 = arith.constant 0 : index
    %22 = vector.load %arg2[%c0_24, %c1_25, %c0_26, %c0_27] : memref<1x10x10x3xbf16, #tpu.memory_space<vmem>>, vector<1x8x8x3xbf16>
    %23 = vector.shape_cast %22 : vector<1x8x8x3xbf16> to vector<8x8x3xbf16>
    %24 = vector.shape_cast %23 : vector<8x8x3xbf16> to vector<64x3xbf16>
    %c1_28 = arith.constant 1 : index
    %c0_29 = arith.constant 0 : index
    %c0_30 = arith.constant 0 : index
    %c0_31 = arith.constant 0 : index
    %25 = vector.load %arg3[%c1_28, %c0_29, %c0_30, %c0_31] : memref<3x3x3x64xbf16, #tpu.memory_space<vmem>>, vector<1x1x3x64xbf16>
    %26 = vector.shape_cast %25 : vector<1x1x3x64xbf16> to vector<3x64xbf16>
    %cst_32 = arith.constant dense<0.000000e+00> : vector<64x64xf32>
    %27 = tpu.matmul %24, %26, %cst_32 {dimension_numbers = #tpu.dot_dimension_numbers<[1], [0], [0], [1], [0, 0, 1, 1], [], []>} : vector<64x3xbf16>, vector<3x64xbf16>, vector<64x64xf32> -> vector<64x64xf32>
    %28 = arith.addf %21, %27 : vector<64x64xf32>
    %c0_33 = arith.constant 0 : index
    %c1_34 = arith.constant 1 : index
    %c1_35 = arith.constant 1 : index
    %c0_36 = arith.constant 0 : index
    %29 = vector.load %arg2[%c0_33, %c1_34, %c1_35, %c0_36] : memref<1x10x10x3xbf16, #tpu.memory_space<vmem>>, vector<1x8x8x3xbf16>
    %30 = vector.shape_cast %29 : vector<1x8x8x3xbf16> to vector<8x8x3xbf16>
    %31 = vector.shape_cast %30 : vector<8x8x3xbf16> to vector<64x3xbf16>
    %c1_37 = arith.constant 1 : index
    %c1_38 = arith.constant 1 : index
    %c0_39 = arith.constant 0 : index
    %c0_40 = arith.constant 0 : index
    %32 = vector.load %arg3[%c1_37, %c1_38, %c0_39, %c0_40] : memref<3x3x3x64xbf16, #tpu.memory_space<vmem>>, vector<1x1x3x64xbf16>
    %33 = vector.shape_cast %32 : vector<1x1x3x64xbf16> to vector<3x64xbf16>
    %cst_41 = arith.constant dense<0.000000e+00> : vector<64x64xf32>
    %34 = tpu.matmul %31, %33, %cst_41 {dimension_numbers = #tpu.dot_dimension_numbers<[1], [0], [0], [1], [0, 0, 1, 1], [], []>} : vector<64x3xbf16>, vector<3x64xbf16>, vector<64x64xf32> -> vector<64x64xf32>
    %35 = arith.addf %28, %34 : vector<64x64xf32>
    %c0_42 = arith.constant 0 : index
    %c1_43 = arith.constant 1 : index
    %c2_44 = arith.constant 2 : index
    %c0_45 = arith.constant 0 : index
    %36 = vector.load %arg2[%c0_42, %c1_43, %c2_44, %c0_45] : memref<1x10x10x3xbf16, #tpu.memory_space<vmem>>, vector<1x8x8x3xbf16>
    %37 = vector.shape_cast %36 : vector<1x8x8x3xbf16> to vector<8x8x3xbf16>
    %38 = vector.shape_cast %37 : vector<8x8x3xbf16> to vector<64x3xbf16>
    %c1_46 = arith.constant 1 : index
    %c2_47 = arith.constant 2 : index
    %c0_48 = arith.constant 0 : index
    %c0_49 = arith.constant 0 : index
    %39 = vector.load %arg3[%c1_46, %c2_47, %c0_48, %c0_49] : memref<3x3x3x64xbf16, #tpu.memory_space<vmem>>, vector<1x1x3x64xbf16>
    %40 = vector.shape_cast %39 : vector<1x1x3x64xbf16> to vector<3x64xbf16>
    %cst_50 = arith.constant dense<0.000000e+00> : vector<64x64xf32>
    %41 = tpu.matmul %38, %40, %cst_50 {dimension_numbers = #tpu.dot_dimension_numbers<[1], [0], [0], [1], [0, 0, 1, 1], [], []>} : vector<64x3xbf16>, vector<3x64xbf16>, vector<64x64xf32> -> vector<64x64xf32>
    %42 = arith.addf %35, %41 : vector<64x64xf32>
    %c0_51 = arith.constant 0 : index
    %c2_52 = arith.constant 2 : index
    %c0_53 = arith.constant 0 : index
    %c0_54 = arith.constant 0 : index
    %43 = vector.load %arg2[%c0_51, %c2_52, %c0_53, %c0_54] : memref<1x10x10x3xbf16, #tpu.memory_space<vmem>>, vector<1x8x8x3xbf16>
    %44 = vector.shape_cast %43 : vector<1x8x8x3xbf16> to vector<8x8x3xbf16>
    %45 = vector.shape_cast %44 : vector<8x8x3xbf16> to vector<64x3xbf16>
    %c2_55 = arith.constant 2 : index
    %c0_56 = arith.constant 0 : index
    %c0_57 = arith.constant 0 : index
    %c0_58 = arith.constant 0 : index
    %46 = vector.load %arg3[%c2_55, %c0_56, %c0_57, %c0_58] : memref<3x3x3x64xbf16, #tpu.memory_space<vmem>>, vector<1x1x3x64xbf16>
    %47 = vector.shape_cast %46 : vector<1x1x3x64xbf16> to vector<3x64xbf16>
    %cst_59 = arith.constant dense<0.000000e+00> : vector<64x64xf32>
    %48 = tpu.matmul %45, %47, %cst_59 {dimension_numbers = #tpu.dot_dimension_numbers<[1], [0], [0], [1], [0, 0, 1, 1], [], []>} : vector<64x3xbf16>, vector<3x64xbf16>, vector<64x64xf32> -> vector<64x64xf32>
    %49 = arith.addf %42, %48 : vector<64x64xf32>
    %c0_60 = arith.constant 0 : index
    %c2_61 = arith.constant 2 : index
    %c1_62 = arith.constant 1 : index
    %c0_63 = arith.constant 0 : index
    %50 = vector.load %arg2[%c0_60, %c2_61, %c1_62, %c0_63] : memref<1x10x10x3xbf16, #tpu.memory_space<vmem>>, vector<1x8x8x3xbf16>
    %51 = vector.shape_cast %50 : vector<1x8x8x3xbf16> to vector<8x8x3xbf16>
    %52 = vector.shape_cast %51 : vector<8x8x3xbf16> to vector<64x3xbf16>
    %c2_64 = arith.constant 2 : index
    %c1_65 = arith.constant 1 : index
    %c0_66 = arith.constant 0 : index
    %c0_67 = arith.constant 0 : index
    %53 = vector.load %arg3[%c2_64, %c1_65, %c0_66, %c0_67] : memref<3x3x3x64xbf16, #tpu.memory_space<vmem>>, vector<1x1x3x64xbf16>
    %54 = vector.shape_cast %53 : vector<1x1x3x64xbf16> to vector<3x64xbf16>
    %cst_68 = arith.constant dense<0.000000e+00> : vector<64x64xf32>
    %55 = tpu.matmul %52, %54, %cst_68 {dimension_numbers = #tpu.dot_dimension_numbers<[1], [0], [0], [1], [0, 0, 1, 1], [], []>} : vector<64x3xbf16>, vector<3x64xbf16>, vector<64x64xf32> -> vector<64x64xf32>
    %56 = arith.addf %49, %55 : vector<64x64xf32>
    %c0_69 = arith.constant 0 : index
    %c2_70 = arith.constant 2 : index
    %c2_71 = arith.constant 2 : index
    %c0_72 = arith.constant 0 : index
    %57 = vector.load %arg2[%c0_69, %c2_70, %c2_71, %c0_72] : memref<1x10x10x3xbf16, #tpu.memory_space<vmem>>, vector<1x8x8x3xbf16>
    %58 = vector.shape_cast %57 : vector<1x8x8x3xbf16> to vector<8x8x3xbf16>
    %59 = vector.shape_cast %58 : vector<8x8x3xbf16> to vector<64x3xbf16>
    %c2_73 = arith.constant 2 : index
    %c2_74 = arith.constant 2 : index
    %c0_75 = arith.constant 0 : index
    %c0_76 = arith.constant 0 : index
    %60 = vector.load %arg3[%c2_73, %c2_74, %c0_75, %c0_76] : memref<3x3x3x64xbf16, #tpu.memory_space<vmem>>, vector<1x1x3x64xbf16>
    %61 = vector.shape_cast %60 : vector<1x1x3x64xbf16> to vector<3x64xbf16>
    %cst_77 = arith.constant dense<0.000000e+00> : vector<64x64xf32>
    %62 = tpu.matmul %59, %61, %cst_77 {dimension_numbers = #tpu.dot_dimension_numbers<[1], [0], [0], [1], [0, 0, 1, 1], [], []>} : vector<64x3xbf16>, vector<3x64xbf16>, vector<64x64xf32> -> vector<64x64xf32>
    %63 = arith.addf %56, %62 : vector<64x64xf32>
    %c0_78 = arith.constant 0 : index
    %c0_79 = arith.constant 0 : index
    %64 = vector.load %arg4[%c0_78, %c0_79] : memref<1x64xf32, #tpu.memory_space<vmem>>, vector<1x64xf32>
    %65 = vector.broadcast %64 : vector<1x64xf32> to vector<64x64xf32>
    %66 = arith.addf %63, %65 : vector<64x64xf32>
    %cst_80 = arith.constant 0.000000e+00 : f32
    %67 = vector.broadcast %cst_80 : f32 to vector<64x64xf32>
    %68 = arith.maximumf %66, %67 : vector<64x64xf32>
    %69 = vector.shape_cast %68 : vector<64x64xf32> to vector<4x2x4x2x64xf32>
    %70 = vector.extract_strided_slice %69 {offsets = [0, 0, 0, 0, 0], sizes = [4, 1, 4, 2, 64], strides = [1, 1, 1, 1, 1]} : vector<4x2x4x2x64xf32> to vector<4x1x4x2x64xf32>
    %71 = vector.shape_cast %70 : vector<4x1x4x2x64xf32> to vector<4x4x2x64xf32>
    %72 = vector.extract_strided_slice %69 {offsets = [0, 1, 0, 0, 0], sizes = [4, 1, 4, 2, 64], strides = [1, 1, 1, 1, 1]} : vector<4x2x4x2x64xf32> to vector<4x1x4x2x64xf32>
    %73 = vector.shape_cast %72 : vector<4x1x4x2x64xf32> to vector<4x4x2x64xf32>
    %74 = arith.maximumf %71, %73 : vector<4x4x2x64xf32>
    %75 = vector.extract_strided_slice %74 {offsets = [0, 0, 0, 0], sizes = [4, 4, 1, 64], strides = [1, 1, 1, 1]} : vector<4x4x2x64xf32> to vector<4x4x1x64xf32>
    %76 = vector.shape_cast %75 : vector<4x4x1x64xf32> to vector<4x4x64xf32>
    %77 = vector.extract_strided_slice %74 {offsets = [0, 0, 1, 0], sizes = [4, 4, 1, 64], strides = [1, 1, 1, 1]} : vector<4x4x2x64xf32> to vector<4x4x1x64xf32>
    %78 = vector.shape_cast %77 : vector<4x4x1x64xf32> to vector<4x4x64xf32>
    %79 = arith.maximumf %76, %78 : vector<4x4x64xf32>
    %80 = arith.truncf %79 : vector<4x4x64xf32> to vector<4x4x64xbf16>
    %c0_81 = arith.constant 0 : index
    %c0_82 = arith.constant 0 : index
    %c0_83 = arith.constant 0 : index
    %c0_84 = arith.constant 0 : index
    %81 = vector.load %arg5[%c0_81, %c0_82, %c0_83, %c0_84] : memref<1x4x4x64xbf16, #tpu.memory_space<vmem>>, vector<1x4x4x64xbf16>
    %82 = vector.shape_cast %81 : vector<1x4x4x64xbf16> to vector<4x4x64xbf16>
    %83 = vector.shape_cast %80 : vector<4x4x64xbf16> to vector<1x4x4x64xbf16>
    tpu.vector_store %arg5[%c0_81, %c0_82, %c0_83, %c0_84], %83 {strides = array<i32>} : memref<1x4x4x64xbf16, #tpu.memory_space<vmem>>, vector<1x4x4x64xbf16>,
    return
  }
  func.func @transform_0(%arg0: i32, %arg1: i32) -> (i32, i32, i32, i32) {
    %c0_i32 = arith.constant 0 : i32
    %c0_i32_0 = arith.constant 0 : i32
    %c0_i32_1 = arith.constant 0 : i32
    %c0_i32_2 = arith.constant 0 : i32
    return %arg0, %c0_i32, %c0_i32_0, %c0_i32_1 : i32, i32, i32, i32
  }
  func.func @transform_1(%arg0: i32, %arg1: i32) -> (i32, i32, i32, i32) {
    %c0_i32 = arith.constant 0 : i32
    %c0_i32_0 = arith.constant 0 : i32
    %c0_i32_1 = arith.constant 0 : i32
    %c0_i32_2 = arith.constant 0 : i32
    return %c0_i32, %c0_i32_0, %c0_i32_1, %arg1 : i32, i32, i32, i32
  }
  func.func @transform_2(%arg0: i32, %arg1: i32) -> (i32, i32) {
    %c0_i32 = arith.constant 0 : i32
    %c0_i32_0 = arith.constant 0 : i32
    return %c0_i32, %arg1 : i32, i32
  }
  func.func @transform_3(%arg0: i32, %arg1: i32) -> (i32, i32, i32, i32) {
    %c0_i32 = arith.constant 0 : i32
    %c0_i32_0 = arith.constant 0 : i32
    %c0_i32_1 = arith.constant 0 : i32
    return %arg0, %c0_i32, %c0_i32_0, %arg1 : i32, i32, i32, i32
  }
}

module attributes {stable_mosaic.version = 11 : i64} {
  func.func @_conv3x3_relu_pool_kernel(%arg0: i32, %arg1: i32, %arg2: memref<1x4x4x128xbf16, #tpu.memory_space<vmem>>, %arg3: memref<3x3x128x256xbf16, #tpu.memory_space<vmem>>, %arg4: memref<1x256xf32, #tpu.memory_space<vmem>>, %arg5: memref<1x1x1x256xbf16, #tpu.memory_space<vmem>>) attributes {dimension_semantics = [#tpu.dimension_semantics<parallel>, #tpu.dimension_semantics<parallel>], iteration_bounds = array<i64: 2, 2>, scalar_prefetch = 0 : i64, scratch_operands = 0 : i64, tpu.core_type = #tpu.core_type<tc>, window_params = [{transform_indices = @transform_0, window_bounds = array<i64: 1, 4, 4, 128>}, {transform_indices = @transform_1, window_bounds = array<i64: 3, 3, 128, 256>}, {transform_indices = @transform_2, window_bounds = array<i64: 1, 256>}, {transform_indices = @transform_3, window_bounds = array<i64: 1, 1, 1, 256>}]} {
    %cst = arith.constant 0.000000e+00 : f32
    %0 = vector.broadcast %cst : f32 to vector<4x256xf32>
    %c0 = arith.constant 0 : index
    %c0_0 = arith.constant 0 : index
    %c0_1 = arith.constant 0 : index
    %c0_2 = arith.constant 0 : index
    %1 = vector.load %arg2[%c0, %c0_0, %c0_1, %c0_2] : memref<1x4x4x128xbf16, #tpu.memory_space<vmem>>, vector<1x2x2x128xbf16>
    %2 = vector.shape_cast %1 : vector<1x2x2x128xbf16> to vector<2x2x128xbf16>
    %3 = vector.shape_cast %2 : vector<2x2x128xbf16> to vector<4x128xbf16>
    %c0_3 = arith.constant 0 : index
    %c0_4 = arith.constant 0 : index
    %c0_5 = arith.constant 0 : index
    %c0_6 = arith.constant 0 : index
    %4 = vector.load %arg3[%c0_3, %c0_4, %c0_5, %c0_6] : memref<3x3x128x256xbf16, #tpu.memory_space<vmem>>, vector<1x1x128x256xbf16>
    %5 = vector.shape_cast %4 : vector<1x1x128x256xbf16> to vector<128x256xbf16>
    %cst_7 = arith.constant dense<0.000000e+00> : vector<4x256xf32>
    %6 = tpu.matmul %3, %5, %cst_7 {dimension_numbers = #tpu.dot_dimension_numbers<[1], [0], [0], [1], [0, 0, 1, 1], [], []>} : vector<4x128xbf16>, vector<128x256xbf16>, vector<4x256xf32> -> vector<4x256xf32>
    %7 = arith.addf %0, %6 : vector<4x256xf32>
    %c0_8 = arith.constant 0 : index
    %c0_9 = arith.constant 0 : index
    %c1 = arith.constant 1 : index
    %c0_10 = arith.constant 0 : index
    %8 = vector.load %arg2[%c0_8, %c0_9, %c1, %c0_10] : memref<1x4x4x128xbf16, #tpu.memory_space<vmem>>, vector<1x2x2x128xbf16>
    %9 = vector.shape_cast %8 : vector<1x2x2x128xbf16> to vector<2x2x128xbf16>
    %10 = vector.shape_cast %9 : vector<2x2x128xbf16> to vector<4x128xbf16>
    %c0_11 = arith.constant 0 : index
    %c1_12 = arith.constant 1 : index
    %c0_13 = arith.constant 0 : index
    %c0_14 = arith.constant 0 : index
    %11 = vector.load %arg3[%c0_11, %c1_12, %c0_13, %c0_14] : memref<3x3x128x256xbf16, #tpu.memory_space<vmem>>, vector<1x1x128x256xbf16>
    %12 = vector.shape_cast %11 : vector<1x1x128x256xbf16> to vector<128x256xbf16>
    %cst_15 = arith.constant dense<0.000000e+00> : vector<4x256xf32>
    %13 = tpu.matmul %10, %12, %cst_15 {dimension_numbers = #tpu.dot_dimension_numbers<[1], [0], [0], [1], [0, 0, 1, 1], [], []>} : vector<4x128xbf16>, vector<128x256xbf16>, vector<4x256xf32> -> vector<4x256xf32>
    %14 = arith.addf %7, %13 : vector<4x256xf32>
    %c0_16 = arith.constant 0 : index
    %c0_17 = arith.constant 0 : index
    %c2 = arith.constant 2 : index
    %c0_18 = arith.constant 0 : index
    %15 = vector.load %arg2[%c0_16, %c0_17, %c2, %c0_18] : memref<1x4x4x128xbf16, #tpu.memory_space<vmem>>, vector<1x2x2x128xbf16>
    %16 = vector.shape_cast %15 : vector<1x2x2x128xbf16> to vector<2x2x128xbf16>
    %17 = vector.shape_cast %16 : vector<2x2x128xbf16> to vector<4x128xbf16>
    %c0_19 = arith.constant 0 : index
    %c2_20 = arith.constant 2 : index
    %c0_21 = arith.constant 0 : index
    %c0_22 = arith.constant 0 : index
    %18 = vector.load %arg3[%c0_19, %c2_20, %c0_21, %c0_22] : memref<3x3x128x256xbf16, #tpu.memory_space<vmem>>, vector<1x1x128x256xbf16>
    %19 = vector.shape_cast %18 : vector<1x1x128x256xbf16> to vector<128x256xbf16>
    %cst_23 = arith.constant dense<0.000000e+00> : vector<4x256xf32>
    %20 = tpu.matmul %17, %19, %cst_23 {dimension_numbers = #tpu.dot_dimension_numbers<[1], [0], [0], [1], [0, 0, 1, 1], [], []>} : vector<4x128xbf16>, vector<128x256xbf16>, vector<4x256xf32> -> vector<4x256xf32>
    %21 = arith.addf %14, %20 : vector<4x256xf32>
    %c0_24 = arith.constant 0 : index
    %c1_25 = arith.constant 1 : index
    %c0_26 = arith.constant 0 : index
    %c0_27 = arith.constant 0 : index
    %22 = vector.load %arg2[%c0_24, %c1_25, %c0_26, %c0_27] : memref<1x4x4x128xbf16, #tpu.memory_space<vmem>>, vector<1x2x2x128xbf16>
    %23 = vector.shape_cast %22 : vector<1x2x2x128xbf16> to vector<2x2x128xbf16>
    %24 = vector.shape_cast %23 : vector<2x2x128xbf16> to vector<4x128xbf16>
    %c1_28 = arith.constant 1 : index
    %c0_29 = arith.constant 0 : index
    %c0_30 = arith.constant 0 : index
    %c0_31 = arith.constant 0 : index
    %25 = vector.load %arg3[%c1_28, %c0_29, %c0_30, %c0_31] : memref<3x3x128x256xbf16, #tpu.memory_space<vmem>>, vector<1x1x128x256xbf16>
    %26 = vector.shape_cast %25 : vector<1x1x128x256xbf16> to vector<128x256xbf16>
    %cst_32 = arith.constant dense<0.000000e+00> : vector<4x256xf32>
    %27 = tpu.matmul %24, %26, %cst_32 {dimension_numbers = #tpu.dot_dimension_numbers<[1], [0], [0], [1], [0, 0, 1, 1], [], []>} : vector<4x128xbf16>, vector<128x256xbf16>, vector<4x256xf32> -> vector<4x256xf32>
    %28 = arith.addf %21, %27 : vector<4x256xf32>
    %c0_33 = arith.constant 0 : index
    %c1_34 = arith.constant 1 : index
    %c1_35 = arith.constant 1 : index
    %c0_36 = arith.constant 0 : index
    %29 = vector.load %arg2[%c0_33, %c1_34, %c1_35, %c0_36] : memref<1x4x4x128xbf16, #tpu.memory_space<vmem>>, vector<1x2x2x128xbf16>
    %30 = vector.shape_cast %29 : vector<1x2x2x128xbf16> to vector<2x2x128xbf16>
    %31 = vector.shape_cast %30 : vector<2x2x128xbf16> to vector<4x128xbf16>
    %c1_37 = arith.constant 1 : index
    %c1_38 = arith.constant 1 : index
    %c0_39 = arith.constant 0 : index
    %c0_40 = arith.constant 0 : index
    %32 = vector.load %arg3[%c1_37, %c1_38, %c0_39, %c0_40] : memref<3x3x128x256xbf16, #tpu.memory_space<vmem>>, vector<1x1x128x256xbf16>
    %33 = vector.shape_cast %32 : vector<1x1x128x256xbf16> to vector<128x256xbf16>
    %cst_41 = arith.constant dense<0.000000e+00> : vector<4x256xf32>
    %34 = tpu.matmul %31, %33, %cst_41 {dimension_numbers = #tpu.dot_dimension_numbers<[1], [0], [0], [1], [0, 0, 1, 1], [], []>} : vector<4x128xbf16>, vector<128x256xbf16>, vector<4x256xf32> -> vector<4x256xf32>
    %35 = arith.addf %28, %34 : vector<4x256xf32>
    %c0_42 = arith.constant 0 : index
    %c1_43 = arith.constant 1 : index
    %c2_44 = arith.constant 2 : index
    %c0_45 = arith.constant 0 : index
    %36 = vector.load %arg2[%c0_42, %c1_43, %c2_44, %c0_45] : memref<1x4x4x128xbf16, #tpu.memory_space<vmem>>, vector<1x2x2x128xbf16>
    %37 = vector.shape_cast %36 : vector<1x2x2x128xbf16> to vector<2x2x128xbf16>
    %38 = vector.shape_cast %37 : vector<2x2x128xbf16> to vector<4x128xbf16>
    %c1_46 = arith.constant 1 : index
    %c2_47 = arith.constant 2 : index
    %c0_48 = arith.constant 0 : index
    %c0_49 = arith.constant 0 : index
    %39 = vector.load %arg3[%c1_46, %c2_47, %c0_48, %c0_49] : memref<3x3x128x256xbf16, #tpu.memory_space<vmem>>, vector<1x1x128x256xbf16>
    %40 = vector.shape_cast %39 : vector<1x1x128x256xbf16> to vector<128x256xbf16>
    %cst_50 = arith.constant dense<0.000000e+00> : vector<4x256xf32>
    %41 = tpu.matmul %38, %40, %cst_50 {dimension_numbers = #tpu.dot_dimension_numbers<[1], [0], [0], [1], [0, 0, 1, 1], [], []>} : vector<4x128xbf16>, vector<128x256xbf16>, vector<4x256xf32> -> vector<4x256xf32>
    %42 = arith.addf %35, %41 : vector<4x256xf32>
    %c0_51 = arith.constant 0 : index
    %c2_52 = arith.constant 2 : index
    %c0_53 = arith.constant 0 : index
    %c0_54 = arith.constant 0 : index
    %43 = vector.load %arg2[%c0_51, %c2_52, %c0_53, %c0_54] : memref<1x4x4x128xbf16, #tpu.memory_space<vmem>>, vector<1x2x2x128xbf16>
    %44 = vector.shape_cast %43 : vector<1x2x2x128xbf16> to vector<2x2x128xbf16>
    %45 = vector.shape_cast %44 : vector<2x2x128xbf16> to vector<4x128xbf16>
    %c2_55 = arith.constant 2 : index
    %c0_56 = arith.constant 0 : index
    %c0_57 = arith.constant 0 : index
    %c0_58 = arith.constant 0 : index
    %46 = vector.load %arg3[%c2_55, %c0_56, %c0_57, %c0_58] : memref<3x3x128x256xbf16, #tpu.memory_space<vmem>>, vector<1x1x128x256xbf16>
    %47 = vector.shape_cast %46 : vector<1x1x128x256xbf16> to vector<128x256xbf16>
    %cst_59 = arith.constant dense<0.000000e+00> : vector<4x256xf32>
    %48 = tpu.matmul %45, %47, %cst_59 {dimension_numbers = #tpu.dot_dimension_numbers<[1], [0], [0], [1], [0, 0, 1, 1], [], []>} : vector<4x128xbf16>, vector<128x256xbf16>, vector<4x256xf32> -> vector<4x256xf32>
    %49 = arith.addf %42, %48 : vector<4x256xf32>
    %c0_60 = arith.constant 0 : index
    %c2_61 = arith.constant 2 : index
    %c1_62 = arith.constant 1 : index
    %c0_63 = arith.constant 0 : index
    %50 = vector.load %arg2[%c0_60, %c2_61, %c1_62, %c0_63] : memref<1x4x4x128xbf16, #tpu.memory_space<vmem>>, vector<1x2x2x128xbf16>
    %51 = vector.shape_cast %50 : vector<1x2x2x128xbf16> to vector<2x2x128xbf16>
    %52 = vector.shape_cast %51 : vector<2x2x128xbf16> to vector<4x128xbf16>
    %c2_64 = arith.constant 2 : index
    %c1_65 = arith.constant 1 : index
    %c0_66 = arith.constant 0 : index
    %c0_67 = arith.constant 0 : index
    %53 = vector.load %arg3[%c2_64, %c1_65, %c0_66, %c0_67] : memref<3x3x128x256xbf16, #tpu.memory_space<vmem>>, vector<1x1x128x256xbf16>
    %54 = vector.shape_cast %53 : vector<1x1x128x256xbf16> to vector<128x256xbf16>
    %cst_68 = arith.constant dense<0.000000e+00> : vector<4x256xf32>
    %55 = tpu.matmul %52, %54, %cst_68 {dimension_numbers = #tpu.dot_dimension_numbers<[1], [0], [0], [1], [0, 0, 1, 1], [], []>} : vector<4x128xbf16>, vector<128x256xbf16>, vector<4x256xf32> -> vector<4x256xf32>
    %56 = arith.addf %49, %55 : vector<4x256xf32>
    %c0_69 = arith.constant 0 : index
    %c2_70 = arith.constant 2 : index
    %c2_71 = arith.constant 2 : index
    %c0_72 = arith.constant 0 : index
    %57 = vector.load %arg2[%c0_69, %c2_70, %c2_71, %c0_72] : memref<1x4x4x128xbf16, #tpu.memory_space<vmem>>, vector<1x2x2x128xbf16>
    %58 = vector.shape_cast %57 : vector<1x2x2x128xbf16> to vector<2x2x128xbf16>
    %59 = vector.shape_cast %58 : vector<2x2x128xbf16> to vector<4x128xbf16>
    %c2_73 = arith.constant 2 : index
    %c2_74 = arith.constant 2 : index
    %c0_75 = arith.constant 0 : index
    %c0_76 = arith.constant 0 : index
    %60 = vector.load %arg3[%c2_73, %c2_74, %c0_75, %c0_76] : memref<3x3x128x256xbf16, #tpu.memory_space<vmem>>, vector<1x1x128x256xbf16>
    %61 = vector.shape_cast %60 : vector<1x1x128x256xbf16> to vector<128x256xbf16>
    %cst_77 = arith.constant dense<0.000000e+00> : vector<4x256xf32>
    %62 = tpu.matmul %59, %61, %cst_77 {dimension_numbers = #tpu.dot_dimension_numbers<[1], [0], [0], [1], [0, 0, 1, 1], [], []>} : vector<4x128xbf16>, vector<128x256xbf16>, vector<4x256xf32> -> vector<4x256xf32>
    %63 = arith.addf %56, %62 : vector<4x256xf32>
    %c0_78 = arith.constant 0 : index
    %c0_79 = arith.constant 0 : index
    %64 = vector.load %arg4[%c0_78, %c0_79] : memref<1x256xf32, #tpu.memory_space<vmem>>, vector<1x256xf32>
    %65 = vector.broadcast %64 : vector<1x256xf32> to vector<4x256xf32>
    %66 = arith.addf %63, %65 : vector<4x256xf32>
    %cst_80 = arith.constant 0.000000e+00 : f32
    %67 = vector.broadcast %cst_80 : f32 to vector<4x256xf32>
    %68 = arith.maximumf %66, %67 : vector<4x256xf32>
    %69 = vector.shape_cast %68 : vector<4x256xf32> to vector<1x2x1x2x256xf32>
    %70 = vector.extract_strided_slice %69 {offsets = [0, 0, 0, 0, 0], sizes = [1, 1, 1, 2, 256], strides = [1, 1, 1, 1, 1]} : vector<1x2x1x2x256xf32> to vector<1x1x1x2x256xf32>
    %71 = vector.shape_cast %70 : vector<1x1x1x2x256xf32> to vector<1x1x2x256xf32>
    %72 = vector.extract_strided_slice %69 {offsets = [0, 1, 0, 0, 0], sizes = [1, 1, 1, 2, 256], strides = [1, 1, 1, 1, 1]} : vector<1x2x1x2x256xf32> to vector<1x1x1x2x256xf32>
    %73 = vector.shape_cast %72 : vector<1x1x1x2x256xf32> to vector<1x1x2x256xf32>
    %74 = arith.maximumf %71, %73 : vector<1x1x2x256xf32>
    %75 = vector.extract_strided_slice %74 {offsets = [0, 0, 0, 0], sizes = [1, 1, 1, 256], strides = [1, 1, 1, 1]} : vector<1x1x2x256xf32> to vector<1x1x1x256xf32>
    %76 = vector.shape_cast %75 : vector<1x1x1x256xf32> to vector<1x1x256xf32>
    %77 = vector.extract_strided_slice %74 {offsets = [0, 0, 1, 0], sizes = [1, 1, 1, 256], strides = [1, 1, 1, 1]} : vector<1x1x2x256xf32> to vector<1x1x1x256xf32>
    %78 = vector.shape_cast %77 : vector<1x1x1x256xf32> to vector<1x1x256xf32>
    %79 = arith.maximumf %76, %78 : vector<1x1x256xf32>
    %80 = arith.truncf %79 : vector<1x1x256xf32> to vector<1x1x256xbf16>
    %c0_81 = arith.constant 0 : index
    %c0_82 = arith.constant 0 : index
    %c0_83 = arith.constant 0 : index
    %c0_84 = arith.constant 0 : index
    %81 = vector.load %arg5[%c0_81, %c0_82, %c0_83, %c0_84] : memref<1x1x1x256xbf16, #tpu.memory_space<vmem>>, vector<1x1x1x256xbf16>
    %82 = vector.shape_cast %81 : vector<1x1x1x256xbf16> to vector<1x1x256xbf16>
    %83 = vector.shape_cast %80 : vector<1x1x256xbf16> to vector<1x1x1x256xbf16>
    tpu.vector_store %arg5[%c0_81, %c0_82, %c0_83, %c0_84], %83 {strides = array<i32>} : memref<1x1x1x256xbf16, #tpu.memory_space<vmem>>, vector<1x1x1x256xbf16>,
    return
  }
  func.func @transform_0(%arg0: i32, %arg1: i32) -> (i32, i32, i32, i32) {
    %c0_i32 = arith.constant 0 : i32
    %c0_i32_0 = arith.constant 0 : i32
    %c0_i32_1 = arith.constant 0 : i32
    %c0_i32_2 = arith.constant 0 : i32
    return %arg0, %c0_i32, %c0_i32_0, %c0_i32_1 : i32, i32, i32, i32
  }
  func.func @transform_1(%arg0: i32, %arg1: i32) -> (i32, i32, i32, i32) {
    %c0_i32 = arith.constant 0 : i32
    %c0_i32_0 = arith.constant 0 : i32
    %c0_i32_1 = arith.constant 0 : i32
    %c0_i32_2 = arith.constant 0 : i32
    return %c0_i32, %c0_i32_0, %c0_i32_1, %arg1 : i32, i32, i32, i32
  }
  func.func @transform_2(%arg0: i32, %arg1: i32) -> (i32, i32) {
    %c0_i32 = arith.constant 0 : i32
    %c0_i32_0 = arith.constant 0 : i32
    return %c0_i32, %arg1 : i32, i32
  }
  func.func @transform_3(%arg0: i32, %arg1: i32) -> (i32, i32, i32, i32) {
    %c0_i32 = arith.constant 0 : i32
    %c0_i32_0 = arith.constant 0 : i32
    %c0_i32_1 = arith.constant 0 : i32
    return %arg0, %c0_i32, %c0_i32_0, %arg1 : i32, i32, i32, i32
  }
}

module attributes {stable_mosaic.version = 11 : i64} {
  func.func @_classifier_kernel(%arg0: i32, %arg1: memref<8x512xbf16, #tpu.memory_space<vmem>>, %arg2: memref<512x512xbf16, #tpu.memory_space<vmem>>, %arg3: memref<1x512xf32, #tpu.memory_space<vmem>>, %arg4: memref<512x512xbf16, #tpu.memory_space<vmem>>, %arg5: memref<1x512xf32, #tpu.memory_space<vmem>>, %arg6: memref<512x128xbf16, #tpu.memory_space<vmem>>, %arg7: memref<1x128xf32, #tpu.memory_space<vmem>>, %arg8: memref<8x128xf32, #tpu.memory_space<vmem>>) attributes {dimension_semantics = [#tpu.dimension_semantics<arbitrary>], iteration_bounds = array<i64: 1>, scalar_prefetch = 0 : i64, scratch_operands = 0 : i64, tpu.core_type = #tpu.core_type<tc>, window_params = [{pipeline_mode = #tpu.pipeline_mode<synchronous>, transform_indices = @transform_0, window_bounds = array<i64: 8, 512>}, {pipeline_mode = #tpu.pipeline_mode<synchronous>, transform_indices = @transform_1, window_bounds = array<i64: 512, 512>}, {pipeline_mode = #tpu.pipeline_mode<synchronous>, transform_indices = @transform_2, window_bounds = array<i64: 1, 512>}, {pipeline_mode = #tpu.pipeline_mode<synchronous>, transform_indices = @transform_3, window_bounds = array<i64: 512, 512>}, {pipeline_mode = #tpu.pipeline_mode<synchronous>, transform_indices = @transform_4, window_bounds = array<i64: 1, 512>}, {pipeline_mode = #tpu.pipeline_mode<synchronous>, transform_indices = @transform_5, window_bounds = array<i64: 512, 128>}, {pipeline_mode = #tpu.pipeline_mode<synchronous>, transform_indices = @transform_6, window_bounds = array<i64: 1, 128>}, {pipeline_mode = #tpu.pipeline_mode<synchronous>, transform_indices = @transform_7, window_bounds = array<i64: 8, 128>}]} {
    %c0 = arith.constant 0 : index
    %c0_0 = arith.constant 0 : index
    %0 = vector.load %arg1[%c0, %c0_0] : memref<8x512xbf16, #tpu.memory_space<vmem>>, vector<8x512xbf16>
    %c0_1 = arith.constant 0 : index
    %c0_2 = arith.constant 0 : index
    %1 = vector.load %arg2[%c0_1, %c0_2] : memref<512x512xbf16, #tpu.memory_space<vmem>>, vector<512x512xbf16>
    %cst = arith.constant dense<0.000000e+00> : vector<8x512xf32>
    %2 = tpu.matmul %0, %1, %cst {dimension_numbers = #tpu.dot_dimension_numbers<[1], [0], [0], [1], [0, 0, 1, 1], [], []>} : vector<8x512xbf16>, vector<512x512xbf16>, vector<8x512xf32> -> vector<8x512xf32>
    %c0_3 = arith.constant 0 : index
    %c0_4 = arith.constant 0 : index
    %3 = vector.load %arg3[%c0_3, %c0_4] : memref<1x512xf32, #tpu.memory_space<vmem>>, vector<1x512xf32>
    %4 = vector.broadcast %3 : vector<1x512xf32> to vector<8x512xf32>
    %5 = arith.addf %2, %4 : vector<8x512xf32>
    %cst_5 = arith.constant 0.000000e+00 : f32
    %6 = vector.broadcast %cst_5 : f32 to vector<8x512xf32>
    %7 = arith.maximumf %5, %6 : vector<8x512xf32>
    %8 = arith.truncf %7 : vector<8x512xf32> to vector<8x512xbf16>
    %c0_6 = arith.constant 0 : index
    %c0_7 = arith.constant 0 : index
    %9 = vector.load %arg4[%c0_6, %c0_7] : memref<512x512xbf16, #tpu.memory_space<vmem>>, vector<512x512xbf16>
    %cst_8 = arith.constant dense<0.000000e+00> : vector<8x512xf32>
    %10 = tpu.matmul %8, %9, %cst_8 {dimension_numbers = #tpu.dot_dimension_numbers<[1], [0], [0], [1], [0, 0, 1, 1], [], []>} : vector<8x512xbf16>, vector<512x512xbf16>, vector<8x512xf32> -> vector<8x512xf32>
    %c0_9 = arith.constant 0 : index
    %c0_10 = arith.constant 0 : index
    %11 = vector.load %arg5[%c0_9, %c0_10] : memref<1x512xf32, #tpu.memory_space<vmem>>, vector<1x512xf32>
    %12 = vector.broadcast %11 : vector<1x512xf32> to vector<8x512xf32>
    %13 = arith.addf %10, %12 : vector<8x512xf32>
    %cst_11 = arith.constant 0.000000e+00 : f32
    %14 = vector.broadcast %cst_11 : f32 to vector<8x512xf32>
    %15 = arith.maximumf %13, %14 : vector<8x512xf32>
    %16 = arith.truncf %15 : vector<8x512xf32> to vector<8x512xbf16>
    %c0_12 = arith.constant 0 : index
    %c0_13 = arith.constant 0 : index
    %17 = vector.load %arg6[%c0_12, %c0_13] : memref<512x128xbf16, #tpu.memory_space<vmem>>, vector<512x128xbf16>
    %cst_14 = arith.constant dense<0.000000e+00> : vector<8x128xf32>
    %18 = tpu.matmul %16, %17, %cst_14 {dimension_numbers = #tpu.dot_dimension_numbers<[1], [0], [0], [1], [0, 0, 1, 1], [], []>} : vector<8x512xbf16>, vector<512x128xbf16>, vector<8x128xf32> -> vector<8x128xf32>
    %c0_15 = arith.constant 0 : index
    %c0_16 = arith.constant 0 : index
    %19 = vector.load %arg7[%c0_15, %c0_16] : memref<1x128xf32, #tpu.memory_space<vmem>>, vector<1x128xf32>
    %20 = vector.broadcast %19 : vector<1x128xf32> to vector<8x128xf32>
    %21 = arith.addf %18, %20 : vector<8x128xf32>
    %c0_17 = arith.constant 0 : index
    %c0_18 = arith.constant 0 : index
    %22 = vector.load %arg8[%c0_17, %c0_18] : memref<8x128xf32, #tpu.memory_space<vmem>>, vector<8x128xf32>
    tpu.vector_store %arg8[%c0_17, %c0_18], %21 {strides = array<i32>} : memref<8x128xf32, #tpu.memory_space<vmem>>, vector<8x128xf32>,
    return
  }
  func.func @transform_0(%arg0: i32) -> (i32, i32) {
    %c0_i32 = arith.constant 0 : i32
    %c0_i32_0 = arith.constant 0 : i32
    %c0_i32_1 = arith.constant 0 : i32
    return %c0_i32, %c0_i32_0 : i32, i32
  }
  func.func @transform_1(%arg0: i32) -> (i32, i32) {
    %c0_i32 = arith.constant 0 : i32
    %c0_i32_0 = arith.constant 0 : i32
    %c0_i32_1 = arith.constant 0 : i32
    return %c0_i32, %c0_i32_0 : i32, i32
  }
  func.func @transform_2(%arg0: i32) -> (i32, i32) {
    %c0_i32 = arith.constant 0 : i32
    %c0_i32_0 = arith.constant 0 : i32
    %c0_i32_1 = arith.constant 0 : i32
    return %c0_i32, %c0_i32_0 : i32, i32
  }
  func.func @transform_3(%arg0: i32) -> (i32, i32) {
    %c0_i32 = arith.constant 0 : i32
    %c0_i32_0 = arith.constant 0 : i32
    %c0_i32_1 = arith.constant 0 : i32
    return %c0_i32, %c0_i32_0 : i32, i32
  }
  func.func @transform_4(%arg0: i32) -> (i32, i32) {
    %c0_i32 = arith.constant 0 : i32
    %c0_i32_0 = arith.constant 0 : i32
    %c0_i32_1 = arith.constant 0 : i32
    return %c0_i32, %c0_i32_0 : i32, i32
  }
  func.func @transform_5(%arg0: i32) -> (i32, i32) {
    %c0_i32 = arith.constant 0 : i32
    %c0_i32_0 = arith.constant 0 : i32
    %c0_i32_1 = arith.constant 0 : i32
    return %c0_i32, %c0_i32_0 : i32, i32
  }
  func.func @transform_6(%arg0: i32) -> (i32, i32) {
    %c0_i32 = arith.constant 0 : i32
    %c0_i32_0 = arith.constant 0 : i32
    %c0_i32_1 = arith.constant 0 : i32
    return %c0_i32, %c0_i32_0 : i32, i32
  }
  func.func @transform_7(%arg0: i32) -> (i32, i32) {
    %c0_i32 = arith.constant 0 : i32
    %c0_i32_0 = arith.constant 0 : i32
    %c0_i32_1 = arith.constant 0 : i32
    return %c0_i32, %c0_i32_0 : i32, i32
  }
}

</mosaic_0001>

<bundles_post_ra>
// kernel: vgg_forward.5
= control target key start
LH: loop header
LB: loop body
LE: loop exit
PB: predicated region body
PF: predicated region fallthrough
CT: control target
= control target key end

     0   :  { %8 = vsyncpa [#allocation3], 0  ;;  %s2436_s12 = smov 0   ;;  %s2438_s13 = smov 0   ;;  %s2785_s0 = inlined_call_operand.vmem [shape: bf16[2,6,6,64], index: 0, kind: input, shape index: {}]   ;;  %s2786_s1 = inlined_call_operand.vmem [shape: bf16[3,3,64,128], index: 1, kind: input, shape index: {}]   ;;  %s2787_s2 = inlined_call_operand.hbm [shape: f32[1,128], index: 2, kind: input, shape index: {}]   ;;  %s2788_s3 = inlined_call_operand.vmem [shape: bf16[2,2,2,128], index: 3, kind: output, shape index: {}]  }
   0x1   :  { %s2440_s14 = smov 0  }
   0x2 LB: > { %s1926_s15 = sadd.s32 4294967295, %s2408_s14   ;;  %s26_s16 = sadd.s32 1, %s2404_s13  ;;  %s2408_s14 = sphi %s2440_s14, %s14_s14   ;;  %s2404_s13 = sphi %s2438_s13, %s2800_s13   ;;  %s2400_s12 = sphi %s2436_s12, %s2799_s12  }
   0x3   : > { %p28_p0 = scmp.ge.s32.totalorder %s26_s16, 2  ;;  %p1928_p1 = scmp.ge.s32.totalorder %s2408_s14, 1 }
   0x4   : > { %p137_p2 = scmp.lt.s32.totalorder %s2408_s14, 3  ;;  %p2461_p4 = scmp.eq.s32.totalorder %s1926_s15, 0 }
   0x5   : > { %s2802_s16 = smov (%p28_p0, %s26_s16), 0  ;;  %s2410_s19 = smov [#allocation2]  }
   0x6   : > { %p2457_p3 = pnand %p1928_p1, %p137_p2  ;;  %s159_s20 = sshll.u32 %s2410_s19, 4  ;;  %s160_s20 = int_to_ptr.vmem [resolvable:$true] %s159_s20 }
   0x7   : > { %s2367_s21 = scalar_lea.vmem %s160_s20, 16  ;;  %s2374_s22 = scalar_lea.vmem %s160_s20, 32 }
   0x8   : > { %p2272_p5 = pneg %p2457_p3  ;;  %p2368_p8 = scmp.ne.s32.totalorder %s160_s20, %s2367_s21 }
   0x9   : > { %p2375_p11 = scmp.lt.s32.totalorder %s160_s20, %s160_s20  ;;  %p2376_p12 = scmp.lt.s32.totalorder %s2374_s22, %s2367_s21 }
   0xa   : > { %p2273_p6 = pnand %p2461_p4, %p2272_p5 }
   0xb   : > { %p2377_p13 = por %p2376_p12, %p2375_p11 }
   0xc   : > { %p2358_p7 = pneg %p2273_p6 }
   0xe   : > { %p2370_p9 = pnand %p2368_p8, %p2358_p7 }
  0x10   : > { %p2371_p10 = pneg %p2370_p9 }
  0x12   : > { %p2378_p0 = pnand %p2377_p13, %p2371_p10 }
  0x14   : > { %2381 = shalt.err (!%p2378_p0)
}
  0x15   : > { %2275 = dma.hbm_to_vmem [thread:$0]  (!%p2273_p6), %s2787_s2, 16, %s160_s20, [#allocation3]  }
  0x16   : > { %180 = sbr.rel (%p2457_p3) target bundleno = 357 (0x165), region = 32 }
  0x1b   : > { %2395 = dma.done.wait (%p2461_p4), [#allocation3], 16  }
  0x1c   : > { %2397 = vsyncadd (%p2461_p4), [#allocation3], 4294967280  ;;  %p210_p1 = scmp.lt.s32.totalorder %s2400_s12, 1  ;;  %v2411_v0 = vmov 0.0   ;;  %vm2412_vm0 = vmmov 0   ;;  %v2308_v1 = vld [vmem:[%s2786_s1 + $0x38] sm:$0xff]   ;;  %v356_v7 = vlaneseq }
  0x1d   : > { %2159 = vmatprep.subr.bf16.mxu0 %v2411_v0  ;;  %2171 = vmatprep.subr.bf16.mxu1 %v2411_v0  ;;  %vm279_vm1 = vsmask.f32 1280  ;;  %vm280_vm2 = vsmask.f32 3336  ;;  %v2309_v2 = vld [vmem:[%s2786_s1 + $0x18] sm:$0xff]   ;;  %v2310_v3 = vld [vmem:[%s2786_s1 + $0x30] sm:$0xff]  }
  0x1e   : > { %2167 = vmatprep.mubr.msk.bf16.mxu0 %vm2412_vm0, %v2411_v0  ;;  %2179 = vmatprep.mubr.msk.bf16.mxu1 %vm2412_vm0, %v2411_v0  ;;  %s2804_s12 = smov (!%p210_p1, %s2400_s12), 1  ;;  %v2311_v4 = vld [vmem:[%s2786_s1 + $0x10] sm:$0xff]   ;;  %v2413_v5 = vmov 1983009808   ;;  %vm282_vm3 = vsmask.f32 5392  ;;  %vm2528_vm5 = vmor %vm279_vm1, %vm280_vm2 }
  0x1f   : > { %s2267_s29 = smul.u32 24, %s2804_s12  ;;  %2160 = vmatpush3.bf16.msra.mxu0 %v2308_v1  ;;  %2172 = vmatpush3.bf16.msra.mxu1 %v2309_v2  ;;  %v354_v6 = vunpack.c.l.s4 %v2413_v5  ;;  %vm284_vm4 = vsmask.f32 7448  ;;  %v2312_v8 = vld [vmem:[%s2786_s1 + $0x28] sm:$0xff]   ;;  %v2515_v11 = vshrl.u32 %v356_v7, 7  ;;  %v2314_v12 = vld [vmem:[%s2786_s1 + $0x20] sm:$0xff]   ;;  %vm283_vm8 = vmor %vm2528_vm5, %vm282_vm3 }
  0x20   : > { %2161 = vmatprep.subr.bf16.mxu0 %v2411_v0  ;;  %2173 = vmatprep.subr.bf16.mxu1 %v2411_v0  ;;  %v2313_v9 = vld [vmem:[%s2786_s1 + $0x8] sm:$0xff]   ;;  %v2315_v14 = vld [vmem:[%s2786_s1] sm:$0xff]   ;;  %vm392_vm6 = vcmask 523264   ;;  %vm566_vm7 = vcmask 1040384   ;;  %vm2543_vm9 = vmor %vm283_vm8, %vm284_vm4  ;;  %vm567_vm10 = vcmask 1042434   ;;  %vm569_vm12 = vcmask 1044484  }
  0x21   : > { %s2506_s9 = scalar_lea.vmem %s2785_s0, %s2267_s29  ;;  %v355_v10 = vunpack.c.0.s8 %v354_v6  ;;  %v2319_v57 = vld [vmem:[%s2786_s1 + $0x78] sm:$0xff]   ;;  %vm568_vm11 = vmor %vm566_vm7, %vm567_vm10  ;;  %v2321_v2 = vld [vmem:[%s2786_s1 + $0x70] sm:$0xff]   ;;  %vm571_vm14 = vcmask 1046534   ;;  %s1935_s6 = sshll.u32 %s2804_s12, 1 }
  0x22   : > { %v1936_v13 = vld.sshfl [vmem:[%s2506_s9] sm:$0x13 pattern:$0x76325410]  ;;  %v2323_v7 = vld [vmem:[%s2786_s1 + $0x68] sm:$0xff]   ;;  %vm2586_vm13 = vmor %vm568_vm11, %vm569_vm12  ;;  %s225_s10 = scalar_lea.vmem %s2788_s3, %s1935_s6 }
  0x23   : > { %2162 = vmatpush3.bf16.msra.mxu0 %v2310_v3  ;;  %2174 = vmatpush3.bf16.msra.mxu1 %v2311_v4  ;;  %v1937_v15 = vld.sshfl [vmem:[%s2506_s9 + $0x4] sm:$0x13 pattern:$0x76325410]  ;;  %v254_v16 = vcombine.high %v1936_v13, %v1936_v13  ;;  %v287_v18 = vshrl.u32 %v1936_v13, 16  ;;  %v290_v19 = vshll.u32 %v1936_v13, 16  ;;  %v2536_v28 = vsub.s32 %v355_v10, %v2515_v11  ;;  %vm2601_vm15 = vmor %vm2586_vm13, %vm571_vm14 }
  0x24   : > { %2163 = vmatprep.subr.bf16.mxu0 %v2411_v0  ;;  %2175 = vmatprep.subr.bf16.mxu1 %v2411_v0  ;;  %v1938_v20 = vld.sshfl [vmem:[%s2506_s9 + $0x8] sm:$0x13 pattern:$0x76325410]  ;;  %v262_v21 = vcombine.high %v1937_v15, %v1937_v15  ;;  %v301_v22 = vshrl.u32 %v1937_v15, 16  ;;  %v304_v23 = vshll.u32 %v1937_v15, 16 }
  0x25   : > { %v1939_v24 = vld.sshfl [vmem:[%s2506_s9 + $0xc] sm:$0x13 pattern:$0x76325410]  ;;  %v270_v25 = vcombine.high %v1938_v20, %v1938_v20  ;;  %v289_v26 = vrot.slane %v287_v18, 6  ;;  %v292_v27 = vrot.slane %v290_v19, 7 }
  0x26   : > { %v278_v29 = vcombine.high %v1939_v24, %v1939_v24  ;;  %v296_v30 = vshll.u32 %v254_v16, 16  ;;  %v303_v31 = vrot.slane %v301_v22, 6  ;;  %v306_v32 = vrot.slane %v304_v23, 7  ;;  %v2338_v41 = vld [vmem:[%s2786_s1 + $0xd0] sm:$0xff]  }
  0x27   : > { %2164 = vmatpush3.bf16.msra.mxu0 %v2312_v8  ;;  %2176 = vmatpush3.bf16.msra.mxu1 %v2313_v9  ;;  %v293_v33 = vor.u32 %v292_v27, %v289_v26  ;;  %v310_v34 = vshll.u32 %v262_v21, 16  ;;  %v315_v35 = vshrl.u32 %v1938_v20, 16  ;;  %v318_v36 = vshll.u32 %v1938_v20, 16 }
  0x28   : > { %2165 = vmatprep.subr.bf16.mxu0 %v2411_v0  ;;  %2177 = vmatprep.subr.bf16.mxu1 %v2411_v0  ;;  %v298_v37 = vrot.slane %v296_v30, 7  ;;  %v307_v38 = vor.u32 %v306_v32, %v303_v31  ;;  %v324_v39 = vshll.u32 %v270_v25, 16  ;;  %v329_v40 = vshrl.u32 %v1939_v24, 16  ;;  %v2325_v30 = vld [vmem:[%s2786_s1 + $0x60] sm:$0xff]  }
  0x29   : > { %v294_v42 = vrot.slane %v293_v33, 2  ;;  %v312_v43 = vrot.slane %v310_v34, 7  ;;  %v317_v44 = vrot.slane %v315_v35, 6  ;;  %v320_v45 = vrot.slane %v318_v36, 7 }
  0x2a   : > { %v2350_v46 = vld.sshfl [vmem:[%s2506_s9] sm:$0xf pattern:$0x76325410]  ;;  %v308_v47 = vrot.slane %v307_v38, 2  ;;  %v331_v48 = vrot.slane %v329_v40, 6 }
  0x2b   : > { %2166 = vmatpush3.bf16.msra.mxu0 %v2314_v12  ;;  %2178 = vmatpush3.bf16.msra.mxu1 %v2315_v14  ;;  %v332_v49 = vshll.u32 %v1939_v24, 16  ;;  %v2351_v50 = vld.sshfl [vmem:[%s2506_s9 + $0x8] sm:$0xf pattern:$0x76325410]  ;;  %v321_v51 = vor.u32 %v320_v45, %v317_v44  ;;  %v326_v52 = vrot.slane %v324_v39, 7  ;;  %v299_v54 = vsel %vm2543_vm9, %v294_v42, %v298_v37 }
  0x2c   : > { %2183 = vmatprep.subr.bf16.mxu0 %v2411_v0  ;;  %2195 = vmatprep.subr.bf16.mxu1 %v2411_v0  ;;  %v338_v53 = vshll.u32 %v278_v29, 16  ;;  %v2555_v55 = vsel %vm2543_vm9, %v308_v47, %v312_v43  ;;  %v457_v61 = vcombine.low %v2350_v46, %v2351_v50  ;;  %v1958_v4 = vld.sshfl [vmem:[%s2506_s9] sm:$0x12 pattern:$0x76325410]  ;;  %v2318_v12 = vld [vmem:[%s2786_s1 + $0x58] sm:$0xff]  }
  0x2d   : > { %v334_v56 = vrot.slane %v332_v49, 7  ;;  %v322_v58 = vrot.slane %v321_v51, 2  ;;  %v351_v62 = vcombine.low %v299_v54, %v2555_v55  ;;  %v1959_v8 = vld.sshfl [vmem:[%s2506_s9 + $0x4] sm:$0x12 pattern:$0x76325410]  ;;  %v541_v9 = vcombine.high %v1958_v4, %v1958_v4 }
  0x2e   : > { %v340_v59 = vrot.slane %v338_v53, 7  ;;  %2180 = vmatmul.mubr.msk.bf16.vlgmr.msra.gmra.mxu1 %vm392_vm6, %v457_v61  ;;  %v1960_v13 = vld.sshfl [vmem:[%s2506_s9 + $0x8] sm:$0x12 pattern:$0x76325410]  ;;  %v549_v14 = vcombine.high %v1959_v8, %v1959_v8  ;;  %v1962_v15 = vrot.slane %v1958_v4, 9 }
  0x2f   : > { %v335_v60 = vor.u32 %v334_v56, %v331_v48  ;;  %v2563_v63 = vsel %vm2543_vm9, %v322_v58, %v326_v52  ;;  %2196 = vmatpush3.bf16.msra.mxu1 %v2319_v57  ;;  %2203 = vmatprep.mubr.msk.bf16.mxu1 %vm2412_vm0, %v2411_v0  ;;  %v359_v6 = vrot.slane %v351_v62, %v2536_v28  ;;  %v1963_v16 = vrot.slane %v1959_v8, 9  ;;  %v1961_v18 = vld.sshfl [vmem:[%s2506_s9 + $0xc] sm:$0x12 pattern:$0x76325410]  ;;  %v2320_v29 = vld [vmem:[%s2786_s1 + $0x50] sm:$0xff]  }
  0x30   : > { %2197 = vmatprep.subr.bf16.mxu1 %v2411_v0  ;;  %v557_v19 = vcombine.high %v1960_v13, %v1960_v13  ;;  %v575_v20 = vrot.slane %v541_v9, 7  ;;  %v1964_v21 = vrot.slane %v1960_v13, 9  ;;  %v565_v22 = vcombine.high %v1961_v18, %v1961_v18  ;;  %v2352_v33 = vld.sshfl [vmem:[%s2506_s9 + $0x4] sm:$0xf pattern:$0x76325410] }
  0x31   : > { %v336_v1 = vrot.slane %v335_v60, 2  ;;  %v579_v24 = vrot.slane %v549_v14, 7  ;;  %v1965_v25 = vrot.slane %v1961_v18, 9  ;;  %v2329_v40 = vld [vmem:[%s2786_s1 + $0xb8] sm:$0xff]   ;;  %v2322_v42 = vld [vmem:[%s2786_s1 + $0x48] sm:$0xff]   ;;  %v2331_v44 = vld [vmem:[%s2786_s1 + $0xb0] sm:$0xff]  }
  0x32   : > { %v583_v27 = vrot.slane %v557_v19, 7  ;;  %v587_v31 = vrot.slane %v565_v22, 7  ;;  %v576_v32 = vsel %vm2601_vm15, %v1962_v15, %v575_v20  ;;  %v2353_v34 = vld.sshfl [vmem:[%s2506_s9 + $0xc] sm:$0xf pattern:$0x76325410] }
  0x33   : > { %v2575_v3 = vsel %vm2543_vm9, %v336_v1, %v340_v59  ;;  %2198 = vmatpush3.bf16.msra.mxu1 %v2321_v2  ;;  %v580_v35 = vsel %vm2601_vm15, %v1963_v16, %v579_v24  ;;  %v719_v43 = vcombine.low %v2352_v33, %v2353_v34  ;;  %v2003_v45 = vld.sshfl [vmem:[%s2506_s9 + $0x10] sm:$0x13 pattern:$0x76325410]  ;;  %v2324_v52 = vld [vmem:[%s2786_s1 + $0x40] sm:$0xff]   ;;  %v2326_v59 = vld [vmem:[%s2786_s1 + $0x98] sm:$0xff]   ;;  %v895_v16 = vcombine.low %v2555_v55, %v2563_v63 }
  0x34   : > { %v352_v5 = vcombine.low %v2563_v63, %v2575_v3  ;;  %2199 = vmatprep.subr.bf16.mxu1 %v2411_v0  ;;  %v584_v36 = vsel %vm2601_vm15, %v1964_v21, %v583_v27  ;;  %v588_v37 = vsel %vm2601_vm15, %v1965_v25, %v587_v31  ;;  %v598_v38 = vcombine.low %v576_v32, %v580_v35  ;;  %v2024_v51 = vld.sshfl [vmem:[%s2506_s9 + $0x10] sm:$0x12 pattern:$0x76325410]  ;;  %v2333_v2 = vld [vmem:[%s2786_s1 + $0xa8] sm:$0xff]   ;;  %v2335_v9 = vld [vmem:[%s2786_s1 + $0xa0] sm:$0xff]  }
  0x35   : > { %v599_v39 = vcombine.low %v584_v36, %v588_v37  ;;  %v829_v46 = vcombine.high %v2003_v45, %v2003_v45  ;;  %v873_v47 = vshrl.u32 %v2003_v45, 16  ;;  %v876_v48 = vshll.u32 %v2003_v45, 16  ;;  %v2066_v15 = vld.sshfl [vmem:[%s2506_s9 + $0x14] sm:$0x13 pattern:$0x76325410] }
  0x36   : > { %v2595_v17 = vrot.slane %v352_v5, %v2536_v28  ;;  %v606_v49 = vrot.slane %v598_v38, %v2536_v28  ;;  %v1021_v57 = vcombine.high %v2024_v51, %v2024_v51  ;;  %v2028_v58 = vrot.slane %v2024_v51, 9  ;;  %v2337_v19 = vld [vmem:[%s2786_s1 + $0xf8] sm:$0xff]   ;;  %v2332_v22 = vld [vmem:[%s2786_s1 + $0x88] sm:$0xff]   ;;  %v2339_v27 = vld [vmem:[%s2786_s1 + $0xf0] sm:$0xff]  }
  0x37   : > { %2200 = vmatpush3.bf16.msra.mxu1 %v2323_v7  ;;  %v2642_v50 = vrot.slane %v599_v39, %v2536_v28  ;;  %v875_v53 = vrot.slane %v873_v47, 6  ;;  %v878_v54 = vrot.slane %v876_v48, 7  ;;  %v882_v56 = vshll.u32 %v829_v46, 16  ;;  %v2341_v34 = vld [vmem:[%s2786_s1 + $0xe8] sm:$0xff]   ;;  %v2343_v38 = vld [vmem:[%s2786_s1 + $0xe0] sm:$0xff]   ;;  %v2346_v48 = vld [vmem:[%s2786_s1 + $0x118] sm:$0xff]  }
  0x38   : > { %v367_v26 = vcombine.low %v359_v6, %v2595_v17  ;;  %2201 = vmatprep.subr.bf16.mxu1 %v2411_v0  ;;  %v1036_v61 = vrot.slane %v1021_v57, 7  ;;  %v1047_v62 = vcombine.low %v580_v35, %v584_v36  ;;  %v1278_v20 = vcombine.high %v2066_v15, %v2066_v15  ;;  %v2336_v35 = vld [vmem:[%s2786_s1 + $0xd8] sm:$0xff]   ;;  %v2087_v45 = vld.sshfl [vmem:[%s2506_s9 + $0x14] sm:$0x12 pattern:$0x76325410] }
  0x39   : > { %v879_v60 = vor.u32 %v878_v54, %v875_v53  ;;  %v614_v1 = vcombine.low %v606_v49, %v2642_v50  ;;  %v884_v5 = vrot.slane %v882_v56, 7  ;;  %v1322_v21 = vshrl.u32 %v2066_v15, 16  ;;  %v2342_v46 = vld [vmem:[%s2786_s1 + $0xc0] sm:$0xff]   ;;  %v2348_v56 = vld [vmem:[%s2786_s1 + $0x108] sm:$0xff]  }
  0x3a   : > { %2168 = vmatmul.mubr.msk.bf16.vlgmr.msra.gmra.mxu0 %vm392_vm6, %v367_v26  ;;  %v2662_v6 = vsel %vm2601_vm15, %v2028_v58, %v1036_v61  ;;  %v1055_v8 = vrot.slane %v1047_v62, %v2536_v28  ;;  %v1325_v24 = vshll.u32 %v2066_v15, 16  ;;  %v1331_v55 = vshll.u32 %v1278_v20, 16  ;;  %v2349_v58 = vld [vmem:[%s2786_s1 + $0x100] sm:$0xff]  }
  0x3b   : > { %2184 = vmatpush3.bf16.msra.mxu0 %v2318_v12  ;;  %2191 = vmatprep.mubr.msk.bf16.mxu0 %vm2412_vm0, %v2411_v0  ;;  %v880_v4 = vrot.slane %v879_v60, 2  ;;  %v1048_v7 = vcombine.low %v588_v37, %v2662_v6  ;;  %v2330_v12 = vld [vmem:[%s2786_s1 + $0x90] sm:$0xff]   ;;  %v1324_v25 = vrot.slane %v1322_v21, 6  ;;  %v1470_v47 = vcombine.high %v2087_v45, %v2087_v45 }
  0x3c   : > { %2185 = vmatprep.subr.bf16.mxu0 %v2411_v0  ;;  %2202 = vmatpush3.bf16.msra.mxu1 %v2325_v30  ;;  %v1327_v63 = vrot.slane %v1325_v24, 7  ;;  %v1333_v31 = vrot.slane %v1331_v55, 7  ;;  %v2091_v49 = vrot.slane %v2087_v45, 9 }
  0x3d   : > { %2219 = vmatprep.subr.bf16.mxu1 %v2411_v0  ;;  %v1062_v10 = vrot.slane %v1048_v7, %v2536_v28  ;;  %v885_v13 = vsel %vm2543_vm9, %v880_v4, %v884_v5  ;;  %v1485_v51 = vrot.slane %v1470_v47, 7 }
  0x3e   : > { %v896_v18 = vcombine.low %v2575_v3, %v885_v13  ;;  %v903_v3 = vrot.slane %v895_v16, %v2536_v28  ;;  %v1328_v30 = vor.u32 %v1327_v63, %v1324_v25 }
  0x3f   : > { %2186 = vmatpush3.bf16.msra.mxu0 %v2320_v29  ;;  %2204 = vmatmul.mubr.msk.bf16.vlgmr.msra.gmra.mxu1 %vm392_vm6, %v719_v43  ;;  %v1063_v14 = vcombine.low %v1055_v8, %v1062_v10  ;;  %v2334_v29 = vld [vmem:[%s2786_s1 + $0x80] sm:$0xff]   ;;  %v2355_v43 = vld.sshfl [vmem:[%s2506_s9 + $0x10] sm:$0xf pattern:$0x76325410]  ;;  %v1486_v53 = vsel %vm2601_vm15, %v2091_v49, %v1485_v51 }
  0x40   : > { %2187 = vmatprep.subr.bf16.mxu0 %v2411_v0  ;;  %2220 = vmatpush3.bf16.msra.mxu1 %v2329_v40  ;;  %v910_v26 = vrot.slane %v896_v18, %v2536_v28  ;;  %v1329_v32 = vrot.slane %v1328_v30, 2  ;;  %v1497_v54 = vcombine.low %v2662_v6, %v1486_v53  ;;  %v2414_v51 = vmov 1966171168  }
  0x41   : > { %2227 = vmatprep.mubr.msk.bf16.mxu1 %vm2412_vm0, %v2411_v0  ;;  %2221 = vmatprep.subr.bf16.mxu1 %v2411_v0 }
  0x42   : > { %v911_v33 = vcombine.low %v903_v3, %v910_v26  ;;  %v1334_v36 = vsel %vm2543_vm9, %v1329_v32, %v1333_v31  ;;  %v1511_v57 = vrot.slane %v1497_v54, %v2536_v28 }
  0x43   : > { %2188 = vmatpush3.bf16.msra.mxu0 %v2322_v42  ;;  %v1345_v37 = vcombine.low %v885_v13, %v1334_v36  ;;  %v2354_v42 = vld.sshfl [vmem:[%s2506_s9 + $0x8] sm:$0xf pattern:$0x76325410] }
  0x44   : > { %2189 = vmatprep.subr.bf16.mxu0 %v2411_v0  ;;  %2222 = vmatpush3.bf16.msra.mxu1 %v2331_v44  ;;  %v2340_v44 = vld [vmem:[%s2786_s1 + $0xc8] sm:$0xff]   ;;  %v1512_v23 = vcombine.low %v2642_v50, %v1511_v57 }
  0x45   : > { %2223 = vmatprep.subr.bf16.mxu1 %v2411_v0  ;;  %v1359_v39 = vrot.slane %v1345_v37, %v2536_v28 }
  0x47   : > { %2190 = vmatpush3.bf16.msra.mxu0 %v2324_v52  ;;  %v1360_v40 = vcombine.low %v2595_v17, %v1359_v39  ;;  %v1168_v17 = vcombine.low %v2354_v42, %v2355_v43  ;;  %v2347_v52 = vld [vmem:[%s2786_s1 + $0x110] sm:$0xff]   ;;  %v2105_v43 = vld [vmem:[#allocation2] ss:$0 sm:$0xff] }
  0x48   : > { %2207 = vmatprep.subr.bf16.mxu0 %v2411_v0  ;;  %2224 = vmatpush3.bf16.msra.mxu1 %v2333_v2 }
  0x49   : > { %2225 = vmatprep.subr.bf16.mxu1 %v2411_v0 }
  0x4a   : > { %2192 = vmatmul.mubr.msk.bf16.vlgmr.msra.gmra.mxu0 %vm392_vm6, %v614_v1 }
  0x4b   : > { %2208 = vmatpush3.bf16.msra.mxu0 %v2326_v59  ;;  %2215 = vmatprep.mubr.msk.bf16.mxu0 %vm2412_vm0, %v2411_v0 }
  0x4c   : > { %2209 = vmatprep.subr.bf16.mxu0 %v2411_v0  ;;  %2226 = vmatpush3.bf16.msra.mxu1 %v2335_v9 }
  0x4d   : > { %2243 = vmatprep.subr.bf16.mxu1 %v2411_v0 }
  0x4f   : > { %2210 = vmatpush3.bf16.msra.mxu0 %v2330_v12  ;;  %2228 = vmatmul.mubr.msk.bf16.vlgmr.msra.gmra.mxu1 %vm392_vm6, %v1063_v14 }
  0x50   : > { %2211 = vmatprep.subr.bf16.mxu0 %v2411_v0  ;;  %2244 = vmatpush3.bf16.msra.mxu1 %v2337_v19 }
  0x51   : > { %2251 = vmatprep.mubr.msk.bf16.mxu1 %vm2412_vm0, %v2411_v0  ;;  %2245 = vmatprep.subr.bf16.mxu1 %v2411_v0 }
  0x53   : > { %2212 = vmatpush3.bf16.msra.mxu0 %v2332_v22 }
  0x54   : > { %2213 = vmatprep.subr.bf16.mxu0 %v2411_v0  ;;  %2246 = vmatpush3.bf16.msra.mxu1 %v2339_v27 }
  0x55   : > { %2247 = vmatprep.subr.bf16.mxu1 %v2411_v0 }
  0x57   : > { %2214 = vmatpush3.bf16.msra.mxu0 %v2334_v29 }
  0x58   : > { %2231 = vmatprep.subr.bf16.mxu0 %v2411_v0  ;;  %2248 = vmatpush3.bf16.msra.mxu1 %v2341_v34 }
  0x59   : > { %2249 = vmatprep.subr.bf16.mxu1 %v2411_v0 }
  0x5a   : > { %2216 = vmatmul.mubr.msk.bf16.vlgmr.msra.gmra.mxu0 %vm392_vm6, %v911_v33 }
  0x5b   : > { %2232 = vmatpush3.bf16.msra.mxu0 %v2336_v35  ;;  %2239 = vmatprep.mubr.msk.bf16.mxu0 %vm2412_vm0, %v2411_v0 }
  0x5c   : > { %2233 = vmatprep.subr.bf16.mxu0 %v2411_v0  ;;  %2250 = vmatpush3.bf16.msra.mxu1 %v2343_v38 }
  0x5f   : > { %2234 = vmatpush3.bf16.msra.mxu0 %v2338_v41  ;;  %2252 = vmatmul.mubr.msk.bf16.vlgmr.msra.gmra.mxu1 %vm392_vm6, %v1360_v40 }
  0x60   : > { %2235 = vmatprep.subr.bf16.mxu0 %v2411_v0 }
  0x63   : > { %2236 = vmatpush3.bf16.msra.mxu0 %v2340_v44 }
  0x64   : > { %2237 = vmatprep.subr.bf16.mxu0 %v2411_v0 }
  0x67   : > { %2238 = vmatpush3.bf16.msra.mxu0 %v2342_v46 }
  0x68   : > { %2255 = vmatprep.subr.bf16.mxu0 %v2411_v0 }
  0x6a   : > { %2240 = vmatmul.mubr.msk.bf16.vlgmr.msra.gmra.mxu0 %vm392_vm6, %v1168_v17 }
  0x6b   : > { %2256 = vmatpush3.bf16.msra.mxu0 %v2346_v48  ;;  %2263 = vmatprep.mubr.msk.bf16.mxu0 %vm2412_vm0, %v2411_v0  ;;  %vm1787_vm0 = vcmask 1041409  }
  0x6c   : > { %2257 = vmatprep.subr.bf16.mxu0 %v2411_v0 }
  0x6f   : > { %2258 = vmatpush3.bf16.msra.mxu0 %v2347_v52  ;;  %v1671_v52 = vunpack.c.l.s4 %v2414_v51 }
  0x70   : > { %2259 = vmatprep.subr.bf16.mxu0 %v2411_v0 }
  0x73   : > { %2260 = vmatpush3.bf16.msra.mxu0 %v2348_v56 }
  0x74   : > { %2261 = vmatprep.subr.bf16.mxu0 %v2411_v0 }
  0x77   : > { %2262 = vmatpush3.bf16.msra.mxu0 %v2349_v58 }
  0x7a   : > { %2264 = vmatmul.mubr.msk.bf16.vlgmr.msra.gmra.mxu0 %vm392_vm6, %v1512_v23 }
  0xee   : > { %v519_v59 = vpop.f32.mrf.mxu1 }
  0xf0   : > { %v2181_v60 = vpop.f32.mrf.mxu1 }
  0xf1   : > { %v1672_v60 = vunpack.c.0.s8 %v1671_v52 }
  0xf2   : > { %v522_v61 = vpop.f32.mrf.mxu1 }
  0xf4   : > { %v2182_v62 = vpop.f32.mrf.mxu1 }
  0xfa   : > { %v430_v1 = vpop.f32.mrf.mxu0 }
  0xfb   : > { %v520_v55 = vadd.f32 %v519_v59, %v430_v1 }
  0xfc   : > { %v2169_v2 = vpop.f32.mrf.mxu0 }
  0xfe   : > { %v433_v4 = vpop.f32.mrf.mxu0 }
  0xff   : > { %v781_v6 = vpop.f32.mrf.mxu1  ;;  %v523_v27 = vadd.f32 %v522_v61, %v433_v4  ;;  %v2415_v61 = vmov 1935823168  }
 0x100   : > { %v2170_v5 = vpop.f32.mrf.mxu0  ;;  %v1727_v62 = vunpack.c.l.s4 %v2415_v61 }
 0x101   : > { %v2205_v7 = vpop.f32.mrf.mxu1 }
 0x103   : > { %v784_v8 = vpop.f32.mrf.mxu1 }
 0x105   : > { %v2206_v9 = vpop.f32.mrf.mxu1 }
 0x106   : > { %v1675_v9 = vsub.s32 %v1672_v60, %v2515_v11 }
 0x10a   : > { %v676_v10 = vpop.f32.mrf.mxu0 }
 0x10b   : > { %v683_v3 = vadd.f32 %v676_v10, %v520_v55  ;;  %v1728_v10 = vunpack.c.0.s8 %v1727_v62 }
 0x10c   : > { %v2193_v12 = vpop.f32.mrf.mxu0 }
 0x10d   : > { %v788_v30 = vadd.f32 %v781_v6, %v683_v3 }
 0x10e   : > { %v679_v0 = vpop.f32.mrf.mxu0 }
 0x10f   : > { %v1125_v50 = vpop.f32.mrf.mxu1  ;;  %v684_v31 = vadd.f32 %v679_v0, %v523_v27 }
 0x110   : > { %v2194_v13 = vpop.f32.mrf.mxu0 }
 0x111   : > { %v2229_v14 = vpop.f32.mrf.mxu1  ;;  %v789_v35 = vadd.f32 %v784_v8, %v684_v31 }
 0x113   : > { %v1128_v15 = vpop.f32.mrf.mxu1 }
 0x115   : > { %v2230_v16 = vpop.f32.mrf.mxu1 }
 0x11a   : > { %v973_v18 = vpop.f32.mrf.mxu0 }
 0x11b   : > { %v980_v33 = vadd.f32 %v973_v18, %v788_v30 }
 0x11c   : > { %v2217_v19 = vpop.f32.mrf.mxu0 }
 0x11d   : > { %v1132_v36 = vadd.f32 %v1125_v50, %v980_v33 }
 0x11e   : > { %v976_v20 = vpop.f32.mrf.mxu0 }
 0x11f   : > { %v1422_v22 = vpop.f32.mrf.mxu1  ;;  %v981_v37 = vadd.f32 %v976_v20, %v789_v35  ;;  %v1731_v20 = vsub.s32 %v1728_v10, %v2515_v11 }
 0x120   : > { %v2218_v21 = vpop.f32.mrf.mxu0 }
 0x121   : > { %v2253_v24 = vpop.f32.mrf.mxu1  ;;  %v1133_v39 = vadd.f32 %v1128_v15, %v981_v37 }
 0x123   : > { %v1425_v25 = vpop.f32.mrf.mxu1 }
 0x125   : > { %v2254_v63 = vpop.f32.mrf.mxu1 }
 0x12a   : > { %v1230_v26 = vpop.f32.mrf.mxu0 }
 0x12b   : > { %v1237_v38 = vadd.f32 %v1230_v26, %v1132_v36 }
 0x12c   : > { %v2241_v29 = vpop.f32.mrf.mxu0 }
 0x12d   : > { %v1429_v41 = vadd.f32 %v1422_v22, %v1237_v38 }
 0x12e   : > { %v1233_v32 = vpop.f32.mrf.mxu0 }
 0x12f   : > { %v1238_v40 = vadd.f32 %v1233_v32, %v1133_v39 }
 0x130   : > { %v2242_v34 = vpop.f32.mrf.mxu0 }
 0x131   : > { %v1430_v46 = vadd.f32 %v1425_v25, %v1238_v40 }
 0x13a   : > { %v1574_v42 = vpop.f32.mrf.mxu0 }
 0x13b   : > { %v1581_v44 = vadd.f32 %v1574_v42, %v1429_v41 }
 0x13c   : > { %v2265_v45 = vpop.f32.mrf.mxu0 }
 0x13d   : > { %v1590_v47 = vadd.f32 %v2105_v43, %v1581_v44 }
 0x13e   : > { %v1577_v17 = vpop.f32.mrf.mxu0 }
 0x13f   : > { %v1592_v48 = vmax.f32 %v1590_v47, 0.0  ;;  %v1582_v49 = vadd.f32 %v1577_v17, %v1430_v46 }
 0x140   : > { %v2266_v53 = vpop.f32.mrf.mxu0 }
 0x141   : > { %v1596_v54 = vcombine.high %v1592_v48, %v1592_v48  ;;  %v1603_v56 = vrot.slane %v1592_v48, %v2536_v28  ;;  %v1591_v57 = vadd.f32 %v2105_v43, %v1582_v49 }
 0x143   : > { %v1610_v58 = vrot.slane %v1596_v54, %v2536_v28  ;;  %v1593_v23 = vmax.f32 %v1591_v57, 0.0  ;;  %v1611_v59 = vcombine.high %v1603_v56, %v1603_v56 }
 0x145   : > { %v1612_v1 = vcombine.high %v1610_v58, %v1610_v58  ;;  %v1638_v2 = vmax.f32 %v1603_v56, %v1610_v58  ;;  %v1613_v4 = vcombine.high %v1593_v23, %v1593_v23  ;;  %v1620_v5 = vrot.slane %v1593_v23, %v2536_v28 }
 0x147   : > { %v1639_v6 = vmax.f32 %v1611_v59, %v1612_v1  ;;  %v2106_v7 = vrot.slane %v1638_v2, 9  ;;  %v1627_v8 = vrot.slane %v1613_v4, %v2536_v28  ;;  %v1628_v12 = vcombine.high %v1620_v5, %v1620_v5 }
 0x149   : > { %v2107_v0 = vrot.slane %v1639_v6, 9  ;;  %v1658_v13 = vmax.f32 %v1638_v2, %v2106_v7  ;;  %v1629_v50 = vcombine.high %v1627_v8, %v1627_v8  ;;  %v1640_v14 = vmax.f32 %v1620_v5, %v1627_v8 }
 0x14b   : > { %v1659_v15 = vmax.f32 %v1639_v6, %v2107_v0  ;;  %v1662_v16 = vpack.c.bf16 %v1658_v13, %v1658_v13  ;;  %v1641_v18 = vmax.f32 %v1628_v12, %v1629_v50  ;;  %v2108_v19 = vrot.slane %v1640_v14, 9 }
 0x14d   : > { %v1663_v21 = vpack.c.bf16 %v1659_v15, %v1659_v15  ;;  %v1676_v22 = vrot.slane %v1662_v16, %v1675_v9  ;;  %v2109_v24 = vrot.slane %v1641_v18, 9  ;;  %v1660_v25 = vmax.f32 %v1640_v14, %v2108_v19 }
 0x14f   : > { %v1683_v55 = vrot.slane %v1676_v22, %v1675_v9  ;;  %v1690_v28 = vrot.slane %v1663_v21, %v1675_v9  ;;  %v1661_v63 = vmax.f32 %v1641_v18, %v2109_v24  ;;  %v1664_v3 = vpack.c.bf16 %v1660_v25, %v1660_v25 }
 0x151   : > { %v1697_v26 = vrot.slane %v1690_v28, %v1675_v9  ;;  %v1732_v27 = vrot.slane %v1683_v55, %v1731_v20  ;;  %v1665_v29 = vpack.c.bf16 %v1661_v63, %v1661_v63  ;;  %v1704_v30 = vrot.slane %v1664_v3, %v1675_v9 }
 0x153   : > { %v1746_v31 = vrot.slane %v1697_v26, %v1731_v20  ;;  %v1711_v32 = vrot.slane %v1704_v30, %v1675_v9  ;;  %v1718_v33 = vrot.slane %v1665_v29, %v1675_v9  ;;  %v1739_v34 = vrot.slane %v1732_v27, %v1731_v20 }
 0x155   : > { %v1753_v35 = vrot.slane %v1746_v31, %v1731_v20  ;;  %v1725_v36 = vrot.slane %v1718_v33, %v1675_v9  ;;  %v1760_v11 = vrot.slane %v1711_v32, %v1731_v20  ;;  %v1782_v39 = vunpack.c.l.b16 %v1739_v34 }
 0x157   : > { %v1783_v37 = vunpack.c.l.b16 %v1753_v35  ;;  %v1774_v38 = vrot.slane %v1725_v36, %v1731_v20  ;;  %v1767_v40 = vrot.slane %v1760_v11, %v1731_v20 }
 0x159   : > { %v1786_v41 = vrot.slane %v1783_v37, 7  ;;  %v1781_v42 = vrot.slane %v1774_v38, %v1731_v20  ;;  %v1784_v46 = vunpack.c.l.b16 %v1767_v40 }
 0x15b   : > { %v1788_v43 = vsel %vm1787_vm0, %v1786_v41, %v1782_v39  ;;  %v1785_v44 = vunpack.c.l.b16 %v1781_v42 }
 0x15c   : > { %v1791_v45 = vpack.c.b16 %v1788_v43, %v1788_v43 }
 0x15d   : > { %v1789_v47 = vrot.slane %v1785_v44, 7 }
 0x15e   : > { %v1799_v17 = vrot.slane %v1791_v45, %v1675_v9 }
 0x15f   : > { %v1790_v48 = vsel %vm1787_vm0, %v1789_v47, %v1784_v46 }
 0x160   : > { %2110 = vst.sshfl [vmem:[%s225_s10] sm:$0x1 pattern:$0x73625140] %v1799_v17  ;;  %v1792_v49 = vpack.c.b16 %v1790_v48, %v1790_v48 }
 0x162   : > { %v1813_v51 = vrot.slane %v1792_v49, %v1675_v9 }
 0x164   : > { %2111 = vst.sshfl [vmem:[%s225_s10 + $0x1] sm:$0x1 pattern:$0x73625140] %v1813_v51 }
 0x165 PF: > { %s14_s14 = sadd.s32 1, %s2408_s14   ;;  %s2799_s12 = smov %s2404_s13 }
 0x166   : > { %p11_p2 = scmp.ge.s32.totalorder %s14_s14, 4   ;;  %s2800_s13 = smov %s2802_s16 }
 0x168   :  { %13 = sbr.rel (!%p11_p2) target bundleno = 2 (0x2), region = 81 }
 0x16d   :  { %1850 = vsyncpa [#allocation3], 1 }
 0x16e   :  { %1852 = vsyncpa [#allocation3 + $0x1], 1 }

// kernel: vgg_forward.6
= control target key start
LH: loop header
LB: loop body
LE: loop exit
PB: predicated region body
PF: predicated region fallthrough
CT: control target
= control target key end

     0   :  { %s3302_s12 = smov 0   ;;  %s3304_s13 = smov 0   ;;  %s3937_s0 = inlined_call_operand.vmem [shape: bf16[2,4,4,128], index: 0, kind: input, shape index: {}]   ;;  %s3938_s1 = inlined_call_operand.vmem [shape: bf16[3,3,128,512], index: 1, kind: input, shape index: {}]   ;;  %s3939_s2 = inlined_call_operand.vmem [shape: f32[1,512], index: 2, kind: input, shape index: {}]   ;;  %s3940_s3 = inlined_call_operand.vmem [shape: bf16[2,1,1,512], index: 3, kind: output, shape index: {}]  }
   0x1   :  { %s3306_s14 = smov 0   ;;  %s3308_s15 = smov 0  }
   0x2   :  { %s3310_s16 = smov 0   ;;  %s3312_s17 = smov 0  }
   0x3   :  { %s3314_s18 = smov 0  }
   0x4 LB: > { %s22_s19 = sadd.s32 1, %s3269_s16  ;;  %s25_s20 = sadd.s32 1, %s3273_s17  ;;  %s3277_s18 = sphi %s3314_s18, %s13_s18   ;;  %s3273_s17 = sphi %s3312_s17, %s3950_s17   ;;  %s3269_s16 = sphi %s3310_s16, %s3949_s16   ;;  %s3265_s15 = sphi %s3308_s15, %s3948_s15   ;;  %s3261_s14 = sphi %s3306_s14, %s3947_s14   ;;  %s3257_s13 = sphi %s3304_s13, %s3946_s13   ;;  %s3253_s12 = sphi %s3302_s12, %s3945_s12  }
   0x5   : > { %p23_p0 = scmp.ge.s32.totalorder %s22_s19, 2  ;;  %s58_s21 = sadd.s32 1, %s3257_s13 }
   0x6   : > { %p65_p1 = scmp.ne.s32.totalorder %s3257_s13, %s3253_s12  ;;  %p66_p2 = scmp.eq.s32.totalorder %s3277_s18, 0 }
   0x7   : > { %s3952_s19 = smov (%p23_p0, %s22_s19), 0  ;;  %s3954_s20 = smov (!%p23_p0, %s25_s20), %s3273_s17 }
   0x8   : > { %s55_s22 = ssub.s32 %s3269_s16, %s3952_s19  ;;  %p67_p3 = por %p66_p2, %p65_p1 }
   0x9   : > { %p27_p4 = scmp.ge.s32.totalorder %s3954_s20, 2  ;;  %p56_p5 = scmp.eq.s32.totalorder %s55_s22, 0 }
   0xa   : > { %p2626_p6 = scmp.ge.s32.totalorder %s3277_s18, 4 }
   0xb   : > { %s3956_s20 = smov (%p27_p4, %s3954_s20), 0 }
   0xc   : > { %s3351_s23 = scalar_select %p56_p5, %s3257_s13, %s58_s21  }
   0xd   : > { %145 = sbr.rel (%p2626_p6) target bundleno = 94 (0x5e), region = 16 }
  0x12   : > { %156 = sbr.rel (!%p67_p3) target bundleno = 94 (0x5e), region = 24  ;;  %s158_s24 = sand.u32 (%p67_p3), 1, %s3257_s13  }
  0x13   : > { %s2944_s25 = sshll.u32 (%p67_p3), %s3269_s16, 3  ;;  %s2946_s26 = smul.u32 (%p67_p3), 1152, %s158_s24 }
  0x14   : > { %s3359_s29 = scalar_lea.vmem (%p67_p3), %s3938_s1, %s2944_s25 }
  0x15   : > { %v478_v0 = vld [vmem:[%s3359_s29] sm:$0xff] (%p67_p3)  ;;  %v480_v1 = vld [vmem:[%s3359_s29 + $0x10] sm:$0xff] (%p67_p3)  ;;  %s3367_s30 = scalar_lea.vmem (%p67_p3), [#allocation2], %s2946_s26 }
  0x16   : > { %v482_v2 = vld [vmem:[%s3359_s29 + $0x20] sm:$0xff] (%p67_p3)  ;;  %v484_v3 = vld [vmem:[%s3359_s29 + $0x30] sm:$0xff] (%p67_p3)  ;;  %479 = vst [vmem:[%s3367_s30] sm:$0xff] (%p67_p3), %v478_v0  ;;  %481 = vst [vmem:[%s3367_s30 + $0x8] sm:$0xff] (%p67_p3), %v480_v1 }
  0x17   : > { %v486_v4 = vld [vmem:[%s3359_s29 + $0x40] sm:$0xff]  ;;  %v488_v5 = vld [vmem:[%s3359_s29 + $0x50] sm:$0xff]  ;;  %483 = vst [vmem:[%s3367_s30 + $0x10] sm:$0xff] %v482_v2  ;;  %485 = vst [vmem:[%s3367_s30 + $0x18] sm:$0xff] %v484_v3 }
  0x18   : > { %487 = vst [vmem:[%s3367_s30 + $0x20] sm:$0xff] %v486_v4  ;;  %489 = vst [vmem:[%s3367_s30 + $0x28] sm:$0xff] %v488_v5  ;;  %v490_v6 = vld [vmem:[%s3359_s29 + $0x60] sm:$0xff]  ;;  %v492_v7 = vld [vmem:[%s3359_s29 + $0x70] sm:$0xff] }
  0x19   : > { %v494_v8 = vld [vmem:[%s3359_s29 + $0x80] sm:$0xff]  ;;  %491 = vst [vmem:[%s3367_s30 + $0x30] sm:$0xff] %v490_v6  ;;  %493 = vst [vmem:[%s3367_s30 + $0x38] sm:$0xff] %v492_v7  ;;  %v496_v9 = vld [vmem:[%s3359_s29 + $0x90] sm:$0xff] }
  0x1a   : > { %495 = vst [vmem:[%s3367_s30 + $0x40] sm:$0xff] %v494_v8  ;;  %v498_v10 = vld [vmem:[%s3359_s29 + $0xa0] sm:$0xff]  ;;  %v500_v11 = vld [vmem:[%s3359_s29 + $0xb0] sm:$0xff]  ;;  %497 = vst [vmem:[%s3367_s30 + $0x48] sm:$0xff] %v496_v9 }
  0x1b   : > { %499 = vst [vmem:[%s3367_s30 + $0x50] sm:$0xff] %v498_v10  ;;  %501 = vst [vmem:[%s3367_s30 + $0x58] sm:$0xff] %v500_v11  ;;  %v502_v12 = vld [vmem:[%s3359_s29 + $0xc0] sm:$0xff]  ;;  %v504_v13 = vld [vmem:[%s3359_s29 + $0xd0] sm:$0xff] }
  0x1c   : > { %v506_v14 = vld [vmem:[%s3359_s29 + $0xe0] sm:$0xff]  ;;  %503 = vst [vmem:[%s3367_s30 + $0x60] sm:$0xff] %v502_v12  ;;  %505 = vst [vmem:[%s3367_s30 + $0x68] sm:$0xff] %v504_v13  ;;  %v508_v15 = vld [vmem:[%s3359_s29 + $0xf0] sm:$0xff] }
  0x1d   : > { %507 = vst [vmem:[%s3367_s30 + $0x70] sm:$0xff] %v506_v14  ;;  %v510_v16 = vld [vmem:[%s3359_s29 + $0x100] sm:$0xff]  ;;  %v512_v17 = vld [vmem:[%s3359_s29 + $0x110] sm:$0xff]  ;;  %509 = vst [vmem:[%s3367_s30 + $0x78] sm:$0xff] %v508_v15 }
  0x1e   : > { %511 = vst [vmem:[%s3367_s30 + $0x80] sm:$0xff] %v510_v16  ;;  %513 = vst [vmem:[%s3367_s30 + $0x88] sm:$0xff] %v512_v17  ;;  %v514_v18 = vld [vmem:[%s3359_s29 + $0x120] sm:$0xff]  ;;  %v516_v19 = vld [vmem:[%s3359_s29 + $0x130] sm:$0xff] }
  0x1f   : > { %v518_v20 = vld [vmem:[%s3359_s29 + $0x140] sm:$0xff]  ;;  %515 = vst [vmem:[%s3367_s30 + $0x90] sm:$0xff] %v514_v18  ;;  %517 = vst [vmem:[%s3367_s30 + $0x98] sm:$0xff] %v516_v19  ;;  %v520_v21 = vld [vmem:[%s3359_s29 + $0x150] sm:$0xff] }
  0x20   : > { %519 = vst [vmem:[%s3367_s30 + $0xa0] sm:$0xff] %v518_v20  ;;  %v522_v22 = vld [vmem:[%s3359_s29 + $0x160] sm:$0xff]  ;;  %v524_v23 = vld [vmem:[%s3359_s29 + $0x170] sm:$0xff]  ;;  %521 = vst [vmem:[%s3367_s30 + $0xa8] sm:$0xff] %v520_v21 }
  0x21   : > { %523 = vst [vmem:[%s3367_s30 + $0xb0] sm:$0xff] %v522_v22  ;;  %525 = vst [vmem:[%s3367_s30 + $0xb8] sm:$0xff] %v524_v23  ;;  %v526_v24 = vld [vmem:[%s3359_s29 + $0x180] sm:$0xff]  ;;  %v528_v25 = vld [vmem:[%s3359_s29 + $0x190] sm:$0xff] }
  0x22   : > { %v530_v26 = vld [vmem:[%s3359_s29 + $0x1a0] sm:$0xff]  ;;  %527 = vst [vmem:[%s3367_s30 + $0xc0] sm:$0xff] %v526_v24  ;;  %529 = vst [vmem:[%s3367_s30 + $0xc8] sm:$0xff] %v528_v25  ;;  %v532_v27 = vld [vmem:[%s3359_s29 + $0x1b0] sm:$0xff] }
  0x23   : > { %531 = vst [vmem:[%s3367_s30 + $0xd0] sm:$0xff] %v530_v26  ;;  %v534_v28 = vld [vmem:[%s3359_s29 + $0x1c0] sm:$0xff]  ;;  %v536_v29 = vld [vmem:[%s3359_s29 + $0x1d0] sm:$0xff]  ;;  %533 = vst [vmem:[%s3367_s30 + $0xd8] sm:$0xff] %v532_v27 }
  0x24   : > { %535 = vst [vmem:[%s3367_s30 + $0xe0] sm:$0xff] %v534_v28  ;;  %537 = vst [vmem:[%s3367_s30 + $0xe8] sm:$0xff] %v536_v29  ;;  %v538_v30 = vld [vmem:[%s3359_s29 + $0x1e0] sm:$0xff]  ;;  %v540_v31 = vld [vmem:[%s3359_s29 + $0x1f0] sm:$0xff] }
  0x25   : > { %v542_v32 = vld [vmem:[%s3359_s29 + $0x200] sm:$0xff]  ;;  %539 = vst [vmem:[%s3367_s30 + $0xf0] sm:$0xff] %v538_v30  ;;  %541 = vst [vmem:[%s3367_s30 + $0xf8] sm:$0xff] %v540_v31  ;;  %v544_v33 = vld [vmem:[%s3359_s29 + $0x210] sm:$0xff] }
  0x26   : > { %543 = vst [vmem:[%s3367_s30 + $0x100] sm:$0xff] %v542_v32  ;;  %v546_v34 = vld [vmem:[%s3359_s29 + $0x220] sm:$0xff]  ;;  %v548_v35 = vld [vmem:[%s3359_s29 + $0x230] sm:$0xff]  ;;  %545 = vst [vmem:[%s3367_s30 + $0x108] sm:$0xff] %v544_v33 }
  0x27   : > { %547 = vst [vmem:[%s3367_s30 + $0x110] sm:$0xff] %v546_v34  ;;  %549 = vst [vmem:[%s3367_s30 + $0x118] sm:$0xff] %v548_v35  ;;  %v550_v36 = vld [vmem:[%s3359_s29 + $0x240] sm:$0xff]  ;;  %v552_v37 = vld [vmem:[%s3359_s29 + $0x250] sm:$0xff] }
  0x28   : > { %v554_v38 = vld [vmem:[%s3359_s29 + $0x260] sm:$0xff]  ;;  %551 = vst [vmem:[%s3367_s30 + $0x120] sm:$0xff] %v550_v36  ;;  %553 = vst [vmem:[%s3367_s30 + $0x128] sm:$0xff] %v552_v37  ;;  %v556_v39 = vld [vmem:[%s3359_s29 + $0x270] sm:$0xff] }
  0x29   : > { %555 = vst [vmem:[%s3367_s30 + $0x130] sm:$0xff] %v554_v38  ;;  %v558_v40 = vld [vmem:[%s3359_s29 + $0x280] sm:$0xff]  ;;  %v560_v41 = vld [vmem:[%s3359_s29 + $0x290] sm:$0xff]  ;;  %557 = vst [vmem:[%s3367_s30 + $0x138] sm:$0xff] %v556_v39 }
  0x2a   : > { %559 = vst [vmem:[%s3367_s30 + $0x140] sm:$0xff] %v558_v40  ;;  %561 = vst [vmem:[%s3367_s30 + $0x148] sm:$0xff] %v560_v41  ;;  %v562_v42 = vld [vmem:[%s3359_s29 + $0x2a0] sm:$0xff]  ;;  %v564_v43 = vld [vmem:[%s3359_s29 + $0x2b0] sm:$0xff] }
  0x2b   : > { %v566_v44 = vld [vmem:[%s3359_s29 + $0x2c0] sm:$0xff]  ;;  %563 = vst [vmem:[%s3367_s30 + $0x150] sm:$0xff] %v562_v42  ;;  %565 = vst [vmem:[%s3367_s30 + $0x158] sm:$0xff] %v564_v43  ;;  %v568_v45 = vld [vmem:[%s3359_s29 + $0x2d0] sm:$0xff] }
  0x2c   : > { %567 = vst [vmem:[%s3367_s30 + $0x160] sm:$0xff] %v566_v44  ;;  %v570_v46 = vld [vmem:[%s3359_s29 + $0x2e0] sm:$0xff]  ;;  %v572_v47 = vld [vmem:[%s3359_s29 + $0x2f0] sm:$0xff]  ;;  %569 = vst [vmem:[%s3367_s30 + $0x168] sm:$0xff] %v568_v45 }
  0x2d   : > { %571 = vst [vmem:[%s3367_s30 + $0x170] sm:$0xff] %v570_v46  ;;  %573 = vst [vmem:[%s3367_s30 + $0x178] sm:$0xff] %v572_v47  ;;  %v574_v48 = vld [vmem:[%s3359_s29 + $0x300] sm:$0xff]  ;;  %v576_v49 = vld [vmem:[%s3359_s29 + $0x310] sm:$0xff] }
  0x2e   : > { %v578_v50 = vld [vmem:[%s3359_s29 + $0x320] sm:$0xff]  ;;  %575 = vst [vmem:[%s3367_s30 + $0x180] sm:$0xff] %v574_v48  ;;  %577 = vst [vmem:[%s3367_s30 + $0x188] sm:$0xff] %v576_v49  ;;  %v580_v51 = vld [vmem:[%s3359_s29 + $0x330] sm:$0xff] }
  0x2f   : > { %579 = vst [vmem:[%s3367_s30 + $0x190] sm:$0xff] %v578_v50  ;;  %v582_v52 = vld [vmem:[%s3359_s29 + $0x340] sm:$0xff]  ;;  %v584_v53 = vld [vmem:[%s3359_s29 + $0x350] sm:$0xff]  ;;  %581 = vst [vmem:[%s3367_s30 + $0x198] sm:$0xff] %v580_v51 }
  0x30   : > { %583 = vst [vmem:[%s3367_s30 + $0x1a0] sm:$0xff] %v582_v52  ;;  %585 = vst [vmem:[%s3367_s30 + $0x1a8] sm:$0xff] %v584_v53  ;;  %v586_v54 = vld [vmem:[%s3359_s29 + $0x360] sm:$0xff]  ;;  %v588_v55 = vld [vmem:[%s3359_s29 + $0x370] sm:$0xff] }
  0x31   : > { %v590_v56 = vld [vmem:[%s3359_s29 + $0x380] sm:$0xff]  ;;  %587 = vst [vmem:[%s3367_s30 + $0x1b0] sm:$0xff] %v586_v54  ;;  %589 = vst [vmem:[%s3367_s30 + $0x1b8] sm:$0xff] %v588_v55  ;;  %v592_v57 = vld [vmem:[%s3359_s29 + $0x390] sm:$0xff] }
  0x32   : > { %591 = vst [vmem:[%s3367_s30 + $0x1c0] sm:$0xff] %v590_v56  ;;  %v594_v58 = vld [vmem:[%s3359_s29 + $0x3a0] sm:$0xff]  ;;  %v596_v59 = vld [vmem:[%s3359_s29 + $0x3b0] sm:$0xff]  ;;  %593 = vst [vmem:[%s3367_s30 + $0x1c8] sm:$0xff] %v592_v57 }
  0x33   : > { %595 = vst [vmem:[%s3367_s30 + $0x1d0] sm:$0xff] %v594_v58  ;;  %597 = vst [vmem:[%s3367_s30 + $0x1d8] sm:$0xff] %v596_v59  ;;  %v598_v60 = vld [vmem:[%s3359_s29 + $0x3c0] sm:$0xff]  ;;  %v600_v61 = vld [vmem:[%s3359_s29 + $0x3d0] sm:$0xff] }
  0x34   : > { %v602_v62 = vld [vmem:[%s3359_s29 + $0x3e0] sm:$0xff]  ;;  %599 = vst [vmem:[%s3367_s30 + $0x1e0] sm:$0xff] %v598_v60  ;;  %601 = vst [vmem:[%s3367_s30 + $0x1e8] sm:$0xff] %v600_v61  ;;  %v604_v63 = vld [vmem:[%s3359_s29 + $0x3f0] sm:$0xff] }
  0x35   : > { %603 = vst [vmem:[%s3367_s30 + $0x1f0] sm:$0xff] %v602_v62  ;;  %v606_v0 = vld [vmem:[%s3359_s29 + $0x400] sm:$0xff]  ;;  %v608_v1 = vld [vmem:[%s3359_s29 + $0x410] sm:$0xff]  ;;  %605 = vst [vmem:[%s3367_s30 + $0x1f8] sm:$0xff] %v604_v63 }
  0x36   : > { %607 = vst [vmem:[%s3367_s30 + $0x200] sm:$0xff] %v606_v0  ;;  %609 = vst [vmem:[%s3367_s30 + $0x208] sm:$0xff] %v608_v1  ;;  %v610_v2 = vld [vmem:[%s3359_s29 + $0x420] sm:$0xff]  ;;  %v612_v3 = vld [vmem:[%s3359_s29 + $0x430] sm:$0xff] }
  0x37   : > { %v614_v4 = vld [vmem:[%s3359_s29 + $0x440] sm:$0xff]  ;;  %611 = vst [vmem:[%s3367_s30 + $0x210] sm:$0xff] %v610_v2  ;;  %613 = vst [vmem:[%s3367_s30 + $0x218] sm:$0xff] %v612_v3  ;;  %v616_v5 = vld [vmem:[%s3359_s29 + $0x450] sm:$0xff] }
  0x38   : > { %615 = vst [vmem:[%s3367_s30 + $0x220] sm:$0xff] %v614_v4  ;;  %v618_v6 = vld [vmem:[%s3359_s29 + $0x460] sm:$0xff]  ;;  %v620_v7 = vld [vmem:[%s3359_s29 + $0x470] sm:$0xff]  ;;  %617 = vst [vmem:[%s3367_s30 + $0x228] sm:$0xff] %v616_v5 }
  0x39   : > { %619 = vst [vmem:[%s3367_s30 + $0x230] sm:$0xff] %v618_v6  ;;  %621 = vst [vmem:[%s3367_s30 + $0x238] sm:$0xff] %v620_v7  ;;  %v622_v8 = vld [vmem:[%s3359_s29 + $0x480] sm:$0xff]  ;;  %v624_v9 = vld [vmem:[%s3359_s29 + $0x490] sm:$0xff] }
  0x3a   : > { %v626_v10 = vld [vmem:[%s3359_s29 + $0x4a0] sm:$0xff]  ;;  %623 = vst [vmem:[%s3367_s30 + $0x240] sm:$0xff] %v622_v8  ;;  %625 = vst [vmem:[%s3367_s30 + $0x248] sm:$0xff] %v624_v9  ;;  %v628_v11 = vld [vmem:[%s3359_s29 + $0x4b0] sm:$0xff] }
  0x3b   : > { %627 = vst [vmem:[%s3367_s30 + $0x250] sm:$0xff] %v626_v10  ;;  %v630_v12 = vld [vmem:[%s3359_s29 + $0x4c0] sm:$0xff]  ;;  %v632_v13 = vld [vmem:[%s3359_s29 + $0x4d0] sm:$0xff]  ;;  %629 = vst [vmem:[%s3367_s30 + $0x258] sm:$0xff] %v628_v11 }
  0x3c   : > { %631 = vst [vmem:[%s3367_s30 + $0x260] sm:$0xff] %v630_v12  ;;  %633 = vst [vmem:[%s3367_s30 + $0x268] sm:$0xff] %v632_v13  ;;  %v634_v14 = vld [vmem:[%s3359_s29 + $0x4e0] sm:$0xff]  ;;  %v636_v15 = vld [vmem:[%s3359_s29 + $0x4f0] sm:$0xff] }
  0x3d   : > { %v638_v16 = vld [vmem:[%s3359_s29 + $0x500] sm:$0xff]  ;;  %635 = vst [vmem:[%s3367_s30 + $0x270] sm:$0xff] %v634_v14  ;;  %637 = vst [vmem:[%s3367_s30 + $0x278] sm:$0xff] %v636_v15  ;;  %v640_v17 = vld [vmem:[%s3359_s29 + $0x510] sm:$0xff] }
  0x3e   : > { %639 = vst [vmem:[%s3367_s30 + $0x280] sm:$0xff] %v638_v16  ;;  %v642_v18 = vld [vmem:[%s3359_s29 + $0x520] sm:$0xff]  ;;  %v644_v19 = vld [vmem:[%s3359_s29 + $0x530] sm:$0xff]  ;;  %641 = vst [vmem:[%s3367_s30 + $0x288] sm:$0xff] %v640_v17 }
  0x3f   : > { %643 = vst [vmem:[%s3367_s30 + $0x290] sm:$0xff] %v642_v18  ;;  %645 = vst [vmem:[%s3367_s30 + $0x298] sm:$0xff] %v644_v19  ;;  %v646_v20 = vld [vmem:[%s3359_s29 + $0x540] sm:$0xff]  ;;  %v648_v21 = vld [vmem:[%s3359_s29 + $0x550] sm:$0xff] }
  0x40   : > { %v650_v22 = vld [vmem:[%s3359_s29 + $0x560] sm:$0xff]  ;;  %647 = vst [vmem:[%s3367_s30 + $0x2a0] sm:$0xff] %v646_v20  ;;  %649 = vst [vmem:[%s3367_s30 + $0x2a8] sm:$0xff] %v648_v21  ;;  %v652_v23 = vld [vmem:[%s3359_s29 + $0x570] sm:$0xff] }
  0x41   : > { %651 = vst [vmem:[%s3367_s30 + $0x2b0] sm:$0xff] %v650_v22  ;;  %v654_v24 = vld [vmem:[%s3359_s29 + $0x580] sm:$0xff]  ;;  %v656_v25 = vld [vmem:[%s3359_s29 + $0x590] sm:$0xff]  ;;  %653 = vst [vmem:[%s3367_s30 + $0x2b8] sm:$0xff] %v652_v23 }
  0x42   : > { %655 = vst [vmem:[%s3367_s30 + $0x2c0] sm:$0xff] %v654_v24  ;;  %657 = vst [vmem:[%s3367_s30 + $0x2c8] sm:$0xff] %v656_v25  ;;  %v658_v26 = vld [vmem:[%s3359_s29 + $0x5a0] sm:$0xff]  ;;  %v660_v27 = vld [vmem:[%s3359_s29 + $0x5b0] sm:$0xff] }
  0x43   : > { %v662_v28 = vld [vmem:[%s3359_s29 + $0x5c0] sm:$0xff]  ;;  %659 = vst [vmem:[%s3367_s30 + $0x2d0] sm:$0xff] %v658_v26  ;;  %661 = vst [vmem:[%s3367_s30 + $0x2d8] sm:$0xff] %v660_v27  ;;  %v664_v29 = vld [vmem:[%s3359_s29 + $0x5d0] sm:$0xff] }
  0x44   : > { %663 = vst [vmem:[%s3367_s30 + $0x2e0] sm:$0xff] %v662_v28  ;;  %v666_v30 = vld [vmem:[%s3359_s29 + $0x5e0] sm:$0xff]  ;;  %v668_v31 = vld [vmem:[%s3359_s29 + $0x5f0] sm:$0xff]  ;;  %665 = vst [vmem:[%s3367_s30 + $0x2e8] sm:$0xff] %v664_v29 }
  0x45   : > { %667 = vst [vmem:[%s3367_s30 + $0x2f0] sm:$0xff] %v666_v30  ;;  %669 = vst [vmem:[%s3367_s30 + $0x2f8] sm:$0xff] %v668_v31  ;;  %v670_v32 = vld [vmem:[%s3359_s29 + $0x600] sm:$0xff]  ;;  %v672_v33 = vld [vmem:[%s3359_s29 + $0x610] sm:$0xff] }
  0x46   : > { %v674_v34 = vld [vmem:[%s3359_s29 + $0x620] sm:$0xff]  ;;  %671 = vst [vmem:[%s3367_s30 + $0x300] sm:$0xff] %v670_v32  ;;  %673 = vst [vmem:[%s3367_s30 + $0x308] sm:$0xff] %v672_v33  ;;  %v676_v35 = vld [vmem:[%s3359_s29 + $0x630] sm:$0xff] }
  0x47   : > { %675 = vst [vmem:[%s3367_s30 + $0x310] sm:$0xff] %v674_v34  ;;  %v678_v36 = vld [vmem:[%s3359_s29 + $0x640] sm:$0xff]  ;;  %v680_v37 = vld [vmem:[%s3359_s29 + $0x650] sm:$0xff]  ;;  %677 = vst [vmem:[%s3367_s30 + $0x318] sm:$0xff] %v676_v35 }
  0x48   : > { %679 = vst [vmem:[%s3367_s30 + $0x320] sm:$0xff] %v678_v36  ;;  %681 = vst [vmem:[%s3367_s30 + $0x328] sm:$0xff] %v680_v37  ;;  %v682_v38 = vld [vmem:[%s3359_s29 + $0x660] sm:$0xff]  ;;  %v684_v39 = vld [vmem:[%s3359_s29 + $0x670] sm:$0xff] }
  0x49   : > { %v686_v40 = vld [vmem:[%s3359_s29 + $0x680] sm:$0xff]  ;;  %683 = vst [vmem:[%s3367_s30 + $0x330] sm:$0xff] %v682_v38  ;;  %685 = vst [vmem:[%s3367_s30 + $0x338] sm:$0xff] %v684_v39  ;;  %v688_v41 = vld [vmem:[%s3359_s29 + $0x690] sm:$0xff] }
  0x4a   : > { %687 = vst [vmem:[%s3367_s30 + $0x340] sm:$0xff] %v686_v40  ;;  %v690_v42 = vld [vmem:[%s3359_s29 + $0x6a0] sm:$0xff]  ;;  %v692_v43 = vld [vmem:[%s3359_s29 + $0x6b0] sm:$0xff]  ;;  %689 = vst [vmem:[%s3367_s30 + $0x348] sm:$0xff] %v688_v41 }
  0x4b   : > { %691 = vst [vmem:[%s3367_s30 + $0x350] sm:$0xff] %v690_v42  ;;  %693 = vst [vmem:[%s3367_s30 + $0x358] sm:$0xff] %v692_v43  ;;  %v694_v44 = vld [vmem:[%s3359_s29 + $0x6c0] sm:$0xff]  ;;  %v696_v45 = vld [vmem:[%s3359_s29 + $0x6d0] sm:$0xff] }
  0x4c   : > { %v698_v46 = vld [vmem:[%s3359_s29 + $0x6e0] sm:$0xff]  ;;  %695 = vst [vmem:[%s3367_s30 + $0x360] sm:$0xff] %v694_v44  ;;  %697 = vst [vmem:[%s3367_s30 + $0x368] sm:$0xff] %v696_v45  ;;  %v700_v47 = vld [vmem:[%s3359_s29 + $0x6f0] sm:$0xff] }
  0x4d   : > { %699 = vst [vmem:[%s3367_s30 + $0x370] sm:$0xff] %v698_v46  ;;  %v702_v48 = vld [vmem:[%s3359_s29 + $0x700] sm:$0xff]  ;;  %v704_v49 = vld [vmem:[%s3359_s29 + $0x710] sm:$0xff]  ;;  %701 = vst [vmem:[%s3367_s30 + $0x378] sm:$0xff] %v700_v47 }
  0x4e   : > { %703 = vst [vmem:[%s3367_s30 + $0x380] sm:$0xff] %v702_v48  ;;  %705 = vst [vmem:[%s3367_s30 + $0x388] sm:$0xff] %v704_v49  ;;  %v706_v50 = vld [vmem:[%s3359_s29 + $0x720] sm:$0xff]  ;;  %v708_v51 = vld [vmem:[%s3359_s29 + $0x730] sm:$0xff] }
  0x4f   : > { %v710_v52 = vld [vmem:[%s3359_s29 + $0x740] sm:$0xff]  ;;  %707 = vst [vmem:[%s3367_s30 + $0x390] sm:$0xff] %v706_v50  ;;  %709 = vst [vmem:[%s3367_s30 + $0x398] sm:$0xff] %v708_v51  ;;  %v712_v53 = vld [vmem:[%s3359_s29 + $0x750] sm:$0xff] }
  0x50   : > { %711 = vst [vmem:[%s3367_s30 + $0x3a0] sm:$0xff] %v710_v52  ;;  %v714_v54 = vld [vmem:[%s3359_s29 + $0x760] sm:$0xff]  ;;  %v716_v55 = vld [vmem:[%s3359_s29 + $0x770] sm:$0xff]  ;;  %713 = vst [vmem:[%s3367_s30 + $0x3a8] sm:$0xff] %v712_v53 }
  0x51   : > { %715 = vst [vmem:[%s3367_s30 + $0x3b0] sm:$0xff] %v714_v54  ;;  %717 = vst [vmem:[%s3367_s30 + $0x3b8] sm:$0xff] %v716_v55  ;;  %v718_v56 = vld [vmem:[%s3359_s29 + $0x780] sm:$0xff]  ;;  %v720_v57 = vld [vmem:[%s3359_s29 + $0x790] sm:$0xff] }
  0x52   : > { %v722_v58 = vld [vmem:[%s3359_s29 + $0x7a0] sm:$0xff]  ;;  %719 = vst [vmem:[%s3367_s30 + $0x3c0] sm:$0xff] %v718_v56  ;;  %721 = vst [vmem:[%s3367_s30 + $0x3c8] sm:$0xff] %v720_v57  ;;  %v724_v59 = vld [vmem:[%s3359_s29 + $0x7b0] sm:$0xff] }
  0x53   : > { %723 = vst [vmem:[%s3367_s30 + $0x3d0] sm:$0xff] %v722_v58  ;;  %v726_v60 = vld [vmem:[%s3359_s29 + $0x7c0] sm:$0xff]  ;;  %v728_v61 = vld [vmem:[%s3359_s29 + $0x7d0] sm:$0xff]  ;;  %725 = vst [vmem:[%s3367_s30 + $0x3d8] sm:$0xff] %v724_v59 }
  0x54   : > { %727 = vst [vmem:[%s3367_s30 + $0x3e0] sm:$0xff] %v726_v60  ;;  %729 = vst [vmem:[%s3367_s30 + $0x3e8] sm:$0xff] %v728_v61  ;;  %v730_v62 = vld [vmem:[%s3359_s29 + $0x7e0] sm:$0xff]  ;;  %v732_v63 = vld [vmem:[%s3359_s29 + $0x7f0] sm:$0xff] }
  0x55   : > { %v734_v0 = vld [vmem:[%s3359_s29 + $0x800] sm:$0xff]  ;;  %731 = vst [vmem:[%s3367_s30 + $0x3f0] sm:$0xff] %v730_v62  ;;  %733 = vst [vmem:[%s3367_s30 + $0x3f8] sm:$0xff] %v732_v63  ;;  %v736_v1 = vld [vmem:[%s3359_s29 + $0x810] sm:$0xff] }
  0x56   : > { %735 = vst [vmem:[%s3367_s30 + $0x400] sm:$0xff] %v734_v0  ;;  %v738_v2 = vld [vmem:[%s3359_s29 + $0x820] sm:$0xff]  ;;  %v740_v3 = vld [vmem:[%s3359_s29 + $0x830] sm:$0xff]  ;;  %737 = vst [vmem:[%s3367_s30 + $0x408] sm:$0xff] %v736_v1 }
  0x57   : > { %739 = vst [vmem:[%s3367_s30 + $0x410] sm:$0xff] %v738_v2  ;;  %741 = vst [vmem:[%s3367_s30 + $0x418] sm:$0xff] %v740_v3  ;;  %v742_v4 = vld [vmem:[%s3359_s29 + $0x840] sm:$0xff]  ;;  %v744_v5 = vld [vmem:[%s3359_s29 + $0x850] sm:$0xff] }
  0x58   : > { %v746_v6 = vld [vmem:[%s3359_s29 + $0x860] sm:$0xff]  ;;  %743 = vst [vmem:[%s3367_s30 + $0x420] sm:$0xff] %v742_v4  ;;  %745 = vst [vmem:[%s3367_s30 + $0x428] sm:$0xff] %v744_v5  ;;  %v748_v7 = vld [vmem:[%s3359_s29 + $0x870] sm:$0xff] }
  0x59   : > { %747 = vst [vmem:[%s3367_s30 + $0x430] sm:$0xff] %v746_v6  ;;  %v750_v8 = vld [vmem:[%s3359_s29 + $0x880] sm:$0xff]  ;;  %v752_v9 = vld [vmem:[%s3359_s29 + $0x890] sm:$0xff]  ;;  %749 = vst [vmem:[%s3367_s30 + $0x438] sm:$0xff] %v748_v7 }
  0x5a   : > { %751 = vst [vmem:[%s3367_s30 + $0x440] sm:$0xff] %v750_v8  ;;  %753 = vst [vmem:[%s3367_s30 + $0x448] sm:$0xff] %v752_v9  ;;  %v754_v10 = vld [vmem:[%s3359_s29 + $0x8a0] sm:$0xff]  ;;  %v756_v11 = vld [vmem:[%s3359_s29 + $0x8b0] sm:$0xff] }
  0x5b   : > { %v758_v12 = vld [vmem:[%s3359_s29 + $0x8c0] sm:$0xff]  ;;  %755 = vst [vmem:[%s3367_s30 + $0x450] sm:$0xff] %v754_v10  ;;  %757 = vst [vmem:[%s3367_s30 + $0x458] sm:$0xff] %v756_v11  ;;  %v760_v13 = vld [vmem:[%s3359_s29 + $0x8d0] sm:$0xff] }
  0x5c   : > { %759 = vst [vmem:[%s3367_s30 + $0x460] sm:$0xff] %v758_v12  ;;  %v762_v14 = vld [vmem:[%s3359_s29 + $0x8e0] sm:$0xff]  ;;  %v764_v15 = vld [vmem:[%s3359_s29 + $0x8f0] sm:$0xff]  ;;  %761 = vst [vmem:[%s3367_s30 + $0x468] sm:$0xff] %v760_v13 }
  0x5d   : > { %763 = vst [vmem:[%s3367_s30 + $0x470] sm:$0xff] %v762_v14  ;;  %765 = vst [vmem:[%s3367_s30 + $0x478] sm:$0xff] %v764_v15 }
  0x5e PF: > { %p2629_p7 = scmp.ge.s32.totalorder %s3277_s18, 1  ;;  %p778_p8 = scmp.lt.s32.totalorder %s3277_s18, 5 }
  0x60   : > { %p779_p9 = pnand %p2629_p7, %p778_p8 }
  0x61   : > { %s785_s4 = sand.u32 (!%p779_p9), 1, %s3253_s12   ;;  %p820_p10 = scmp.lt.s32.totalorder (!%p779_p9), %s3265_s15, 1 }
  0x62   : > { %782 = sbr.rel (%p779_p9) target bundleno = 488 (0x1e8), region = 66  ;;  %s2632_s11 = sshll.u32 (!%p779_p9), %s3261_s14, 1 }
  0x63   : > { %s2947_s5 = smul.u32 (!%p779_p9), 1152, %s785_s4  ;;  %p827_p11 = scmp.lt.s32.totalorder (!%p779_p9), %s2632_s11, 3 }
  0x65   : > { %s3656_s6 = scalar_lea.vmem (!%p779_p9), [#allocation2], %s2947_s5 }
  0x67   : > { %v3279_v16 = vmov 0   ;;  %v3007_v17 = vld [vmem:[%s3656_s6 + $0xf4] ss:$8 sps:$4 sm:$0xff]   ;;  %v3011_v19 = vld [vmem:[%s3656_s6 + $0xf0] ss:$8 sps:$4 sm:$0xff]   ;;  %s3958_s15 = smov (!%p820_p10, %s3265_s15), 1  ;;  %v933_v35 = vlaneseq }
  0x68   : > { %1057 = vmatprep.mubr.bf16.mxu0 %v3279_v16  ;;  %1196 = vmatprep.mubr.bf16.mxu1 %v3279_v16  ;;  %v3009_v18 = vld [vmem:[%s3656_s6 + $0x74] ss:$8 sps:$4 sm:$0xff]   ;;  %v3012_v20 = vld [vmem:[%s3656_s6 + $0x70] ss:$8 sps:$4 sm:$0xff]   ;;  %v3013_v21 = vld [vmem:[%s3656_s6 + $0xe4] ss:$8 sps:$4 sm:$0xff]  }
  0x69   : > { %1025 = vmatprep.subr.bf16.mxu0 %v3007_v17  ;;  %1164 = vmatprep.subr.bf16.mxu1 %v3009_v18  ;;  %v3015_v22 = vld [vmem:[%s3656_s6 + $0x64] ss:$8 sps:$4 sm:$0xff]   ;;  %v3017_v23 = vld [vmem:[%s3656_s6 + $0xe0] ss:$8 sps:$4 sm:$0xff]   ;;  %v3019_v25 = vld [vmem:[%s3656_s6 + $0xd4] ss:$8 sps:$4 sm:$0xff]  }
  0x6a   : > { %1026 = vmatpush1.bf16.msra.mxu0 %v3011_v19  ;;  %1165 = vmatpush1.bf16.msra.mxu1 %v3012_v20  ;;  %v3018_v24 = vld [vmem:[%s3656_s6 + $0x60] ss:$8 sps:$4 sm:$0xff]   ;;  %v3021_v26 = vld [vmem:[%s3656_s6 + $0x54] ss:$8 sps:$4 sm:$0xff]   ;;  %v3023_v27 = vld [vmem:[%s3656_s6 + $0xd0] ss:$8 sps:$4 sm:$0xff]  }
  0x6b   : > { %1027 = vmatprep.subr.bf16.mxu0 %v3013_v21  ;;  %1166 = vmatprep.subr.bf16.mxu1 %v3015_v22  ;;  %v3024_v28 = vld [vmem:[%s3656_s6 + $0x50] ss:$8 sps:$4 sm:$0xff]   ;;  %v3025_v29 = vld [vmem:[%s3656_s6 + $0xc4] ss:$8 sps:$4 sm:$0xff]   ;;  %vm879_vm0 = vsmask.f32 256 }
  0x6c   : > { %v3027_v30 = vld [vmem:[%s3656_s6 + $0x44] ss:$8 sps:$4 sm:$0xff]   ;;  %vm880_vm1 = vsmask.f32 1284  ;;  %v3029_v31 = vld [vmem:[%s3656_s6 + $0xc0] ss:$8 sps:$4 sm:$0xff]  }
  0x6d   : > { %v3030_v32 = vld [vmem:[%s3656_s6 + $0x40] ss:$8 sps:$4 sm:$0xff]   ;;  %v3031_v33 = vld [vmem:[%s3656_s6 + $0xb4] ss:$8 sps:$4 sm:$0xff]   ;;  %vm882_vm2 = vsmask.f32 2312  ;;  %vm881_vm3 = vmor %vm879_vm0, %vm880_vm1 }
  0x6e   : > { %1028 = vmatpush1.bf16.msra.mxu0 %v3017_v23  ;;  %1167 = vmatpush1.bf16.msra.mxu1 %v3018_v24  ;;  %v3033_v34 = vld [vmem:[%s3656_s6 + $0x34] ss:$8 sps:$4 sm:$0xff]   ;;  %v3035_v36 = vld [vmem:[%s3656_s6 + $0xb0] ss:$8 sps:$4 sm:$0xff]   ;;  %s2945_s7 = sshll.u32 %s3958_s15, 3  ;;  %vm3692_vm6 = vmor %vm881_vm3, %vm882_vm2  ;;  %v3696_v43 = vshrl.u32 %v933_v35, 7 }
  0x6f   : > { %1029 = vmatprep.subr.bf16.mxu0 %v3019_v25  ;;  %1168 = vmatprep.subr.bf16.mxu1 %v3021_v26  ;;  %v3036_v37 = vld [vmem:[%s3656_s6 + $0x30] ss:$8 sps:$4 sm:$0xff]   ;;  %v3280_v38 = vmov 1966171168   ;;  %v3037_v40 = vld [vmem:[%s3656_s6 + $0xa4] ss:$8 sps:$4 sm:$0xff]   ;;  %s3689_s10 = scalar_lea.vmem %s3937_s0, %s2945_s7 }
  0x70   : > { %v931_v39 = vunpack.c.l.s4 %v3280_v38  ;;  %vm884_vm4 = vsmask.f32 3340  ;;  %v3039_v41 = vld [vmem:[%s3656_s6 + $0x24] ss:$8 sps:$4 sm:$0xff]   ;;  %vm886_vm5 = vsmask.f32 4368 }
  0x71   : > { %vm888_vm7 = vsmask.f32 5396  ;;  %vm890_vm8 = vsmask.f32 6424  ;;  %v3041_v44 = vld [vmem:[%s3656_s6 + $0xa0] ss:$8 sps:$4 sm:$0xff]   ;;  %vm885_vm10 = vmor %vm3692_vm6, %vm884_vm4 }
  0x72   : > { %1030 = vmatpush1.bf16.msra.mxu0 %v3023_v27  ;;  %1169 = vmatpush1.bf16.msra.mxu1 %v3024_v28  ;;  %vm892_vm9 = vsmask.f32 7452  ;;  %v932_v45 = vunpack.c.0.s8 %v931_v39  ;;  %v3042_v46 = vld [vmem:[%s3656_s6 + $0x20] ss:$8 sps:$4 sm:$0xff]   ;;  %v3043_v47 = vld [vmem:[%s3656_s6 + $0x94] ss:$8 sps:$4 sm:$0xff]   ;;  %vm887_vm11 = vmor %vm885_vm10, %vm886_vm5 }
  0x73   : > { %1031 = vmatprep.subr.bf16.mxu0 %v3025_v29  ;;  %1170 = vmatprep.subr.bf16.mxu1 %v3027_v30  ;;  %v3045_v48 = vld [vmem:[%s3656_s6 + $0x14] ss:$8 sps:$4 sm:$0xff]   ;;  %v2635_v49 = vld.sshfl [vmem:[%s3689_s10] sm:$0x11 pattern:$0x75316420]  ;;  %vm889_vm12 = vmor %vm887_vm11, %vm888_vm7 }
  0x74   : > { %v3047_v50 = vld [vmem:[%s3656_s6 + $0x90] ss:$8 sps:$4 sm:$0xff]   ;;  %v2636_v52 = vld.sshfl [vmem:[%s3689_s10 + $0x2] sm:$0x11 pattern:$0x75316420]  ;;  %v870_v53 = vcombine.high %v2635_v49, %v2635_v49  ;;  %v3712_v57 = vsub.s32 %v932_v45, %v3696_v43  ;;  %vm891_vm13 = vmor %vm889_vm12, %vm890_vm8 }
  0x75   : > { %v3048_v51 = vld [vmem:[%s3656_s6 + $0x10] ss:$8 sps:$4 sm:$0xff]   ;;  %v895_v54 = vshrl.u32 %v2635_v49, 16  ;;  %v878_v55 = vcombine.high %v2636_v52, %v2636_v52  ;;  %v904_v56 = vshrl.u32 %v2636_v52, 16  ;;  %v841_v58 = vld [vmem:[%s3689_s10] sm:$0x1]  ;;  %vm3720_vm14 = vmor %vm891_vm13, %vm892_vm9 }
  0x76   : > { %1032 = vmatpush1.bf16.msra.mxu0 %v3029_v31  ;;  %1171 = vmatpush1.bf16.msra.mxu1 %v3030_v32  ;;  %v842_v59 = vld [vmem:[%s3689_s10 + $0x2] sm:$0x1]  ;;  %v3049_v60 = vld [vmem:[%s3656_s6 + $0x84] ss:$8 sps:$4 sm:$0xff]   ;;  %v900_v61 = vshll.u32 %v870_v53, 16  ;;  %s3960_s11 = smov (!%p827_p11, %s2632_s11), 3 }
  0x77   : > { %1033 = vmatprep.subr.bf16.mxu0 %v3031_v33  ;;  %1172 = vmatprep.subr.bf16.mxu1 %v3033_v34  ;;  %v1068_v62 = vcombine.low %v841_v58, %v842_v59  ;;  %v3051_v63 = vld [vmem:[%s3656_s6 + $0x4] ss:$8 sps:$4 sm:$0xff]   ;;  %v909_v1 = vshll.u32 %v878_v55, 16  ;;  %v3053_v3 = vld [vmem:[%s3656_s6 + $0x80] ss:$8 sps:$4 sm:$0xff]   ;;  %s829_s22 = scalar_lea.vmem %s3939_s2, %s3960_s11  ;;  %s2634_s14 = sshll.u32 %s3958_s15, 2 }
  0x78   : > { %v902_v2 = vsel %vm3720_vm14, %v895_v54, %v900_v61  ;;  %v3054_v6 = vld [vmem:[%s3656_s6] ss:$8 sps:$4 sm:$0xff]   ;;  %v3057_v8 = vld [vmem:[%s3656_s6 + $0x174] ss:$8 sps:$4 sm:$0xff]   ;;  %v3055_v12 = vld [vmem:[%s3656_s6 + $0x170] ss:$8 sps:$4 sm:$0xff]   ;;  %s837_s24 = sadd.s32 %s2634_s14, %s3960_s11 }
  0x79   : > { %v3729_v4 = vsel %vm3720_vm14, %v904_v56, %v909_v1  ;;  %v1075_v5 = vrot.slane %v1068_v62, %v3712_v57  ;;  %v3060_v9 = vld [vmem:[%s3656_s6 + $0x1f4] ss:$8 sps:$4 sm:$0xff]   ;;  %v3058_v14 = vld [vmem:[%s3656_s6 + $0x1f0] ss:$8 sps:$4 sm:$0xff]   ;;  %v3063_v15 = vld [vmem:[%s3656_s6 + $0x164] ss:$8 sps:$4 sm:$0xff]   ;;  %s838_s27 = scalar_lea.vmem %s3940_s3, %s837_s24 }
  0x7a   : > { %1034 = vmatpush1.bf16.msra.mxu0 %v3035_v36  ;;  %1173 = vmatpush1.bf16.msra.mxu1 %v3036_v37  ;;  %v929_v7 = vcombine.low %v902_v2, %v3729_v4  ;;  %v3066_v17 = vld [vmem:[%s3656_s6 + $0x1e4] ss:$8 sps:$4 sm:$0xff]   ;;  %v3061_v18 = vld [vmem:[%s3656_s6 + $0x160] ss:$8 sps:$4 sm:$0xff]   ;;  %v3069_v20 = vld [vmem:[%s3656_s6 + $0x154] ss:$8 sps:$4 sm:$0xff]  }
  0x7b   : > { %1035 = vmatprep.subr.bf16.mxu0 %v3037_v40  ;;  %1174 = vmatprep.subr.bf16.mxu1 %v3039_v41  ;;  %v1082_v11 = vrot.slane %v1075_v5, %v3712_v57  ;;  %v3064_v19 = vld [vmem:[%s3656_s6 + $0x1e0] ss:$8 sps:$4 sm:$0xff]   ;;  %v3072_v21 = vld [vmem:[%s3656_s6 + $0x1d4] ss:$8 sps:$4 sm:$0xff]   ;;  %v3067_v22 = vld [vmem:[%s3656_s6 + $0x150] ss:$8 sps:$4 sm:$0xff]  }
  0x7c   : > { %v936_v10 = vrot.slane %v929_v7, %v3712_v57  ;;  %v3070_v23 = vld [vmem:[%s3656_s6 + $0x1d0] ss:$8 sps:$4 sm:$0xff]   ;;  %v3075_v24 = vld [vmem:[%s3656_s6 + $0x144] ss:$8 sps:$4 sm:$0xff]   ;;  %v3073_v26 = vld [vmem:[%s3656_s6 + $0x140] ss:$8 sps:$4 sm:$0xff]  }
  0x7d   : > { %v3078_v25 = vld [vmem:[%s3656_s6 + $0x1c4] ss:$8 sps:$4 sm:$0xff]   ;;  %v3076_v27 = vld [vmem:[%s3656_s6 + $0x1c0] ss:$8 sps:$4 sm:$0xff]   ;;  %v3081_v28 = vld [vmem:[%s3656_s6 + $0x134] ss:$8 sps:$4 sm:$0xff]  }
  0x7e   : > { %1036 = vmatpush1.bf16.msra.mxu0 %v3041_v44  ;;  %1175 = vmatpush1.bf16.msra.mxu1 %v3042_v46  ;;  %v943_v13 = vrot.slane %v936_v10, %v3712_v57  ;;  %v3084_v29 = vld [vmem:[%s3656_s6 + $0x1b4] ss:$8 sps:$4 sm:$0xff]   ;;  %v3079_v30 = vld [vmem:[%s3656_s6 + $0x130] ss:$8 sps:$4 sm:$0xff]   ;;  %v3087_v32 = vld [vmem:[%s3656_s6 + $0x124] ss:$8 sps:$4 sm:$0xff]  }
  0x7f   : > { %1037 = vmatprep.subr.bf16.mxu0 %v3043_v47  ;;  %1176 = vmatprep.subr.bf16.mxu1 %v3045_v48  ;;  %v3082_v31 = vld [vmem:[%s3656_s6 + $0x1b0] ss:$8 sps:$4 sm:$0xff]   ;;  %v3090_v33 = vld [vmem:[%s3656_s6 + $0x1a4] ss:$8 sps:$4 sm:$0xff]   ;;  %v3085_v34 = vld [vmem:[%s3656_s6 + $0x120] ss:$8 sps:$4 sm:$0xff]  }
  0x80   : > { %v3088_v35 = vld [vmem:[%s3656_s6 + $0x1a0] ss:$8 sps:$4 sm:$0xff]   ;;  %v2723_v39 = vld [vmem:[%s3689_s10 + $0x4] sm:$0x1]  ;;  %v3093_v40 = vld [vmem:[%s3656_s6 + $0x114] ss:$8 sps:$4 sm:$0xff]  }
  0x81   : > { %v2687_v36 = vld.sshfl [vmem:[%s3689_s10] sm:$0x10 pattern:$0x75316420]  ;;  %v2722_v38 = vld [vmem:[%s3689_s10 + $0x2] sm:$0x1] }
  0x82   : > { %1038 = vmatpush1.bf16.msra.mxu0 %v3047_v50  ;;  %1177 = vmatpush1.bf16.msra.mxu1 %v3048_v51  ;;  %v3765_v37 = vld.sshfl [vmem:[%s3689_s10 + $0x2] sm:$0x10 pattern:$0x75316420]  ;;  %v3096_v41 = vld [vmem:[%s3656_s6 + $0x194] ss:$8 sps:$4 sm:$0xff]   ;;  %v1403_v44 = vcombine.low %v2722_v38, %v2723_v39 }
  0x83   : > { %1039 = vmatprep.subr.bf16.mxu0 %v3049_v60  ;;  %1178 = vmatprep.subr.bf16.mxu1 %v3051_v63  ;;  %v2705_v42 = vcombine.high %v2687_v36, %v3765_v37  ;;  %v3091_v45 = vld [vmem:[%s3656_s6 + $0x110] ss:$8 sps:$4 sm:$0xff]   ;;  %v3099_v47 = vld [vmem:[%s3656_s6 + $0x104] ss:$8 sps:$4 sm:$0xff]   ;;  %v3097_v51 = vld [vmem:[%s3656_s6 + $0x100] ss:$8 sps:$4 sm:$0xff]  }
  0x84   : > { %v3094_v46 = vld [vmem:[%s3656_s6 + $0x190] ss:$8 sps:$4 sm:$0xff]   ;;  %v3102_v48 = vld [vmem:[%s3656_s6 + $0x184] ss:$8 sps:$4 sm:$0xff]   ;;  %v1410_v50 = vrot.slane %v1403_v44, %v3712_v57  ;;  %v3100_v52 = vld [vmem:[%s3656_s6 + $0x180] ss:$8 sps:$4 sm:$0xff]  }
  0x85   : > { %v1249_v49 = vrot.slane %v2705_v42, %v3712_v57  ;;  %v3105_v53 = vld [vmem:[%s3656_s6 + $0x274] ss:$8 sps:$4 sm:$0xff]   ;;  %v3103_v58 = vld [vmem:[%s3656_s6 + $0x270] ss:$8 sps:$4 sm:$0xff]   ;;  %v3111_v60 = vld [vmem:[%s3656_s6 + $0x264] ss:$8 sps:$4 sm:$0xff]  }
  0x86   : > { %1040 = vmatpush1.bf16.msra.mxu0 %v3053_v3  ;;  %1179 = vmatpush1.bf16.msra.mxu1 %v3054_v6  ;;  %v3108_v54 = vld [vmem:[%s3656_s6 + $0x2f4] ss:$8 sps:$4 sm:$0xff]   ;;  %v1417_v56 = vrot.slane %v1410_v50, %v3712_v57  ;;  %v3106_v59 = vld [vmem:[%s3656_s6 + $0x2f0] ss:$8 sps:$4 sm:$0xff]   ;;  %v3114_v61 = vld [vmem:[%s3656_s6 + $0x2e4] ss:$8 sps:$4 sm:$0xff]  }
  0x87   : > { %1338 = vmatprep.subr.bf16.mxu0 %v3057_v8  ;;  %1499 = vmatprep.subr.bf16.mxu1 %v3060_v9  ;;  %v1256_v55 = vrot.slane %v1249_v49, %v3712_v57  ;;  %v3109_v62 = vld [vmem:[%s3656_s6 + $0x260] ss:$8 sps:$4 sm:$0xff]   ;;  %v3117_v1 = vld [vmem:[%s3656_s6 + $0x254] ss:$8 sps:$4 sm:$0xff]   ;;  %v3115_v3 = vld [vmem:[%s3656_s6 + $0x250] ss:$8 sps:$4 sm:$0xff]  }
  0x88   : > { %v3112_v63 = vld [vmem:[%s3656_s6 + $0x2e0] ss:$8 sps:$4 sm:$0xff]   ;;  %v3120_v2 = vld [vmem:[%s3656_s6 + $0x2d4] ss:$8 sps:$4 sm:$0xff]   ;;  %v3118_v5 = vld [vmem:[%s3656_s6 + $0x2d0] ss:$8 sps:$4 sm:$0xff]  }
  0x89   : > { %1058 = vmatmul.mubr.bf16.vlgmr.msra.gmra.mxu0 %v943_v13  ;;  %1197 = vmatmul.mubr.bf16.vlgmr.msra.gmra.mxu1 %v1082_v11  ;;  %v3123_v6 = vld [vmem:[%s3656_s6 + $0x244] ss:$8 sps:$4 sm:$0xff]   ;;  %v3121_v9 = vld [vmem:[%s3656_s6 + $0x240] ss:$8 sps:$4 sm:$0xff]   ;;  %v3132_v13 = vld [vmem:[%s3656_s6 + $0x2b4] ss:$8 sps:$4 sm:$0xff]  }
  0x8a   : > { %1339 = vmatpush1.bf16.msra.mxu0 %v3055_v12  ;;  %1500 = vmatpush1.bf16.msra.mxu1 %v3058_v14  ;;  %v3126_v7 = vld [vmem:[%s3656_s6 + $0x2c4] ss:$8 sps:$4 sm:$0xff]   ;;  %v3124_v10 = vld [vmem:[%s3656_s6 + $0x2c0] ss:$8 sps:$4 sm:$0xff]   ;;  %v3129_v12 = vld [vmem:[%s3656_s6 + $0x234] ss:$8 sps:$4 sm:$0xff]  }
  0x8b   : > { %1340 = vmatprep.subr.bf16.mxu0 %v3063_v15  ;;  %1501 = vmatprep.subr.bf16.mxu1 %v3066_v17  ;;  %v2759_v8 = vld.sshfl [vmem:[%s3689_s10 + $0x4] sm:$0x11 pattern:$0x75316420]  ;;  %v3127_v14 = vld [vmem:[%s3656_s6 + $0x230] ss:$8 sps:$4 sm:$0xff]  }
  0x8c   : > { %1370 = vmatprep.mubr.bf16.mxu0 %v3279_v16  ;;  %1531 = vmatprep.mubr.bf16.mxu1 %v3279_v16  ;;  %v1561_v11 = vcombine.high %v2759_v8, %v2759_v8  ;;  %v3130_v15 = vld [vmem:[%s3656_s6 + $0x2b0] ss:$8 sps:$4 sm:$0xff]   ;;  %v1572_v17 = vshrl.u32 %v2759_v8, 16  ;;  %v3153_v36 = vld [vmem:[%s3656_s6 + $0x374] ss:$8 sps:$4 sm:$0xff]   ;;  %vm2509_vm15 = vcmask 1040384  }
  0x8d   : > { %v3151_v39 = vld [vmem:[%s3656_s6 + $0x370] ss:$8 sps:$4 sm:$0xff]   ;;  %v3159_v42 = vld [vmem:[%s3656_s6 + $0x364] ss:$8 sps:$4 sm:$0xff]   ;;  %vm2511_vm1 = vcmask 1041409   ;;  %vm2510_vm3 = vmand %vm2509_vm15, %vm879_vm0 }
  0x8e   : > { %1341 = vmatpush1.bf16.msra.mxu0 %v3061_v18  ;;  %1502 = vmatpush1.bf16.msra.mxu1 %v3064_v19  ;;  %v1577_v18 = vshll.u32 %v1561_v11, 16  ;;  %v3135_v19 = vld [vmem:[%s3656_s6 + $0x224] ss:$8 sps:$4 sm:$0xff]   ;;  %v3163_v49 = vld [vmem:[%s3656_s6 + $0x350] ss:$8 sps:$4 sm:$0xff]  }
  0x8f   : > { %1342 = vmatprep.subr.bf16.mxu0 %v3069_v20  ;;  %1503 = vmatprep.subr.bf16.mxu1 %v3072_v21  ;;  %v3138_v20 = vld [vmem:[%s3656_s6 + $0x2a4] ss:$8 sps:$4 sm:$0xff]   ;;  %v3133_v21 = vld [vmem:[%s3656_s6 + $0x220] ss:$8 sps:$4 sm:$0xff]   ;;  %v3166_v50 = vld [vmem:[%s3656_s6 + $0x3d0] ss:$8 sps:$4 sm:$0xff]  }
  0x90   : > { %v3162_v44 = vld [vmem:[%s3656_s6 + $0x3e4] ss:$8 sps:$4 sm:$0xff]   ;;  %vm2512_vm2 = vsmask.f32 1280 }
  0x91   : > { %v3198_v0 = vld [vmem:[%s3656_s6 + $0x384] ss:$8 sps:$4 sm:$0xff]   ;;  %vm2513_vm4 = vmand %vm2511_vm1, %vm2512_vm2 }
  0x92   : > { %1343 = vmatpush1.bf16.msra.mxu0 %v3067_v22  ;;  %1504 = vmatpush1.bf16.msra.mxu1 %v3070_v23  ;;  %v3136_v22 = vld [vmem:[%s3656_s6 + $0x2a0] ss:$8 sps:$4 sm:$0xff]   ;;  %v3811_v23 = vsel %vm3720_vm14, %v1572_v17, %v1577_v18  ;;  %vm2514_vm5 = vmor %vm2513_vm4, %vm2510_vm3 }
  0x93   : > { %1344 = vmatprep.subr.bf16.mxu0 %v3075_v24  ;;  %1505 = vmatprep.subr.bf16.mxu1 %v3078_v25  ;;  %v3814_v24 = vld.sshfl [vmem:[%s3689_s10 + $0x4] sm:$0x10 pattern:$0x75316420]  ;;  %v3141_v25 = vld [vmem:[%s3656_s6 + $0x214] ss:$8 sps:$4 sm:$0xff]  }
  0x96   : > { %1345 = vmatpush1.bf16.msra.mxu0 %v3073_v26  ;;  %1506 = vmatpush1.bf16.msra.mxu1 %v3076_v27  ;;  %v3144_v26 = vld [vmem:[%s3656_s6 + $0x294] ss:$8 sps:$4 sm:$0xff]   ;;  %v3139_v27 = vld [vmem:[%s3656_s6 + $0x210] ss:$8 sps:$4 sm:$0xff]  }
  0x97   : > { %1346 = vmatprep.subr.bf16.mxu0 %v3081_v28  ;;  %1507 = vmatprep.subr.bf16.mxu1 %v3084_v29  ;;  %v1597_v28 = vcombine.low %v3729_v4, %v3811_v23  ;;  %v2814_v29 = vcombine.high %v3765_v37, %v3814_v24  ;;  %v3148_v4 = vld [vmem:[%s3656_s6 + $0x280] ss:$8 sps:$4 sm:$0xff]   ;;  %v3156_v37 = vld [vmem:[%s3656_s6 + $0x3f4] ss:$8 sps:$4 sm:$0xff]  }
  0x9a   : > { %1347 = vmatpush1.bf16.msra.mxu0 %v3079_v30  ;;  %1508 = vmatpush1.bf16.msra.mxu1 %v3082_v31  ;;  %v3142_v30 = vld [vmem:[%s3656_s6 + $0x290] ss:$8 sps:$4 sm:$0xff]   ;;  %v3147_v31 = vld [vmem:[%s3656_s6 + $0x204] ss:$8 sps:$4 sm:$0xff]  }
  0x9b   : > { %1348 = vmatprep.subr.bf16.mxu0 %v3087_v32  ;;  %1509 = vmatprep.subr.bf16.mxu1 %v3090_v33  ;;  %v3150_v32 = vld [vmem:[%s3656_s6 + $0x284] ss:$8 sps:$4 sm:$0xff]   ;;  %v3145_v33 = vld [vmem:[%s3656_s6 + $0x200] ss:$8 sps:$4 sm:$0xff]  }
  0x9e   : > { %1349 = vmatpush1.bf16.msra.mxu0 %v3085_v34  ;;  %1510 = vmatpush1.bf16.msra.mxu1 %v3088_v35  ;;  %v1604_v34 = vrot.slane %v1597_v28, %v3712_v57  ;;  %v1780_v35 = vrot.slane %v2814_v29, %v3712_v57  ;;  %v3207_v28 = vld [vmem:[%s3656_s6 + $0x454] ss:$8 sps:$4 sm:$0xff]   ;;  %v3205_v29 = vld [vmem:[%s3656_s6 + $0x450] ss:$8 sps:$4 sm:$0xff]  }
  0x9f   : > { %1350 = vmatprep.subr.bf16.mxu0 %v3093_v40  ;;  %1511 = vmatprep.subr.bf16.mxu1 %v3096_v41  ;;  %v3154_v41 = vld [vmem:[%s3656_s6 + $0x3f0] ss:$8 sps:$4 sm:$0xff]  }
  0xa0   : > { %v1611_v38 = vrot.slane %v1604_v34, %v3712_v57  ;;  %v1787_v40 = vrot.slane %v1780_v35, %v3712_v57  ;;  %v3214_v34 = vld [vmem:[%s3656_s6 + $0x420] ss:$8 sps:$4 sm:$0xff]   ;;  %v2906_v35 = vld.sshfl [vmem:[%s3689_s10 + $0x6] sm:$0x10 pattern:$0x75316420] }
  0xa2   : > { %1351 = vmatpush1.bf16.msra.mxu0 %v3091_v45  ;;  %1512 = vmatpush1.bf16.msra.mxu1 %v3094_v46  ;;  %v3157_v45 = vld [vmem:[%s3656_s6 + $0x360] ss:$8 sps:$4 sm:$0xff]  }
  0xa3   : > { %1352 = vmatprep.subr.bf16.mxu0 %v3099_v47  ;;  %1513 = vmatprep.subr.bf16.mxu1 %v3102_v48  ;;  %v3160_v46 = vld [vmem:[%s3656_s6 + $0x3e0] ss:$8 sps:$4 sm:$0xff]   ;;  %v3165_v47 = vld [vmem:[%s3656_s6 + $0x354] ss:$8 sps:$4 sm:$0xff]  }
  0xa4   : > { %v3168_v48 = vld [vmem:[%s3656_s6 + $0x3d4] ss:$8 sps:$4 sm:$0xff]  }
  0xa6   : > { %1353 = vmatpush1.bf16.msra.mxu0 %v3097_v51  ;;  %1514 = vmatpush1.bf16.msra.mxu1 %v3100_v52  ;;  %v3171_v51 = vld [vmem:[%s3656_s6 + $0x344] ss:$8 sps:$4 sm:$0xff]  }
  0xa7   : > { %1693 = vmatprep.subr.bf16.mxu0 %v3105_v53  ;;  %1869 = vmatprep.subr.bf16.mxu1 %v3108_v54  ;;  %v3174_v52 = vld [vmem:[%s3656_s6 + $0x3c4] ss:$8 sps:$4 sm:$0xff]   ;;  %v3169_v54 = vld [vmem:[%s3656_s6 + $0x340] ss:$8 sps:$4 sm:$0xff]  }
  0xa8   : > { %v2868_v53 = vld.sshfl [vmem:[%s3689_s10 + $0x6] sm:$0x11 pattern:$0x75316420] }
  0xa9   : > { %1371 = vmatmul.mubr.bf16.vlgmr.msra.gmra.mxu0 %v1256_v55  ;;  %1532 = vmatmul.mubr.bf16.vlgmr.msra.gmra.mxu1 %v1417_v56  ;;  %v3172_v55 = vld [vmem:[%s3656_s6 + $0x3c0] ss:$8 sps:$4 sm:$0xff]   ;;  %v2092_v56 = vcombine.high %v2868_v53, %v2868_v53 }
  0xaa   : > { %1694 = vmatpush1.bf16.msra.mxu0 %v3103_v58  ;;  %1870 = vmatpush1.bf16.msra.mxu1 %v3106_v59  ;;  %v3177_v58 = vld [vmem:[%s3656_s6 + $0x334] ss:$8 sps:$4 sm:$0xff]  }
  0xab   : > { %1695 = vmatprep.subr.bf16.mxu0 %v3111_v60  ;;  %1871 = vmatprep.subr.bf16.mxu1 %v3114_v61  ;;  %v3180_v59 = vld [vmem:[%s3656_s6 + $0x3b4] ss:$8 sps:$4 sm:$0xff]   ;;  %v3175_v60 = vld [vmem:[%s3656_s6 + $0x330] ss:$8 sps:$4 sm:$0xff]  }
  0xac   : > { %1725 = vmatprep.mubr.bf16.mxu0 %v3279_v16  ;;  %1901 = vmatprep.mubr.bf16.mxu1 %v3279_v16  ;;  %v3178_v61 = vld [vmem:[%s3656_s6 + $0x3b0] ss:$8 sps:$4 sm:$0xff]  }
  0xae   : > { %1696 = vmatpush1.bf16.msra.mxu0 %v3109_v62  ;;  %1872 = vmatpush1.bf16.msra.mxu1 %v3112_v63  ;;  %v2103_v62 = vshrl.u32 %v2868_v53, 16  ;;  %v2108_v63 = vshll.u32 %v2092_v56, 16 }
  0xaf   : > { %1697 = vmatprep.subr.bf16.mxu0 %v3117_v1  ;;  %1873 = vmatprep.subr.bf16.mxu1 %v3120_v2  ;;  %v3183_v1 = vld [vmem:[%s3656_s6 + $0x324] ss:$8 sps:$4 sm:$0xff]  }
  0xb0   : > { %v3186_v2 = vld [vmem:[%s3656_s6 + $0x3a4] ss:$8 sps:$4 sm:$0xff]   ;;  %v2110_v8 = vsel %vm3720_vm14, %v2103_v62, %v2108_v63 }
  0xb2   : > { %1698 = vmatpush1.bf16.msra.mxu0 %v3115_v3  ;;  %1874 = vmatpush1.bf16.msra.mxu1 %v3118_v5  ;;  %v3181_v3 = vld [vmem:[%s3656_s6 + $0x320] ss:$8 sps:$4 sm:$0xff]  }
  0xb3   : > { %1699 = vmatprep.subr.bf16.mxu0 %v3123_v6  ;;  %1875 = vmatprep.subr.bf16.mxu1 %v3126_v7  ;;  %v3184_v5 = vld [vmem:[%s3656_s6 + $0x3a0] ss:$8 sps:$4 sm:$0xff]   ;;  %v2831_v6 = vld [vmem:[%s3689_s10 + $0x4] sm:$0x1]  ;;  %v2832_v7 = vld [vmem:[%s3689_s10 + $0x6] sm:$0x1] }
  0xb4   : > { %v1934_v11 = vcombine.low %v2831_v6, %v2832_v7 }
  0xb6   : > { %1700 = vmatpush1.bf16.msra.mxu0 %v3121_v9  ;;  %1876 = vmatpush1.bf16.msra.mxu1 %v3124_v10  ;;  %v3189_v9 = vld [vmem:[%s3656_s6 + $0x314] ss:$8 sps:$4 sm:$0xff]   ;;  %v1941_v17 = vrot.slane %v1934_v11, %v3712_v57 }
  0xb7   : > { %1701 = vmatprep.subr.bf16.mxu0 %v3129_v12  ;;  %1877 = vmatprep.subr.bf16.mxu1 %v3132_v13  ;;  %v3192_v10 = vld [vmem:[%s3656_s6 + $0x394] ss:$8 sps:$4 sm:$0xff]   ;;  %v2128_v12 = vcombine.low %v3811_v23, %v2110_v8  ;;  %v3187_v13 = vld [vmem:[%s3656_s6 + $0x310] ss:$8 sps:$4 sm:$0xff]  }
  0xb9   : > { %v2135_v18 = vrot.slane %v2128_v12, %v3712_v57 }
  0xba   : > { %1702 = vmatpush1.bf16.msra.mxu0 %v3127_v14  ;;  %1878 = vmatpush1.bf16.msra.mxu1 %v3130_v15  ;;  %v3190_v14 = vld [vmem:[%s3656_s6 + $0x390] ss:$8 sps:$4 sm:$0xff]   ;;  %v3195_v15 = vld [vmem:[%s3656_s6 + $0x304] ss:$8 sps:$4 sm:$0xff]  }
  0xbb   : > { %1703 = vmatprep.subr.bf16.mxu0 %v3135_v19  ;;  %1879 = vmatprep.subr.bf16.mxu1 %v3138_v20  ;;  %v3193_v19 = vld [vmem:[%s3656_s6 + $0x300] ss:$8 sps:$4 sm:$0xff]   ;;  %v2142_v23 = vrot.slane %v2135_v18, %v3712_v57 }
  0xbc   : > { %v3196_v20 = vld [vmem:[%s3656_s6 + $0x380] ss:$8 sps:$4 sm:$0xff]  }
  0xbe   : > { %1704 = vmatpush1.bf16.msra.mxu0 %v3133_v21  ;;  %1880 = vmatpush1.bf16.msra.mxu1 %v3136_v22  ;;  %v3201_v21 = vld [vmem:[%s3656_s6 + $0x474] ss:$8 sps:$4 sm:$0xff]   ;;  %v1948_v22 = vrot.slane %v1941_v17, %v3712_v57 }
  0xbf   : > { %1705 = vmatprep.subr.bf16.mxu0 %v3141_v25  ;;  %1881 = vmatprep.subr.bf16.mxu1 %v3144_v26  ;;  %v3199_v25 = vld [vmem:[%s3656_s6 + $0x470] ss:$8 sps:$4 sm:$0xff]   ;;  %v3204_v26 = vld [vmem:[%s3656_s6 + $0x464] ss:$8 sps:$4 sm:$0xff]  }
  0xc2   : > { %1706 = vmatpush1.bf16.msra.mxu0 %v3139_v27  ;;  %1882 = vmatpush1.bf16.msra.mxu1 %v3142_v30  ;;  %v3202_v27 = vld [vmem:[%s3656_s6 + $0x460] ss:$8 sps:$4 sm:$0xff]   ;;  %v3210_v30 = vld [vmem:[%s3656_s6 + $0x444] ss:$8 sps:$4 sm:$0xff]  }
  0xc3   : > { %1707 = vmatprep.subr.bf16.mxu0 %v3147_v31  ;;  %1883 = vmatprep.subr.bf16.mxu1 %v3150_v32  ;;  %v3208_v31 = vld [vmem:[%s3656_s6 + $0x440] ss:$8 sps:$4 sm:$0xff]   ;;  %v3213_v32 = vld [vmem:[%s3656_s6 + $0x434] ss:$8 sps:$4 sm:$0xff]  }
  0xc6   : > { %1708 = vmatpush1.bf16.msra.mxu0 %v3145_v33  ;;  %1884 = vmatpush1.bf16.msra.mxu1 %v3148_v4  ;;  %v3211_v33 = vld [vmem:[%s3656_s6 + $0x430] ss:$8 sps:$4 sm:$0xff]   ;;  %v3219_v4 = vld [vmem:[%s3656_s6 + $0x414] ss:$8 sps:$4 sm:$0xff]  }
  0xc7   : > { %2030 = vmatprep.subr.bf16.mxu0 %v3153_v36  ;;  %2224 = vmatprep.subr.bf16.mxu1 %v3156_v37  ;;  %v2923_v36 = vcombine.high %v3814_v24, %v2906_v35  ;;  %v3217_v37 = vld [vmem:[%s3656_s6 + $0x410] ss:$8 sps:$4 sm:$0xff]  }
  0xc9   : > { %1726 = vmatmul.mubr.bf16.vlgmr.msra.gmra.mxu0 %v1611_v38  ;;  %1902 = vmatmul.mubr.bf16.vlgmr.msra.gmra.mxu1 %v1787_v40  ;;  %v3222_v38 = vld [vmem:[%s3656_s6 + $0x404] ss:$8 sps:$4 sm:$0xff]   ;;  %v3220_v40 = vld [vmem:[%s3656_s6 + $0x400] ss:$8 sps:$4 sm:$0xff]  }
  0xca   : > { %2031 = vmatpush1.bf16.msra.mxu0 %v3151_v39  ;;  %2225 = vmatpush1.bf16.msra.mxu1 %v3154_v41  ;;  %v2311_v39 = vrot.slane %v2923_v36, %v3712_v57 }
  0xcb   : > { %2032 = vmatprep.subr.bf16.mxu0 %v3159_v42  ;;  %2226 = vmatprep.subr.bf16.mxu1 %v3162_v44 }
  0xcc   : > { %2062 = vmatprep.mubr.bf16.mxu0 %v3279_v16  ;;  %2256 = vmatprep.mubr.bf16.mxu1 %v3279_v16  ;;  %v2318_v41 = vrot.slane %v2311_v39, %v3712_v57 }
  0xce   : > { %2033 = vmatpush1.bf16.msra.mxu0 %v3157_v45  ;;  %2227 = vmatpush1.bf16.msra.mxu1 %v3160_v46 }
  0xcf   : > { %2034 = vmatprep.subr.bf16.mxu0 %v3165_v47  ;;  %2228 = vmatprep.subr.bf16.mxu1 %v3168_v48 }
  0xd2   : > { %2035 = vmatpush1.bf16.msra.mxu0 %v3163_v49  ;;  %2229 = vmatpush1.bf16.msra.mxu1 %v3166_v50 }
  0xd3   : > { %2036 = vmatprep.subr.bf16.mxu0 %v3171_v51  ;;  %2230 = vmatprep.subr.bf16.mxu1 %v3174_v52 }
  0xd6   : > { %2037 = vmatpush1.bf16.msra.mxu0 %v3169_v54  ;;  %2231 = vmatpush1.bf16.msra.mxu1 %v3172_v55 }
  0xd7   : > { %2038 = vmatprep.subr.bf16.mxu0 %v3177_v58  ;;  %2232 = vmatprep.subr.bf16.mxu1 %v3180_v59 }
  0xda   : > { %2039 = vmatpush1.bf16.msra.mxu0 %v3175_v60  ;;  %2233 = vmatpush1.bf16.msra.mxu1 %v3178_v61 }
  0xdb   : > { %2040 = vmatprep.subr.bf16.mxu0 %v3183_v1  ;;  %2234 = vmatprep.subr.bf16.mxu1 %v3186_v2 }
  0xde   : > { %2041 = vmatpush1.bf16.msra.mxu0 %v3181_v3  ;;  %2235 = vmatpush1.bf16.msra.mxu1 %v3184_v5 }
  0xdf   : > { %2042 = vmatprep.subr.bf16.mxu0 %v3189_v9  ;;  %2236 = vmatprep.subr.bf16.mxu1 %v3192_v10 }
  0xe2   : > { %2043 = vmatpush1.bf16.msra.mxu0 %v3187_v13  ;;  %2237 = vmatpush1.bf16.msra.mxu1 %v3190_v14 }
  0xe3   : > { %2044 = vmatprep.subr.bf16.mxu0 %v3195_v15  ;;  %2238 = vmatprep.subr.bf16.mxu1 %v3198_v0 }
  0xe6   : > { %2045 = vmatpush1.bf16.msra.mxu0 %v3193_v19  ;;  %2239 = vmatpush1.bf16.msra.mxu1 %v3196_v20 }
  0xe7   : > { %2400 = vmatprep.subr.bf16.mxu0 %v3201_v21 }
  0xe9   : > { %2063 = vmatmul.mubr.bf16.vlgmr.msra.gmra.mxu0 %v1948_v22  ;;  %2257 = vmatmul.mubr.bf16.vlgmr.msra.gmra.mxu1 %v2142_v23 }
  0xea   : > { %2401 = vmatpush1.bf16.msra.mxu0 %v3199_v25  ;;  %2432 = vmatprep.mubr.bf16.mxu0 %v3279_v16  ;;  %v3216_v16 = vld [vmem:[%s3656_s6 + $0x424] ss:$8 sps:$4 sm:$0xff]   ;;  %v2447_v25 = vsub.s32 0, %v3696_v43 }
  0xeb   : > { %2402 = vmatprep.subr.bf16.mxu0 %v3204_v26  ;;  %v2443_v26 = vld [vmem:[%s829_s22] sm:$0x3] }
  0xee   : > { %2403 = vmatpush1.bf16.msra.mxu0 %v3202_v27 }
  0xef   : > { %2404 = vmatprep.subr.bf16.mxu0 %v3207_v28  ;;  %v2451_v28 = vsub.s32 1, %v3696_v43 }
  0xf1   : > { %v2452_v35 = vrot.slane %v2443_v26, %v2451_v28 }
  0xf2   : > { %2405 = vmatpush1.bf16.msra.mxu0 %v3205_v29 }
  0xf3   : > { %2406 = vmatprep.subr.bf16.mxu0 %v3210_v30  ;;  %v2448_v30 = vrot.slane %v2443_v26, %v2447_v25 }
  0xf6   : > { %2407 = vmatpush1.bf16.msra.mxu0 %v3208_v31  ;;  %v3281_v31 = vmov 1983009808  }
  0xf7   : > { %2408 = vmatprep.subr.bf16.mxu0 %v3213_v32  ;;  %v2463_v32 = vunpack.c.l.s4 %v3281_v31 }
  0xfa   : > { %2409 = vmatpush1.bf16.msra.mxu0 %v3211_v33 }
  0xfb   : > { %2410 = vmatprep.subr.bf16.mxu0 %v3216_v16 }
  0xfe   : > { %2411 = vmatpush1.bf16.msra.mxu0 %v3214_v34 }
  0xff   : > { %2412 = vmatprep.subr.bf16.mxu0 %v3219_v4 }
 0x102   : > { %2413 = vmatpush1.bf16.msra.mxu0 %v3217_v37 }
 0x103   : > { %2414 = vmatprep.subr.bf16.mxu0 %v3222_v38  ;;  %v2464_v38 = vunpack.c.0.s8 %v2463_v32 }
 0x106   : > { %2415 = vmatpush1.bf16.msra.mxu0 %v3220_v40 }
 0x109   : > { %2433 = vmatmul.mubr.bf16.vlgmr.msra.gmra.mxu0 %v2318_v41 }
 0x149   : > { %v1059_v42 = vpop.f32.mrf.mxu0  ;;  %v1198_v44 = vpop.f32.mrf.mxu1 }
 0x14a   : > { %v1199_v45 = vadd.f32 %v1198_v44, %v1059_v42 }
 0x14b   : > { %v1061_v46 = vpop.f32.mrf.mxu0  ;;  %v1200_v47 = vpop.f32.mrf.mxu1 }
 0x14c   : > { %v1201_v48 = vadd.f32 %v1200_v47, %v1061_v46 }
 0x14d   : > { %v1063_v24 = vpop.f32.mrf.mxu0  ;;  %v1202_v49 = vpop.f32.mrf.mxu1 }
 0x14f   : > { %v1064_v50 = vpop.f32.mrf.mxu0  ;;  %v1203_v51 = vpop.f32.mrf.mxu1 }
 0x150   : > { %v2485_v50 = vsub.s32 2, %v3696_v43 }
 0x169   : > { %v1372_v52 = vpop.f32.mrf.mxu0  ;;  %v1533_v53 = vpop.f32.mrf.mxu1 }
 0x16a   : > { %v1379_v54 = vadd.f32 %v1372_v52, %v1199_v45  ;;  %v2467_v45 = vsub.s32 %v2464_v38, %v3696_v43 }
 0x16b   : > { %v1374_v55 = vpop.f32.mrf.mxu0  ;;  %v1535_v56 = vpop.f32.mrf.mxu1 }
 0x16c   : > { %v1380_v58 = vadd.f32 %v1374_v55, %v1201_v48  ;;  %v1540_v59 = vadd.f32 %v1533_v53, %v1379_v54 }
 0x16d   : > { %v1376_v60 = vpop.f32.mrf.mxu0  ;;  %v1537_v61 = vpop.f32.mrf.mxu1 }
 0x16e   : > { %v1541_v62 = vadd.f32 %v1535_v56, %v1380_v58  ;;  %v2515_v56 = vld [vmem:[%s838_s27] sm:$0x3] }
 0x16f   : > { %v1377_v63 = vpop.f32.mrf.mxu0  ;;  %v1538_v1 = vpop.f32.mrf.mxu1 }
 0x189   : > { %v1727_v2 = vpop.f32.mrf.mxu0  ;;  %v1903_v3 = vpop.f32.mrf.mxu1 }
 0x18a   : > { %v1734_v19 = vadd.f32 %v1727_v2, %v1540_v59 }
 0x18b   : > { %v1729_v5 = vpop.f32.mrf.mxu0  ;;  %v1905_v6 = vpop.f32.mrf.mxu1 }
 0x18c   : > { %v1735_v20 = vadd.f32 %v1729_v5, %v1541_v62  ;;  %v1910_v21 = vadd.f32 %v1903_v3, %v1734_v19 }
 0x18d   : > { %v1731_v7 = vpop.f32.mrf.mxu0  ;;  %v1907_v8 = vpop.f32.mrf.mxu1 }
 0x18e   : > { %v1911_v22 = vadd.f32 %v1905_v6, %v1735_v20 }
 0x18f   : > { %v1732_v9 = vpop.f32.mrf.mxu0  ;;  %v1908_v10 = vpop.f32.mrf.mxu1 }
 0x1a9   : > { %v2064_v11 = vpop.f32.mrf.mxu0  ;;  %v2258_v12 = vpop.f32.mrf.mxu1 }
 0x1aa   : > { %v2071_v23 = vadd.f32 %v2064_v11, %v1910_v21 }
 0x1ab   : > { %v2066_v13 = vpop.f32.mrf.mxu0  ;;  %v2260_v14 = vpop.f32.mrf.mxu1 }
 0x1ac   : > { %v2072_v27 = vadd.f32 %v2066_v13, %v1911_v22  ;;  %v2265_v29 = vadd.f32 %v2258_v12, %v2071_v23 }
 0x1ad   : > { %v2068_v15 = vpop.f32.mrf.mxu0  ;;  %v2262_v0 = vpop.f32.mrf.mxu1 }
 0x1ae   : > { %v2266_v16 = vadd.f32 %v2260_v14, %v2072_v27 }
 0x1af   : > { %v2069_v17 = vpop.f32.mrf.mxu0  ;;  %v2263_v18 = vpop.f32.mrf.mxu1 }
 0x1c9   : > { %v2434_v33 = vpop.f32.mrf.mxu0 }
 0x1ca   : > { %v2441_v34 = vadd.f32 %v2434_v33, %v2265_v29 }
 0x1cb   : > { %v2436_v4 = vpop.f32.mrf.mxu0 }
 0x1cc   : > { %v2455_v36 = vadd.f32 %v2448_v30, %v2441_v34  ;;  %v2442_v37 = vadd.f32 %v2436_v4, %v2266_v16 }
 0x1cd   : > { %v2438_v39 = vpop.f32.mrf.mxu0 }
 0x1ce   : > { %v2456_v40 = vadd.f32 %v2452_v35, %v2442_v37  ;;  %v2457_v42 = vmax.f32 %v2455_v36, 0.0 }
 0x1cf   : > { %v2439_v41 = vpop.f32.mrf.mxu0 }
 0x1d0   : > { %v2458_v44 = vmax.f32 %v2456_v40, 0.0 }
 0x1d2   : > { %v2461_v46 = vcombine.low %v2457_v42, %v2458_v44 }
 0x1d4   : > { %v2468_v47 = vrot.slane %v2461_v46, %v2467_v45 }
 0x1d6   : > { %v2469_v48 = vcombine.high %v2468_v47, %v2468_v47 }
 0x1d8   : > { %v2472_v24 = vmax.f32 %v2468_v47, %v2469_v48 }
 0x1da   : > { %v2940_v49 = vrot.slane %v2472_v24, 9 }
 0x1dc   : > { %v2477_v51 = vmax.f32 %v2472_v24, %v2940_v49 }
 0x1de   : > { %v2482_v52 = vrot.slane %v2477_v51, %v2447_v25  ;;  %v2486_v53 = vrot.slane %v2477_v51, %v2485_v50 }
 0x1e0   : > { %v2941_v54 = vpack.c.bf16 %v2486_v53, %v2482_v52 }
 0x1e2   : > { %v2500_v55 = vrot.slane %v2941_v54, %v3712_v57 }
 0x1e4   : > { %v2507_v43 = vrot.slane %v2500_v55, %v3712_v57 }
 0x1e6   : > { %v2516_v58 = vsel %vm2514_vm5, %v2507_v43, %v2515_v56 }
 0x1e7   : > { %2517 = vst [vmem:[%s838_s27] sm:$0x3] %v2516_v58 }
 0x1e8 PF: > { %s13_s18 = sadd.s32 1, %s3277_s18   ;;  %s3945_s12 = smov %s3257_s13 }
 0x1e9   : > { %p10_p12 = scmp.ge.s32.totalorder %s13_s18, 6   ;;  %s3946_s13 = smov %s3351_s23 }
 0x1ea   : > { %s3947_s14 = smov %s3269_s16  ;;  %s3948_s15 = smov %s3273_s17 }
 0x1eb   : > { %s3949_s16 = smov %s3952_s19  ;;  %s3950_s17 = smov %s3956_s20 }
 0x1ec   :  { %12 = sbr.rel (!%p10_p12) target bundleno = 4 (0x4), region = 121 }

// kernel: vgg_forward.4
= control target key start
LH: loop header
LB: loop body
LE: loop exit
PB: predicated region body
PF: predicated region fallthrough
CT: control target
= control target key end

     0   :  { %8 = vsyncpa [#allocation3], 0  ;;  %s2940_s12 = smov 0   ;;  %s2942_s13 = smov 0   ;;  %s3581_s0 = inlined_call_operand.vmem [shape: bf16[2,10,10,3], index: 0, kind: input, shape index: {}]   ;;  %s3582_s1 = inlined_call_operand.vmem [shape: bf16[3,3,3,64], index: 1, kind: input, shape index: {}]   ;;  %s3583_s2 = inlined_call_operand.hbm [shape: f32[1,64], index: 2, kind: input, shape index: {}]   ;;  %s3584_s3 = inlined_call_operand.vmem [shape: bf16[2,4,4,64], index: 3, kind: output, shape index: {}]  }
   0x1   :  { %s2944_s14 = smov 0  }
   0x2 LB: > { %s2477_s15 = sadd.s32 4294967295, %s2915_s14   ;;  %s26_s16 = sadd.s32 1, %s2911_s13  ;;  %s2915_s14 = sphi %s2944_s14, %s14_s14   ;;  %s2911_s13 = sphi %s2942_s13, %s3592_s13   ;;  %s2907_s12 = sphi %s2940_s12, %s3591_s12  }
   0x3   : > { %p28_p0 = scmp.ge.s32.totalorder %s26_s16, 2  ;;  %p2479_p1 = scmp.ge.s32.totalorder %s2915_s14, 1 }
   0x4   : > { %p137_p2 = scmp.lt.s32.totalorder %s2915_s14, 3  ;;  %p2965_p4 = scmp.eq.s32.totalorder %s2477_s15, 0 }
   0x5   : > { %s3594_s16 = smov (%p28_p0, %s26_s16), 0  ;;  %s2917_s19 = smov [#allocation2]  }
   0x6   : > { %p2961_p3 = pnand %p2479_p1, %p137_p2  ;;  %s159_s20 = sshll.u32 %s2917_s19, 4  ;;  %s160_s20 = int_to_ptr.vmem [resolvable:$true] %s159_s20 }
   0x7   : > { %s2874_s21 = scalar_lea.vmem %s160_s20, 16  ;;  %s2881_s22 = scalar_lea.vmem %s160_s20, 32 }
   0x8   : > { %p2818_p5 = pneg %p2961_p3  ;;  %p2875_p8 = scmp.ne.s32.totalorder %s160_s20, %s2874_s21 }
   0x9   : > { %p2882_p11 = scmp.lt.s32.totalorder %s160_s20, %s160_s20  ;;  %p2883_p12 = scmp.lt.s32.totalorder %s2881_s22, %s2874_s21 }
   0xa   : > { %p2819_p6 = pnand %p2965_p4, %p2818_p5 }
   0xb   : > { %p2884_p13 = por %p2883_p12, %p2882_p11 }
   0xc   : > { %p2865_p7 = pneg %p2819_p6 }
   0xe   : > { %p2877_p9 = pnand %p2875_p8, %p2865_p7 }
  0x10   : > { %p2878_p10 = pneg %p2877_p9 }
  0x12   : > { %p2885_p0 = pnand %p2884_p13, %p2878_p10 }
  0x14   : > { %2888 = shalt.err (!%p2885_p0)
}
  0x15   : > { %2821 = dma.hbm_to_vmem [thread:$0]  (!%p2819_p6), %s3583_s2, 16, %s160_s20, [#allocation3]  }
  0x16   : > { %180 = sbr.rel (%p2961_p3) target bundleno = 380 (0x17c), region = 32 }
  0x1b   : > { %2902 = dma.done.wait (%p2965_p4), [#allocation3], 16  }
  0x1c   : > { %2904 = vsyncadd (%p2965_p4), [#allocation3], 4294967280  ;;  %vm388_vm0 = vcmask 1040384   ;;  %p211_p1 = scmp.lt.s32.totalorder %s2907_s12, 1  ;;  %vm389_vm1 = vcmask 1041408   ;;  %v2918_v0 = vmov 65535  }
  0x1d   : > { %v390_v1 = vsel %vm388_vm0, 4294967295, %v2918_v0  ;;  %vm246_vm2 = vsmask.f32 3328  ;;  %vm247_vm3 = vsmask.f32 7440  ;;  %vm375_vm4 = vcmask 23552  }
  0x1e   : > { %s3596_s12 = smov (!%p211_p1, %s2907_s12), 1  ;;  %v2987_v2 = vsel %vm389_vm1, %v390_v1, 0  ;;  %v2488_v3 = vld [vmem:[%s3582_s1 + $0x2] sm:$0x3]  ;;  %vm3037_vm5 = vmor %vm246_vm2, %vm247_vm3  ;;  %v237_v37 = vld [vmem:[%s3582_s1] sm:$0x3] }
  0x1f   : > { %s2813_s25 = smul.u32 80, %s3596_s12  ;;  %v393_v6 = vand.u32 %v2488_v3, %v2987_v2  ;;  %vm584_vm6 = vcmask 1042432   ;;  %vm585_vm7 = vcmask 1046532   ;;  %v3063_v55 = vand.u32 %v2987_v2, %v237_v37  ;;  %s2675_s24 = sshll.u32 %s3596_s12, 3 }
  0x20   : > { %vm3113_vm8 = vmor %vm584_vm6, %vm585_vm7  ;;  %vm2303_vm9 = vcmask 1041409   ;;  %vm2306_vm10 = vcmask 1042434   ;;  %vm2309_vm11 = vcmask 1043459   ;;  %s3527_s26 = scalar_lea.vmem %s3584_s3, %s2675_s24  ;;  %vm2365_vm12 = vcmask 517120  }
  0x21   : > { %s2992_s28 = scalar_lea.vmem %s3581_s0, %s2813_s25  ;;  %2811 = vmatprep.subr.bf16.mxu1 %v393_v6  ;;  %2721 = vmatprep.subr.bf16.mxu0 %v393_v6 }
  0x22   : > { %v2998_v4 = vld [vmem:[%s2992_s28] sm:$0xf]  ;;  %v3001_v5 = vld [vmem:[%s2992_s28 + $0x8] sm:$0xf]  ;;  %v3005_v7 = vld [vmem:[%s2992_s28 + $0x4] sm:$0x1]  ;;  %2812 = vmatpush3.bf16.msra.mxu1 %v393_v6  ;;  %2722 = vmatpush3.bf16.msra.mxu0 %v393_v6 }
  0x23   : > { %v3008_v8 = vld [vmem:[%s2992_s28 + $0xc] sm:$0x1]  ;;  %v250_v9 = vshrl.u32 %v2998_v4, 16  ;;  %v253_v10 = vshll.u32 %v2998_v4, 16  ;;  %v2497_v11 = vcombine.low %v2998_v4, %v3001_v5  ;;  %v259_v12 = vshll.u32 %v3005_v7, 16  ;;  %2731 = vmatprep.subr.bf16.mxu1 %v3063_v55 }
  0x24   : > { %v264_v13 = vshrl.u32 %v3001_v5, 16  ;;  %v267_v14 = vshll.u32 %v3001_v5, 16  ;;  %v273_v15 = vshll.u32 %v3008_v8, 16  ;;  %v3019_v16 = vld [vmem:[%s2992_s28 + $0x20] sm:$0xf]  ;;  %v589_v19 = vrot.slane %v3005_v7, 5 }
  0x25   : > { %v252_v17 = vrot.slane %v250_v9, 4  ;;  %v255_v18 = vrot.slane %v253_v10, 5  ;;  %v593_v20 = vrot.slane %v3008_v8, 5  ;;  %v3024_v21 = vld [vmem:[%s2992_s28 + $0x28] sm:$0xf]  ;;  %v261_v22 = vrot.slane %v259_v12, 5 }
  0x26   : > { %v266_v23 = vrot.slane %v264_v13, 4  ;;  %v269_v24 = vrot.slane %v267_v14, 5  ;;  %v275_v25 = vrot.slane %v273_v15, 5  ;;  %v3027_v26 = vld [vmem:[%s2992_s28 + $0x24] sm:$0x1]  ;;  %v306_v29 = vshrl.u32 %v3019_v16, 16 }
  0x27   : > { %v256_v27 = vor.u32 %v255_v18, %v252_v17  ;;  %v3030_v28 = vld [vmem:[%s2992_s28 + $0x2c] sm:$0x1]  ;;  %v309_v30 = vshll.u32 %v3019_v16, 16  ;;  %v315_v31 = vshll.u32 %v3027_v26, 16  ;;  %v320_v34 = vshrl.u32 %v3024_v21, 16 }
  0x28   : > { %v270_v33 = vor.u32 %v269_v24, %v266_v23  ;;  %v323_v35 = vshll.u32 %v3024_v21, 16  ;;  %v329_v36 = vshll.u32 %v3030_v28, 16  ;;  %v308_v39 = vrot.slane %v306_v29, 4  ;;  %v3048_v42 = vld [vmem:[%s2992_s28 + $0x10] sm:$0xf] }
  0x29   : > { %v257_v38 = vrot.slane %v256_v27, 4  ;;  %v311_v40 = vrot.slane %v309_v30, 5  ;;  %v317_v41 = vrot.slane %v315_v31, 5  ;;  %v322_v44 = vrot.slane %v320_v34, 4  ;;  %v3055_v51 = vld [vmem:[%s2992_s28 + $0x18] sm:$0xf] }
  0x2a   : > { %v271_v43 = vrot.slane %v270_v33, 4  ;;  %v325_v45 = vrot.slane %v323_v35, 5  ;;  %v331_v46 = vrot.slane %v329_v36, 5  ;;  %v605_v49 = vrot.slane %v3027_v26, 5  ;;  %v3058_v52 = vld [vmem:[%s2992_s28 + $0x14] sm:$0x1] }
  0x2b   : > { %v262_v47 = vsel %vm3037_vm5, %v257_v38, %v261_v22  ;;  %v312_v48 = vor.u32 %v311_v40, %v308_v39  ;;  %v609_v50 = vrot.slane %v3030_v28, 5  ;;  %v3066_v56 = vld [vmem:[%s2992_s28 + $0x1c] sm:$0x1]  ;;  %v278_v57 = vshrl.u32 %v3048_v42, 16  ;;  %v3072_v62 = vld [vmem:[%s2992_s28 + $0x30] sm:$0xf] }
  0x2c   : > { %v276_v53 = vsel %vm3037_vm5, %v271_v43, %v275_v25  ;;  %v326_v54 = vor.u32 %v325_v45, %v322_v44  ;;  %v281_v60 = vshll.u32 %v3048_v42, 16  ;;  %v287_v61 = vshll.u32 %v3058_v52, 16  ;;  %v3078_v6 = vld [vmem:[%s2992_s28 + $0x38] sm:$0xf]  ;;  %v3085_v14 = vld [vmem:[%s2992_s28 + $0x34] sm:$0x1] }
  0x2d   : > { %v2489_v58 = vcombine.low %v262_v47, %v276_v53  ;;  %v313_v59 = vrot.slane %v312_v48, 4  ;;  %v280_v0 = vrot.slane %v278_v57, 4  ;;  %v292_v1 = vshrl.u32 %v3055_v51, 16  ;;  %v3091_v23 = vld [vmem:[%s2992_s28 + $0x3c] sm:$0x1] }
  0x2e   : > { %v327_v63 = vrot.slane %v326_v54, 4  ;;  %v295_v3 = vshll.u32 %v3055_v51, 16  ;;  %v283_v10 = vrot.slane %v281_v60, 5  ;;  %v289_v12 = vrot.slane %v287_v61, 5  ;;  %v2513_v30 = vld [vmem:[%s3582_s1 + $0x4] sm:$0x3] }
  0x2f   : > { %2723 = vmatprep.mubr.msk.bf16.mxu0 %vm375_vm4, %v2489_v58  ;;  %v318_v9 = vsel %vm3037_vm5, %v313_v59, %v317_v41  ;;  %v301_v13 = vshll.u32 %v3066_v56, 16  ;;  %v294_v17 = vrot.slane %v292_v1, 4  ;;  %v597_v22 = vrot.slane %v3058_v52, 5  ;;  %v560_v36 = vld [vmem:[%s2992_s28] sm:$0xe] }
  0x30   : > { %v332_v15 = vsel %vm3037_vm5, %v327_v63, %v331_v46  ;;  %v297_v18 = vrot.slane %v295_v3, 5  ;;  %v284_v25 = vor.u32 %v283_v10, %v280_v0  ;;  %v601_v29 = vrot.slane %v3066_v56, 5  ;;  %v561_v41 = vld [vmem:[%s2992_s28 + $0x8] sm:$0xe]  ;;  %v2530_v47 = vld [vmem:[%s3582_s1 + $0x6] sm:$0x3] }
  0x31   : > { %v2491_v24 = vcombine.low %v318_v9, %v332_v15  ;;  %v303_v27 = vrot.slane %v301_v13, 5  ;;  %v334_v33 = vshrl.u32 %v3072_v62, 16  ;;  %v337_v34 = vshll.u32 %v3072_v62, 16  ;;  %v562_v57 = vld [vmem:[%s2992_s28 + $0x10] sm:$0xe] }
  0x32   : > { %v298_v31 = vor.u32 %v297_v18, %v294_v17  ;;  %v343_v35 = vshll.u32 %v3085_v14, 16  ;;  %v285_v37 = vrot.slane %v284_v25, 4  ;;  %v348_v38 = vshrl.u32 %v3078_v6, 16  ;;  %v563_v63 = vld [vmem:[%s2992_s28 + $0x18] sm:$0xe] }
  0x33   : > { %2727 = vmatprep.mubr.msk.bf16.mxu1 %vm375_vm4, %v2491_v24  ;;  %v351_v39 = vshll.u32 %v3078_v6, 16  ;;  %v357_v40 = vshll.u32 %v3091_v23, 16  ;;  %v336_v44 = vrot.slane %v334_v33, 4  ;;  %v339_v45 = vrot.slane %v337_v34, 5  ;;  %v2555_v0 = vld [vmem:[%s3582_s1 + $0x8] sm:$0x3] }
  0x34   : > { %v299_v43 = vrot.slane %v298_v31, 4  ;;  %v345_v46 = vrot.slane %v343_v35, 5  ;;  %v290_v48 = vsel %vm3037_vm5, %v285_v37, %v289_v12  ;;  %v350_v52 = vrot.slane %v348_v38, 4  ;;  %v564_v12 = vld [vmem:[%s2992_s28 + $0x20] sm:$0xe] }
  0x35   : > { %v353_v53 = vrot.slane %v351_v39, 5  ;;  %v359_v54 = vrot.slane %v357_v40, 5  ;;  %v340_v59 = vor.u32 %v339_v45, %v336_v44  ;;  %v646_v60 = vand.u32 %v2513_v30, %v2987_v2  ;;  %v565_v24 = vld [vmem:[%s2992_s28 + $0x28] sm:$0xe]  ;;  %v566_v31 = vld [vmem:[%s2992_s28 + $0x30] sm:$0xe] }
  0x36   : > { %v304_v58 = vsel %vm3037_vm5, %v299_v43, %v303_v27  ;;  %v2505_v61 = vrot.slane %v560_v36, 9  ;;  %v2506_v9 = vrot.slane %v561_v41, 9  ;;  %v3126_v10 = vand.u32 %v2530_v47, %v2987_v2  ;;  %v567_v35 = vld [vmem:[%s2992_s28 + $0x38] sm:$0xe]  ;;  %v2539_v36 = vld [vmem:[%s2992_s28 + $0x8] sm:$0xf] }
  0x37   : > { %v2490_v1 = vcombine.low %v290_v48, %v304_v58  ;;  %v354_v3 = vor.u32 %v353_v53, %v350_v52  ;;  %v341_v13 = vrot.slane %v340_v59, 4  ;;  %2741 = vmatprep.subr.bf16.mxu0 %v646_v60  ;;  %v2498_v17 = vcombine.low %v3048_v42, %v3055_v51  ;;  %v2541_v45 = vld [vmem:[%s2992_s28 + $0x10] sm:$0xf]  ;;  %v2580_v53 = vld [vmem:[%s3582_s1 + $0xa] sm:$0x3] }
  0x38   : > { %v590_v15 = vsel %vm3113_vm8, %v2505_v61, %v589_v19  ;;  %v2507_v18 = vrot.slane %v562_v57, 9  ;;  %v594_v27 = vsel %vm3113_vm8, %v2506_v9, %v593_v20  ;;  %v2508_v7 = vrot.slane %v563_v63, 9  ;;  %v3152_v20 = vld [vmem:[%s2992_s28 + $0xc] sm:$0x1]  ;;  %v3181_v28 = vld [vmem:[%s2992_s28 + $0x1c] sm:$0x1] }
  0x39   : > { %2724 = vmatmul.mubr.msk.bf16.vlgmr.msra.gmra.mxu0 %vm375_vm4, %v2490_v1  ;;  %v355_v25 = vrot.slane %v354_v3, 4  ;;  %v995_v30 = vand.u32 %v2555_v0, %v2987_v2  ;;  %v346_v19 = vsel %vm3037_vm5, %v341_v13, %v345_v46  ;;  %v2514_v33 = vcombine.low %v590_v15, %v594_v27  ;;  %v3163_v46 = vld [vmem:[%s2992_s28 + $0x14] sm:$0x1]  ;;  %v2545_v59 = vld [vmem:[%s2992_s28 + $0x20] sm:$0xf] }
  0x3a   : > { %2742 = vmatpush3.bf16.msra.mxu0 %v646_v60  ;;  %v598_v34 = vsel %vm3113_vm8, %v2507_v18, %v597_v22  ;;  %v2499_v8 = vcombine.low %v3019_v16, %v3024_v21  ;;  %v602_v38 = vsel %vm3113_vm8, %v2508_v7, %v601_v29  ;;  %v2509_v39 = vrot.slane %v564_v12, 9  ;;  %v2597_v18 = vld [vmem:[%s3582_s1 + $0xc] sm:$0x3] }
  0x3b   : > { %v360_v37 = vsel %vm3037_vm5, %v355_v25, %v359_v54  ;;  %2761 = vmatprep.subr.bf16.mxu0 %v995_v30  ;;  %v2510_v40 = vrot.slane %v565_v24, 9  ;;  %2743 = vmatprep.mubr.msk.bf16.mxu0 %vm375_vm4, %v2514_v33  ;;  %v2515_v22 = vcombine.low %v598_v34, %v602_v38  ;;  %v2500_v43 = vcombine.low %v3072_v62, %v3078_v6  ;;  %v2543_v54 = vld [vmem:[%s2992_s28 + $0x18] sm:$0xf]  ;;  %v2622_v62 = vld [vmem:[%s3582_s1 + $0xe] sm:$0x3] }
  0x3c   : > { %v2492_v41 = vcombine.low %v346_v19, %v360_v37  ;;  %v2511_v44 = vrot.slane %v566_v31, 9  ;;  %v606_v29 = vsel %vm3113_vm8, %v2509_v39, %v605_v49  ;;  %v613_v48 = vrot.slane %v3085_v14, 5  ;;  %v2566_v6 = vld [vmem:[%s2992_s28 + $0x18] sm:$0xe] }
  0x3d   : > { %v610_v47 = vsel %vm3113_vm8, %v2510_v40, %v609_v50  ;;  %v2512_v52 = vrot.slane %v567_v35, 9  ;;  %v617_v57 = vrot.slane %v3091_v23, 5  ;;  %v857_v49 = vshrl.u32 %v2539_v36, 16  ;;  %v3193_v23 = vld [vmem:[%s2992_s28 + $0x24] sm:$0x1] }
  0x3e   : > { %2728 = vmatmul.mubr.msk.bf16.vlgmr.msra.gmra.mxu1 %vm375_vm4, %v2492_v41  ;;  %v2516_v26 = vcombine.low %v606_v29, %v610_v47  ;;  %v860_v58 = vshll.u32 %v2539_v36, 16  ;;  %v614_v50 = vsel %vm3113_vm8, %v2511_v44, %v613_v48  ;;  %v866_v14 = vshll.u32 %v3152_v20, 16  ;;  %v3211_v35 = vld [vmem:[%s2992_s28 + $0x2c] sm:$0x1]  ;;  %v2549_v40 = vld [vmem:[%s2992_s28 + $0x30] sm:$0xf] }
  0x3f   : > { %2732 = vmatpush3.bf16.msra.mxu1 %v3063_v55  ;;  %2733 = vmatprep.mubr.msk.bf16.mxu1 %vm375_vm4, %v2497_v11  ;;  %v871_v60 = vshrl.u32 %v2541_v45, 16  ;;  %v874_v61 = vshll.u32 %v2541_v45, 16  ;;  %v618_v63 = vsel %vm3113_vm8, %v2512_v52, %v617_v57  ;;  %v859_v55 = vrot.slane %v857_v49, 4 }
  0x40   : > { %2751 = vmatprep.subr.bf16.mxu1 %v3126_v10  ;;  %v862_v0 = vrot.slane %v860_v58, 5  ;;  %v880_v4 = vshll.u32 %v3163_v46, 16  ;;  %v2517_v5 = vcombine.low %v614_v50, %v618_v63  ;;  %v868_v11 = vrot.slane %v866_v14, 5  ;;  %v2553_v58 = vld [vmem:[%s2992_s28 + $0x40] sm:$0xf] }
  0x41   : > { %2744 = vmatmul.mubr.msk.bf16.vlgmr.msra.gmra.mxu0 %vm375_vm4, %v2515_v22  ;;  %v873_v1 = vrot.slane %v871_v60, 4  ;;  %v876_v3 = vrot.slane %v874_v61, 5  ;;  %v3202_v13 = vand.u32 %v2580_v53, %v2987_v2  ;;  %v885_v15 = vshrl.u32 %v2543_v54, 16  ;;  %v2855_v53 = vld [vmem:[%s2992_s28 + $0x8] ss:$8 sps:$4 sm:$0xff]  }
  0x42   : > { %2762 = vmatpush3.bf16.msra.mxu0 %v995_v30  ;;  %2747 = vmatprep.mubr.msk.bf16.mxu0 %vm375_vm4, %v2516_v26  ;;  %v863_v9 = vor.u32 %v862_v0, %v859_v55  ;;  %v882_v12 = vrot.slane %v880_v4, 5  ;;  %v888_v25 = vshll.u32 %v2543_v54, 16  ;;  %v894_v27 = vshll.u32 %v3181_v28, 16  ;;  %v2547_v30 = vld [vmem:[%s2992_s28 + $0x28] sm:$0xf] }
  0x43   : > { %v877_v24 = vor.u32 %v876_v3, %v873_v1  ;;  %v899_v7 = vshrl.u32 %v2545_v59, 16  ;;  %v887_v19 = vrot.slane %v885_v15, 4  ;;  %v902_v33 = vshll.u32 %v2545_v59, 16  ;;  %v3246_v61 = vld [vmem:[%s2992_s28 + $0x44] sm:$0x1] }
  0x44   : > { %v864_v31 = vrot.slane %v863_v9, 4  ;;  %v908_v34 = vshll.u32 %v3193_v23, 16  ;;  %v890_v37 = vrot.slane %v888_v25, 5  ;;  %v896_v38 = vrot.slane %v894_v27, 5 }
  0x45   : > { %v878_v36 = vrot.slane %v877_v24, 4  ;;  %v901_v39 = vrot.slane %v899_v7, 4  ;;  %v904_v22 = vrot.slane %v902_v33, 5  ;;  %v3221_v45 = vand.u32 %v2597_v18, %v2987_v2 }
  0x46   : > { %2734 = vmatmul.mubr.msk.bf16.vlgmr.msra.gmra.mxu1 %vm375_vm4, %v2498_v17  ;;  %v869_v41 = vsel %vm3037_vm5, %v864_v31, %v868_v11  ;;  %v910_v44 = vrot.slane %v908_v34, 5  ;;  %v891_v51 = vor.u32 %v890_v37, %v887_v19  ;;  %v3231_v17 = vld [vmem:[%s2992_s28 + $0x34] sm:$0x1]  ;;  %v913_v29 = vshrl.u32 %v2547_v30, 16  ;;  %v2565_v31 = vld [vmem:[%s2992_s28 + $0x10] sm:$0xe] }
  0x47   : > { %2752 = vmatpush3.bf16.msra.mxu1 %v3126_v10  ;;  %2737 = vmatprep.mubr.msk.bf16.mxu1 %vm375_vm4, %v2499_v8  ;;  %v883_v42 = vsel %vm3037_vm5, %v878_v36, %v882_v12  ;;  %v916_v47 = vshll.u32 %v2547_v30, 16  ;;  %v905_v52 = vor.u32 %v904_v22, %v901_v39  ;;  %v922_v16 = vshll.u32 %v3211_v35, 16  ;;  %v2551_v10 = vld [vmem:[%s2992_s28 + $0x38] sm:$0xf]  ;;  %v3238_v8 = vld [vmem:[%s2992_s28 + $0x3c] sm:$0x1] }
  0x48   : > { %v2556_v48 = vcombine.low %v869_v41, %v883_v42  ;;  %2771 = vmatprep.subr.bf16.mxu1 %v3202_v13  ;;  %2781 = vmatprep.subr.bf16.mxu0 %v3221_v45  ;;  %v927_v21 = vshrl.u32 %v2549_v40, 16  ;;  %v892_v54 = vrot.slane %v891_v51, 4  ;;  %v915_v26 = vrot.slane %v913_v29, 4  ;;  %v2567_v42 = vld [vmem:[%s2992_s28 + $0x20] sm:$0xe] }
  0x49   : > { %2748 = vmatmul.mubr.msk.bf16.gmra.mxu0 %vm375_vm4, %v2517_v5  ;;  %v918_v57 = vrot.slane %v916_v47, 5  ;;  %v930_v49 = vshll.u32 %v2549_v40, 16  ;;  %v906_v59 = vrot.slane %v905_v52, 4  ;;  %v924_v50 = vrot.slane %v922_v16, 5  ;;  %v2564_v5 = vld [vmem:[%s2992_s28 + $0x8] sm:$0xe] }
  0x4a   : > { %2763 = vmatprep.mubr.msk.bf16.mxu0 %vm375_vm4, %v2556_v48  ;;  %v929_v14 = vrot.slane %v927_v21, 4  ;;  %v936_v60 = vshll.u32 %v3231_v17, 16  ;;  %v897_v63 = vsel %vm3037_vm5, %v892_v54, %v896_v38  ;;  %v941_v4 = vshrl.u32 %v2551_v10, 16  ;;  %v2857_v51 = vld [vmem:[%s2992_s28 + $0x28] ss:$8 sps:$4 sm:$0xff]  }
  0x4b   : > { %v919_v55 = vor.u32 %v918_v57, %v915_v26  ;;  %v932_v0 = vrot.slane %v930_v49, 5  ;;  %v911_v11 = vsel %vm3037_vm5, %v906_v59, %v910_v44  ;;  %v944_v3 = vshll.u32 %v2551_v10, 16  ;;  %v2568_v10 = vld [vmem:[%s2992_s28 + $0x28] sm:$0xe] }
  0x4c   : > { %v938_v1 = vrot.slane %v936_v60, 5  ;;  %v950_v9 = vshll.u32 %v3238_v8, 16  ;;  %v2557_v12 = vcombine.low %v897_v63, %v911_v11  ;;  %v943_v24 = vrot.slane %v941_v4, 4  ;;  %v2571_v4 = vld [vmem:[%s2992_s28 + $0x40] sm:$0xe] }
  0x4d   : > { %v920_v15 = vrot.slane %v919_v55, 4  ;;  %v933_v18 = vor.u32 %v932_v0, %v929_v14  ;;  %v946_v25 = vrot.slane %v944_v3, 5  ;;  %v955_v7 = vshrl.u32 %v2553_v58, 16  ;;  %v2570_v14 = vld [vmem:[%s2992_s28 + $0x38] sm:$0xe] }
  0x4e   : > { %2738 = vmatmul.mubr.msk.bf16.gmra.mxu1 %vm375_vm4, %v2500_v43  ;;  %v952_v27 = vrot.slane %v950_v9, 5  ;;  %v958_v30 = vshll.u32 %v2553_v58, 16  ;;  %v964_v34 = vshll.u32 %v3246_v61, 16  ;;  %v2572_v36 = vrot.slane %v2564_v5, 9  ;;  %v2856_v43 = vld [vmem:[%s2992_s28 + $0x18] ss:$8 sps:$4 sm:$0xff]  }
  0x4f   : > { %2753 = vmatprep.mubr.msk.bf16.mxu1 %vm375_vm4, %v2855_v53  ;;  %v925_v19 = vsel %vm3037_vm5, %v920_v15, %v924_v50  ;;  %v934_v33 = vrot.slane %v933_v18, 4  ;;  %v947_v37 = vor.u32 %v946_v25, %v943_v24  ;;  %v957_v38 = vrot.slane %v955_v7, 4  ;;  %v2859_v58 = vld [vmem:[%s2992_s28 + $0x10] ss:$8 sps:$4 sm:$0xff]   ;;  %v2607_v15 = vld [vmem:[%s2992_s28 + $0x14] sm:$0x1] }
  0x50   : > { %v960_v39 = vrot.slane %v958_v30, 5  ;;  %v1096_v40 = vrot.slane %v3152_v20, 5  ;;  %v2573_v22 = vrot.slane %v2565_v31, 9  ;;  %v1100_v44 = vrot.slane %v3163_v46, 5  ;;  %v2647_v20 = vld [vmem:[%s3582_s1 + $0x10] sm:$0x3] }
  0x51   : > { %2764 = vmatmul.mubr.msk.bf16.vlgmr.msra.gmra.mxu0 %vm375_vm4, %v2557_v12  ;;  %v939_v41 = vsel %vm3037_vm5, %v934_v33, %v938_v1  ;;  %v948_v47 = vrot.slane %v947_v37, 4  ;;  %v966_v52 = vrot.slane %v964_v34, 5  ;;  %v2574_v21 = vrot.slane %v2566_v6, 9  ;;  %v2858_v11 = vld [vmem:[%s2992_s28 + $0x38] ss:$8 sps:$4 sm:$0xff]  }
  0x52   : > { %2782 = vmatpush3.bf16.msra.mxu0 %v3221_v45  ;;  %v2558_v29 = vcombine.low %v925_v19, %v939_v41  ;;  %v961_v48 = vor.u32 %v960_v39, %v957_v38  ;;  %v3281_v16 = vsel %vm3113_vm8, %v2572_v36, %v1096_v40  ;;  %v1104_v46 = vrot.slane %v3181_v28, 5  ;;  %v2569_v45 = vld [vmem:[%s2992_s28 + $0x30] sm:$0xe]  ;;  %v2608_v18 = vld [vmem:[%s2992_s28 + $0x18] sm:$0xf] }
  0x53   : > { %v953_v53 = vsel %vm3037_vm5, %v948_v47, %v952_v27  ;;  %v3290_v26 = vand.u32 %v2622_v62, %v2987_v2  ;;  %v2575_v57 = vrot.slane %v2567_v42, 9  ;;  %v1101_v49 = vsel %vm3113_vm8, %v2573_v22, %v1100_v44  ;;  %v2606_v9 = vld [vmem:[%s2992_s28 + $0x10] sm:$0xf]  ;;  %v2609_v25 = vld [vmem:[%s2992_s28 + $0x1c] sm:$0x1] }
  0x54   : > { %2767 = vmatprep.mubr.msk.bf16.mxu0 %vm375_vm4, %v2558_v29  ;;  %v962_v54 = vrot.slane %v961_v48, 4  ;;  %v1108_v59 = vrot.slane %v3193_v23, 5  ;;  %v3297_v28 = vand.u32 %v2647_v20, %v2987_v2  ;;  %v2576_v50 = vrot.slane %v2568_v10, 9  ;;  %v2631_v36 = vld [vmem:[%s2992_s28 + $0x10] sm:$0xe] }
  0x55   : > { %v1112_v63 = vrot.slane %v3211_v35, 5  ;;  %v2577_v55 = vrot.slane %v2569_v45, 9  ;;  %v1116_v0 = vrot.slane %v3231_v17, 5  ;;  %v3310_v23 = vsel %vm3113_vm8, %v2574_v21, %v1104_v46  ;;  %v2632_v62 = vld [vmem:[%s2992_s28 + $0x18] sm:$0xe] }
  0x56   : > { %2754 = vmatmul.mubr.msk.bf16.vlgmr.msra.gmra.mxu1 %vm375_vm4, %v2856_v43  ;;  %v967_v60 = vsel %vm3037_vm5, %v962_v54, %v966_v52  ;;  %v3314_v5 = vsel %vm3113_vm8, %v2575_v57, %v1108_v59  ;;  %v2578_v35 = vrot.slane %v2570_v14, 9  ;;  %2801 = vmatprep.subr.bf16.mxu0 %v3297_v28  ;;  %v1120_v1 = vrot.slane %v3238_v8, 5  ;;  %v2861_v6 = vld [vmem:[%s2992_s28 + $0x30] ss:$8 sps:$4 sm:$0xff]   ;;  %v2610_v40 = vld [vmem:[%s2992_s28 + $0x20] sm:$0xf] }
  0x57   : > { %2772 = vmatpush3.bf16.msra.mxu1 %v3202_v13  ;;  %2757 = vmatprep.mubr.msk.bf16.mxu1 %vm375_vm4, %v2857_v51  ;;  %v2559_v2 = vcombine.low %v953_v53, %v967_v60  ;;  %v3321_v13 = vsel %vm3113_vm8, %v2576_v50, %v1112_v63  ;;  %v3325_v17 = vsel %vm3113_vm8, %v2577_v55, %v1116_v0  ;;  %v2579_v3 = vrot.slane %v2571_v4, 9  ;;  %v2611_v51 = vld [vmem:[%s2992_s28 + $0x24] sm:$0x1]  ;;  %v2612_v20 = vld [vmem:[%s2992_s28 + $0x28] sm:$0xf] }
  0x58   : > { %2791 = vmatprep.subr.bf16.mxu1 %v3290_v26  ;;  %v1124_v12 = vrot.slane %v3246_v61, 5  ;;  %v1364_v24 = vshrl.u32 %v2606_v9, 16  ;;  %v1367_v27 = vshll.u32 %v2606_v9, 16  ;;  %v1373_v7 = vshll.u32 %v2607_v15, 16  ;;  %v2860_v61 = vld [vmem:[%s2992_s28 + $0x20] ss:$8 sps:$4 sm:$0xff]  }
  0x59   : > { %2768 = vmatmul.mubr.msk.bf16.gmra.mxu0 %vm375_vm4, %v2559_v2  ;;  %v1378_v8 = vshrl.u32 %v2608_v18, 16  ;;  %v1381_v30 = vshll.u32 %v2608_v18, 16  ;;  %v2581_v31 = vcombine.low %v3281_v16, %v1101_v49  ;;  %v2582_v19 = vcombine.low %v3310_v23, %v3314_v5  ;;  %v2613_v46 = vld [vmem:[%s2992_s28 + $0x2c] sm:$0x1]  ;;  %v2634_v63 = vld [vmem:[%s2992_s28 + $0x28] sm:$0xe] }
  0x5a   : > { %2783 = vmatprep.mubr.msk.bf16.mxu0 %vm375_vm4, %v2859_v58  ;;  %v2583_v33 = vcombine.low %v3321_v13, %v3325_v17  ;;  %v1366_v34 = vrot.slane %v1364_v24, 4  ;;  %v3346_v43 = vsel %vm3113_vm8, %v2578_v35, %v1120_v1  ;;  %v3350_v37 = vsel %vm3113_vm8, %v2579_v3, %v1124_v12  ;;  %v2633_v58 = vld [vmem:[%s2992_s28 + $0x20] sm:$0xe]  ;;  %v2614_v23 = vld [vmem:[%s2992_s28 + $0x30] sm:$0xf] }
  0x5b   : > { %v1369_v38 = vrot.slane %v1367_v27, 5  ;;  %v1380_v39 = vrot.slane %v1378_v8, 4  ;;  %v1383_v41 = vrot.slane %v1381_v30, 5  ;;  %v1387_v22 = vshll.u32 %v2609_v25, 16  ;;  %v2615_v3 = vld [vmem:[%s2992_s28 + $0x34] sm:$0x1] }
  0x5c   : > { %v2639_v44 = vrot.slane %v2631_v36, 9  ;;  %v1603_v42 = vrot.slane %v2607_v15, 5  ;;  %v1375_v47 = vrot.slane %v1373_v7, 5  ;;  %v2640_v48 = vrot.slane %v2632_v62, 9  ;;  %v2616_v18 = vld [vmem:[%s2992_s28 + $0x38] sm:$0xf] }
  0x5d   : > { %v1370_v29 = vor.u32 %v1369_v38, %v1366_v34  ;;  %v1607_v52 = vrot.slane %v2609_v25, 5  ;;  %v1384_v16 = vor.u32 %v1383_v41, %v1380_v39  ;;  %v1392_v10 = vshrl.u32 %v2610_v40, 16  ;;  %v2862_v24 = vld [vmem:[%s2992_s28 + $0x40] ss:$8 sps:$4 sm:$0xff]   ;;  %v2617_v34 = vld [vmem:[%s2992_s28 + $0x3c] sm:$0x1] }
  0x5e   : > { %2758 = vmatmul.mubr.msk.bf16.gmra.mxu1 %vm375_vm4, %v2858_v11  ;;  %v1604_v21 = vsel %vm3113_vm8, %v2639_v44, %v1603_v42  ;;  %v1395_v45 = vshll.u32 %v2610_v40, 16  ;;  %v1401_v57 = vshll.u32 %v2611_v51, 16  ;;  %v1406_v49 = vshrl.u32 %v2612_v20, 16  ;;  %v2635_v62 = vld [vmem:[%s2992_s28 + $0x30] sm:$0xe] }
  0x5f   : > { %2773 = vmatprep.mubr.msk.bf16.mxu1 %vm375_vm4, %v2581_v31  ;;  %v1371_v53 = vrot.slane %v1370_v29, 4  ;;  %v1608_v54 = vsel %vm3113_vm8, %v2640_v48, %v1607_v52  ;;  %v1385_v59 = vrot.slane %v1384_v16, 4  ;;  %v1389_v50 = vrot.slane %v1387_v22, 5  ;;  %v2636_v40 = vld [vmem:[%s2992_s28 + $0x38] sm:$0xe] }
  0x60   : > { %v1394_v14 = vrot.slane %v1392_v10, 4  ;;  %v1397_v60 = vrot.slane %v1395_v45, 5  ;;  %v2584_v55 = vcombine.low %v3346_v43, %v3350_v37  ;;  %v2648_v0 = vcombine.low %v1604_v21, %v1608_v54  ;;  %v2619_v45 = vld [vmem:[%s2992_s28 + $0x44] sm:$0x1] }
  0x61   : > { %2784 = vmatmul.mubr.msk.bf16.vlgmr.msra.gmra.mxu0 %vm375_vm4, %v2860_v61  ;;  %v1408_v4 = vrot.slane %v1406_v49, 4  ;;  %v1409_v2 = vshll.u32 %v2612_v20, 16  ;;  %v1376_v5 = vsel %vm3037_vm5, %v1371_v53, %v1375_v47  ;;  %v1415_v11 = vshll.u32 %v2613_v46, 16  ;;  %v2620_v20 = vld [vmem:[%s2992_s28 + $0x48] sm:$0xf] }
  0x62   : > { %2802 = vmatpush3.bf16.msra.mxu0 %v3297_v28  ;;  %2787 = vmatprep.mubr.msk.bf16.mxu0 %vm375_vm4, %v2861_v6  ;;  %v1398_v35 = vor.u32 %v1397_v60, %v1394_v14  ;;  %v2641_v1 = vrot.slane %v2633_v58, 9  ;;  %v3373_v28 = vrot.slane %v1401_v57, 5  ;;  %v1611_v12 = vrot.slane %v2611_v51, 5  ;;  %v2618_v51 = vld [vmem:[%s2992_s28 + $0x40] sm:$0xf] }
  0x63   : > { %v1411_v9 = vrot.slane %v1409_v2, 5  ;;  %v2642_v15 = vrot.slane %v2634_v63, 9  ;;  %v1390_v25 = vsel %vm3037_vm5, %v1385_v59, %v1389_v50  ;;  %v1615_v7 = vrot.slane %v2613_v46, 5  ;;  %v2621_v14 = vld [vmem:[%s2992_s28 + $0x4c] sm:$0x1] }
  0x64   : > { %v3379_v27 = vrot.slane %v1398_v35, 4  ;;  %v1420_v8 = vshrl.u32 %v2614_v23, 16  ;;  %v3382_v31 = vrot.slane %v1415_v11, 5  ;;  %v1612_v61 = vsel %vm3113_vm8, %v2641_v1, %v1611_v12  ;;  %v2637_v63 = vld [vmem:[%s2992_s28 + $0x40] sm:$0xe] }
  0x65   : > { %v1412_v30 = vor.u32 %v1411_v9, %v1408_v4  ;;  %v1423_v36 = vshll.u32 %v2614_v23, 16  ;;  %v1429_v38 = vshll.u32 %v2615_v3, 16  ;;  %v1434_v39 = vshrl.u32 %v2616_v18, 16 }
  0x66   : > { %2774 = vmatmul.mubr.msk.bf16.vlgmr.msra.gmra.mxu1 %vm375_vm4, %v2582_v19  ;;  %v1616_v19 = vsel %vm3113_vm8, %v2642_v15, %v1615_v7  ;;  %v1422_v6 = vrot.slane %v1420_v8, 4  ;;  %v2623_v41 = vcombine.low %v1376_v5, %v1390_v25  ;;  %v1437_v17 = vshll.u32 %v2616_v18, 16  ;;  %v2638_v5 = vld [vmem:[%s2992_s28 + $0x48] sm:$0xe] }
  0x67   : > { %2792 = vmatpush3.bf16.msra.mxu1 %v3290_v26  ;;  %2777 = vmatprep.mubr.msk.bf16.mxu1 %vm375_vm4, %v2583_v33  ;;  %v1404_v26 = vsel %vm3037_vm5, %v3379_v27, %v3373_v28  ;;  %v1413_v22 = vrot.slane %v1412_v30, 4  ;;  %v1425_v44 = vrot.slane %v1423_v36, 5  ;;  %v1436_v13 = vrot.slane %v1434_v39, 4 }
  0x68   : > { %v1443_v33 = vshll.u32 %v2617_v34, 16  ;;  %v2643_v42 = vrot.slane %v2635_v62, 9  ;;  %v2649_v29 = vcombine.low %v1612_v61, %v1616_v19  ;;  %v1619_v48 = vrot.slane %v2615_v3, 5 }
  0x69   : > { %2788 = vmatmul.mubr.msk.bf16.gmra.mxu0 %vm375_vm4, %v2862_v24  ;;  %v1426_v47 = vor.u32 %v1425_v44, %v1422_v6  ;;  %v2644_v52 = vrot.slane %v2636_v40, 9  ;;  %v1418_v16 = vsel %vm3037_vm5, %v1413_v22, %v3382_v31  ;;  %v1431_v21 = vrot.slane %v1429_v38, 5 }
  0x6a   : > { %2803 = vmatprep.mubr.msk.bf16.mxu0 %vm375_vm4, %v2648_v0  ;;  %v1439_v46 = vrot.slane %v1437_v17, 5  ;;  %v1623_v10 = vrot.slane %v2617_v34, 5  ;;  %v1620_v54 = vsel %vm3113_vm8, %v2643_v42, %v1619_v48  ;;  %v1448_v57 = vshrl.u32 %v2618_v51, 16 }
  0x6b   : > { %v1427_v53 = vrot.slane %v1426_v47, 4  ;;  %v1451_v49 = vshll.u32 %v2618_v51, 16  ;;  %v1445_v59 = vrot.slane %v1443_v33, 5  ;;  %v1462_v60 = vshrl.u32 %v2620_v20, 16 }
  0x6c   : > { %v1440_v58 = vor.u32 %v1439_v46, %v1436_v13  ;;  %v1624_v50 = vsel %vm3113_vm8, %v2644_v52, %v1623_v10  ;;  %v1450_v4 = vrot.slane %v1448_v57, 4  ;;  %v1457_v23 = vshll.u32 %v2619_v45, 16 }
  0x6d   : > { %v2650_v0 = vcombine.low %v1620_v54, %v1624_v50  ;;  %v1453_v2 = vrot.slane %v1451_v49, 5  ;;  %v1432_v35 = vsel %vm3037_vm5, %v1427_v53, %v1431_v21  ;;  %v1464_v1 = vrot.slane %v1462_v60, 4 }
  0x6e   : > { %2778 = vmatmul.mubr.msk.bf16.gmra.mxu1 %vm375_vm4, %v2584_v55  ;;  %v1441_v11 = vrot.slane %v1440_v58, 4  ;;  %v1465_v3 = vshll.u32 %v2620_v20, 16  ;;  %v1471_v9 = vshll.u32 %v2621_v14, 16  ;;  %v2645_v12 = vrot.slane %v2637_v63, 9 }
  0x6f   : > { %2793 = vmatprep.mubr.msk.bf16.mxu1 %vm375_vm4, %v2623_v41  ;;  %v1454_v28 = vor.u32 %v1453_v2, %v1450_v4  ;;  %v1627_v15 = vrot.slane %v2619_v45, 5  ;;  %v2646_v55 = vrot.slane %v2638_v5, 9  ;;  %v1631_v18 = vrot.slane %v2621_v14, 5 }
  0x70   : > { %v1446_v43 = vsel %vm3037_vm5, %v1441_v11, %v1445_v59  ;;  %v1467_v37 = vrot.slane %v1465_v3, 5  ;;  %v2624_v24 = vcombine.low %v1404_v26, %v1418_v16  ;;  %v1459_v27 = vrot.slane %v1457_v23, 5 }
  0x71   : > { %2804 = vmatmul.mubr.msk.bf16.vlgmr.msra.gmra.mxu0 %vm375_vm4, %v2649_v29  ;;  %v2625_v25 = vcombine.low %v1432_v35, %v1446_v43  ;;  %v1628_v7 = vsel %vm3113_vm8, %v2645_v12, %v1627_v15  ;;  %v1455_v8 = vrot.slane %v1454_v28, 4  ;;  %v1473_v31 = vrot.slane %v1471_v9, 5 }
  0x72   : > { %2807 = vmatprep.mubr.msk.bf16.mxu0 %vm375_vm4, %v2650_v0  ;;  %v1468_v30 = vor.u32 %v1467_v37, %v1464_v1  ;;  %v1632_v61 = vsel %vm3113_vm8, %v2646_v55, %v1631_v18 }
  0x73   : > { %v2651_v36 = vcombine.low %v1628_v7, %v1632_v61  ;;  %v1460_v62 = vsel %vm3037_vm5, %v1455_v8, %v1459_v27 }
  0x74   : > { %v1469_v34 = vrot.slane %v1468_v30, 4 }
  0x76   : > { %2794 = vmatmul.mubr.msk.bf16.vlgmr.msra.gmra.mxu1 %vm375_vm4, %v2624_v24  ;;  %v1474_v19 = vsel %vm3037_vm5, %v1469_v34, %v1473_v31 }
  0x77   : > { %2797 = vmatprep.mubr.msk.bf16.mxu1 %vm375_vm4, %v2625_v25  ;;  %v2626_v6 = vcombine.low %v1460_v62, %v1474_v19 }
  0x79   : > { %2808 = vmatmul.mubr.msk.bf16.gmra.mxu0 %vm375_vm4, %v2651_v36 }
  0x7e   : > { %2798 = vmatmul.mubr.msk.bf16.gmra.mxu1 %vm375_vm4, %v2626_v6 }
  0xf9   : > { %v2725_v38 = vpop.f32.mrf.mxu0 }
  0xfb   : > { %v429_v56 = vpop.f32.mrf.mxu0 }
  0xfd   : > { %v2726_v39 = vpop.f32.mrf.mxu0 }
  0xfe   : > { %v2729_v40 = vpop.f32.mrf.mxu1 }
  0xff   : > { %v432_v41 = vpop.f32.mrf.mxu0 }
 0x100   : > { %v445_v26 = vpop.f32.mrf.mxu1 }
 0x101   : > { %v2745_v22 = vpop.f32.mrf.mxu0 }
 0x102   : > { %v2730_v44 = vpop.f32.mrf.mxu1 }
 0x103   : > { %v682_v13 = vpop.f32.mrf.mxu0 }
 0x104   : > { %v3438_v17 = vpop.f32.mrf.mxu1 }
 0x105   : > { %v2746_v33 = vpop.f32.mrf.mxu0 }
 0x106   : > { %v2735_v42 = vpop.f32.mrf.mxu1 }
 0x107   : > { %v685_v32 = vpop.f32.mrf.mxu0  ;;  %v538_v3 = vadd.f32 %v2735_v42, %v2725_v38 }
 0x108   : > { %v529_v51 = vpop.f32.mrf.mxu1 }
 0x109   : > { %v2749_v29 = vpop.f32.mrf.mxu0  ;;  %v530_v12 = vadd.f32 %v529_v51, %v429_v56  ;;  %v715_v37 = vadd.f32 %v2745_v22, %v538_v3 }
 0x10a   : > { %v2736_v47 = vpop.f32.mrf.mxu1 }
 0x10b   : > { %v698_v48 = vpop.f32.mrf.mxu0  ;;  %v541_v55 = vadd.f32 %v2736_v47, %v2726_v39  ;;  %v713_v27 = vadd.f32 %v682_v13, %v530_v12 }
 0x10c   : > { %v532_v52 = vpop.f32.mrf.mxu1 }
 0x10d   : > { %v3440_v20 = vpop.f32.mrf.mxu0  ;;  %v533_v24 = vadd.f32 %v532_v52, %v432_v41  ;;  %v716_v31 = vadd.f32 %v2746_v33, %v541_v55  ;;  %v2919_v33 = vmov 1983009808  }
 0x10e   : > { %v2739_v16 = vpop.f32.mrf.mxu1 }
 0x10f   : > { %v3442_v21 = vpop.f32.mrf.mxu0  ;;  %v714_v36 = vadd.f32 %v685_v32, %v533_v24  ;;  %v554_v62 = vadd.f32 %v2739_v16, %v2729_v40  ;;  %v1770_v40 = vlaneseq }
 0x110   : > { %v545_v46 = vpop.f32.mrf.mxu1 }
 0x111   : > { %v2765_v10 = vpop.f32.mrf.mxu0  ;;  %v546_v6 = vadd.f32 %v545_v46, %v445_v26  ;;  %v719_v52 = vadd.f32 %v2749_v29, %v554_v62 }
 0x112   : > { %v2740_v45 = vpop.f32.mrf.mxu1 }
 0x113   : > { %v1031_v53 = vpop.f32.mrf.mxu0  ;;  %v557_v22 = vadd.f32 %v2740_v45, %v2730_v44  ;;  %v717_v3 = vadd.f32 %v698_v48, %v546_v6 }
 0x114   : > { %v548_v54 = vpop.f32.mrf.mxu1 }
 0x115   : > { %v2766_v57 = vpop.f32.mrf.mxu0  ;;  %v720_v26 = vadd.f32 %v3440_v20, %v557_v22  ;;  %v549_v46 = vadd.f32 %v548_v54, %v3438_v17  ;;  %v1771_v17 = vshrl.u32 %v1770_v40, 7 }
 0x116   : > { %v2755_v49 = vpop.f32.mrf.mxu1 }
 0x117   : > { %v1034_v58 = vpop.f32.mrf.mxu0  ;;  %v834_v7 = vadd.f32 %v2755_v49, %v715_v37 }
 0x118   : > { %v801_v59 = vpop.f32.mrf.mxu1 }
 0x119   : > { %v3444_v50 = vpop.f32.mrf.mxu0  ;;  %v832_v61 = vadd.f32 %v801_v59, %v713_v27  ;;  %v1064_v38 = vadd.f32 %v2765_v10, %v834_v7  ;;  %v1768_v59 = vunpack.c.l.s4 %v2919_v33  ;;  %v3466_v27 = vld [vmem:[#allocation2] ss:$0 sm:$0xff] }
 0x11a   : > { %v2756_v14 = vpop.f32.mrf.mxu1 }
 0x11b   : > { %v3446_v60 = vpop.f32.mrf.mxu0  ;;  %v835_v56 = vadd.f32 %v2756_v14, %v716_v31  ;;  %v1062_v13 = vadd.f32 %v1031_v53, %v832_v61  ;;  %v1769_v20 = vunpack.c.0.s8 %v1768_v59 }
 0x11c   : > { %v804_v63 = vpop.f32.mrf.mxu1 }
 0x11d   : > { %v3448_v0 = vpop.f32.mrf.mxu0  ;;  %v833_v41 = vadd.f32 %v804_v63, %v714_v36  ;;  %v1065_v12 = vadd.f32 %v2766_v57, %v835_v56  ;;  %v718_v57 = vadd.f32 %v3442_v21, %v549_v46  ;;  %v3472_v6 = vsub.s32 %v1769_v20, %v1771_v17 }
 0x11e   : > { %v2759_v4 = vpop.f32.mrf.mxu1 }
 0x11f   : > { %v3450_v2 = vpop.f32.mrf.mxu0  ;;  %v1063_v10 = vadd.f32 %v1034_v58, %v833_v41  ;;  %v838_v44 = vadd.f32 %v2759_v4, %v719_v52 }
 0x120   : > { %v817_v23 = vpop.f32.mrf.mxu1 }
 0x121   : > { %v2785_v5 = vpop.f32.mrf.mxu0  ;;  %v836_v14 = vadd.f32 %v817_v23, %v717_v3 }
 0x122   : > { %v2760_v35 = vpop.f32.mrf.mxu1 }
 0x123   : > { %v1308_v11 = vpop.f32.mrf.mxu0  ;;  %v1066_v58 = vadd.f32 %v3446_v60, %v836_v14 }
 0x124   : > { %v3452_v1 = vpop.f32.mrf.mxu1 }
 0x125   : > { %v2786_v28 = vpop.f32.mrf.mxu0 }
 0x126   : > { %v2775_v9 = vpop.f32.mrf.mxu1 }
 0x127   : > { %v1311_v15 = vpop.f32.mrf.mxu0  ;;  %v1222_v51 = vadd.f32 %v2775_v9, %v1064_v38  ;;  %v839_v9 = vadd.f32 %v2760_v35, %v720_v26 }
 0x128   : > { %v1189_v43 = vpop.f32.mrf.mxu1 }
 0x129   : > { %v3454_v18 = vpop.f32.mrf.mxu0  ;;  %v1220_v32 = vadd.f32 %v1189_v43, %v1062_v13  ;;  %v1341_v53 = vadd.f32 %v2785_v5, %v1222_v51  ;;  %v1068_v43 = vadd.f32 %v3444_v50, %v838_v44  ;;  %v1069_v35 = vadd.f32 %v3448_v0, %v839_v9 }
 0x12a   : > { %v2776_v25 = vpop.f32.mrf.mxu1 }
 0x12b   : > { %v3456_v8 = vpop.f32.mrf.mxu0  ;;  %v1223_v63 = vadd.f32 %v2776_v25, %v1065_v12  ;;  %v1339_v24 = vadd.f32 %v1308_v11, %v1220_v32  ;;  %v837_v25 = vadd.f32 %v3452_v1, %v718_v57 }
 0x12c   : > { %v1192_v30 = vpop.f32.mrf.mxu1 }
 0x12d   : > { %v3458_v34 = vpop.f32.mrf.mxu0  ;;  %v1221_v29 = vadd.f32 %v1192_v30, %v1063_v10  ;;  %v1342_v4 = vadd.f32 %v2786_v28, %v1223_v63  ;;  %v1067_v1 = vadd.f32 %v3450_v2, %v837_v25 }
 0x12e   : > { %v2779_v19 = vpop.f32.mrf.mxu1 }
 0x12f   : > { %v3460_v39 = vpop.f32.mrf.mxu0  ;;  %v1340_v11 = vadd.f32 %v1311_v15, %v1221_v29  ;;  %v1226_v7 = vadd.f32 %v2779_v19, %v1068_v43 }
 0x130   : > { %v1205_v42 = vpop.f32.mrf.mxu1 }
 0x131   : > { %v2805_v47 = vpop.f32.mrf.mxu0  ;;  %v1224_v31 = vadd.f32 %v1205_v42, %v1066_v58  ;;  %v1345_v15 = vadd.f32 %v3454_v18, %v1226_v7 }
 0x132   : > { %v2780_v49 = vpop.f32.mrf.mxu1 }
 0x133   : > { %v1696_v16 = vpop.f32.mrf.mxu0  ;;  %v1227_v62 = vadd.f32 %v2780_v49, %v1069_v35  ;;  %v1343_v41 = vadd.f32 %v3456_v8, %v1224_v31 }
 0x134   : > { %v1208_v45 = vpop.f32.mrf.mxu1 }
 0x135   : > { %v2806_v55 = vpop.f32.mrf.mxu0  ;;  %v1225_v52 = vadd.f32 %v1208_v45, %v1067_v1 }
 0x136   : > { %v2795_v37 = vpop.f32.mrf.mxu1 }
 0x137   : > { %v1571_v48 = vadd.f32 %v2795_v37, %v1341_v53  ;;  %v1699_v21 = vpop.f32.mrf.mxu0  ;;  %v3486_v44 = vadd.f32 %v3460_v39, %v1225_v52 }
 0x138   : > { %v1538_v54 = vpop.f32.mrf.mxu1 }
 0x139   : > { %v1729_v23 = vadd.f32 %v2805_v47, %v1571_v48  ;;  %v1569_v5 = vadd.f32 %v1538_v54, %v1339_v24  ;;  %v2809_v22 = vpop.f32.mrf.mxu0  ;;  %v1346_v47 = vadd.f32 %v3458_v34, %v1227_v62 }
 0x13a   : > { %v2796_v30 = vpop.f32.mrf.mxu1 }
 0x13b   : > { %v1744_v50 = vadd.f32 %v3466_v27, %v1729_v23  ;;  %v1727_v61 = vadd.f32 %v1696_v16, %v1569_v5  ;;  %v1572_v36 = vadd.f32 %v2796_v30, %v1342_v4  ;;  %v1712_v16 = vpop.f32.mrf.mxu0 }
 0x13c   : > { %v1541_v60 = vpop.f32.mrf.mxu1 }
 0x13d   : > { %v1752_v28 = vmax.f32 %v1744_v50, 0.0  ;;  %v1742_v38 = vadd.f32 %v3466_v27, %v1727_v61  ;;  %v1730_v56 = vadd.f32 %v2806_v55, %v1572_v36  ;;  %v1570_v0 = vadd.f32 %v1541_v60, %v1340_v11  ;;  %v2810_v43 = vpop.f32.mrf.mxu0 }
 0x13e   : > { %v2799_v19 = vpop.f32.mrf.mxu1 }
 0x13f   : > { %v1800_v42 = vcombine.high %v1752_v28, %v1752_v28  ;;  %v1750_v13 = vmax.f32 %v1742_v38, 0.0  ;;  %v1745_v51 = vadd.f32 %v3466_v27, %v1730_v56  ;;  %v1728_v49 = vadd.f32 %v1699_v21, %v1570_v0 }
 0x140   : > { %v1575_v33 = vadd.f32 %v2799_v19, %v1345_v15  ;;  %v1554_v59 = vpop.f32.mrf.mxu1  ;;  %v1807_v3 = vrot.slane %v1752_v28, %v3472_v6 }
 0x141   : > { %v1814_v2 = vrot.slane %v1800_v42, %v3472_v6  ;;  %v1766_v12 = vcombine.high %v1750_v13, %v1750_v13  ;;  %v1773_v18 = vrot.slane %v1750_v13, %v3472_v6  ;;  %v1753_v32 = vmax.f32 %v1745_v51, 0.0 }
 0x142   : > { %v1743_v8 = vadd.f32 %v3466_v27, %v1728_v49  ;;  %v1733_v40 = vadd.f32 %v2809_v22, %v1575_v33  ;;  %v2800_v26 = vpop.f32.mrf.mxu1  ;;  %v1573_v34 = vadd.f32 %v1554_v59, %v1343_v41  ;;  %v1815_v63 = vcombine.high %v1807_v3, %v1807_v3 }
 0x143   : > { %v1780_v46 = vrot.slane %v1766_v12, %v3472_v6  ;;  %v1576_v10 = vadd.f32 %v2800_v26, %v1346_v47  ;;  %v1817_v45 = vcombine.high %v1753_v32, %v1753_v32  ;;  %v1824_v14 = vrot.slane %v1753_v32, %v3472_v6 }
 0x144   : > { %v1751_v53 = vmax.f32 %v1743_v8, 0.0  ;;  %v1816_v9 = vcombine.high %v1814_v2, %v1814_v2  ;;  %v1781_v29 = vcombine.high %v1773_v18, %v1773_v18  ;;  %v1748_v37 = vadd.f32 %v3466_v27, %v1733_v40 }
 0x145   : > { %v1831_v55 = vrot.slane %v1817_v45, %v3472_v6  ;;  %v1832_v24 = vcombine.high %v1824_v14, %v1824_v14  ;;  %v1938_v48 = vmax.f32 %v1807_v3, %v1824_v14  ;;  %v1782_v20 = vcombine.high %v1780_v46, %v1780_v46 }
 0x146   : > { %v1783_v57 = vcombine.high %v1751_v53, %v1751_v53  ;;  %v1790_v17 = vrot.slane %v1751_v53, %v3472_v6  ;;  %v1731_v39 = vadd.f32 %v1712_v16, %v1573_v34  ;;  %v1734_v54 = vadd.f32 %v2810_v43, %v1576_v10 }
 0x147   : > { %v1833_v58 = vcombine.high %v1831_v55, %v1831_v55  ;;  %v1939_v4 = vmax.f32 %v1815_v63, %v1832_v24  ;;  %v1940_v23 = vmax.f32 %v1814_v2, %v1831_v55  ;;  %v2661_v5 = vrot.slane %v1938_v48, 9  ;;  %v1557_v55 = vpop.f32.mrf.mxu1 }
 0x148   : > { %v1797_v35 = vrot.slane %v1783_v57, %v3472_v6  ;;  %v1798_v25 = vcombine.high %v1790_v17, %v1790_v17  ;;  %v1934_v11 = vmax.f32 %v1773_v18, %v1790_v17  ;;  %v3493_v7 = vmax.f32 %v1748_v37, 0.0 }
 0x149   : > { %v1941_v30 = vmax.f32 %v1816_v9, %v1833_v58  ;;  %v2662_v21 = vrot.slane %v1939_v4, 9  ;;  %v2663_v31 = vrot.slane %v1940_v23, 9  ;;  %v2018_v50 = vmax.f32 %v1938_v48, %v2661_v5 }
 0x14a   : > { %v1799_v61 = vcombine.high %v1797_v35, %v1797_v35  ;;  %v1935_v36 = vmax.f32 %v1781_v29, %v1798_v25  ;;  %v1936_v62 = vmax.f32 %v1780_v46, %v1797_v35  ;;  %v2657_v60 = vrot.slane %v1934_v11, 9 }
 0x14b   : > { %v2664_v28 = vrot.slane %v1941_v30, 9  ;;  %v2019_v38 = vmax.f32 %v1939_v4, %v2662_v21  ;;  %v2020_v56 = vmax.f32 %v1940_v23, %v2663_v31  ;;  %v2034_v0 = vpack.c.bf16 %v2018_v50, %v2018_v50 }
 0x14c   : > { %v1937_v1 = vmax.f32 %v1782_v20, %v1799_v61  ;;  %v2658_v15 = vrot.slane %v1935_v36, 9  ;;  %v2659_v19 = vrot.slane %v1936_v62, 9  ;;  %v2014_v22 = vmax.f32 %v1934_v11, %v2657_v60 }
 0x14d   : > { %v2021_v41 = vmax.f32 %v1941_v30, %v2664_v28  ;;  %v2035_v42 = vpack.c.bf16 %v2019_v38, %v2019_v38  ;;  %v2036_v13 = vpack.c.bf16 %v2020_v56, %v2020_v56  ;;  %v2096_v51 = vrot.slane %v2034_v0, %v3472_v6 }
 0x14e   : > { %v2660_v47 = vrot.slane %v1937_v1, 9  ;;  %v2015_v52 = vmax.f32 %v1935_v36, %v2658_v15  ;;  %v2016_v49 = vmax.f32 %v1936_v62, %v2659_v19  ;;  %v2030_v33 = vpack.c.bf16 %v2014_v22, %v2014_v22 }
 0x14f   : > { %v2037_v59 = vpack.c.bf16 %v2021_v41, %v2021_v41  ;;  %v2103_v3 = vrot.slane %v2035_v42, %v3472_v6  ;;  %v2110_v2 = vrot.slane %v2036_v13, %v3472_v6  ;;  %v1746_v12 = vadd.f32 %v3466_v27, %v1731_v39 }
 0x150   : > { %v2017_v18 = vmax.f32 %v1937_v1, %v2660_v47  ;;  %v2031_v32 = vpack.c.bf16 %v2015_v52, %v2015_v52  ;;  %v2032_v8 = vpack.c.bf16 %v2016_v49, %v2016_v49  ;;  %v2068_v40 = vrot.slane %v2030_v33, %v3472_v6 }
 0x151   : > { %v2117_v16 = vrot.slane %v2037_v59, %v3472_v6  ;;  %v2208_v26 = vrot.slane %v2096_v51, %v3472_v6  ;;  %v2215_v46 = vrot.slane %v2103_v3, %v3472_v6  ;;  %v2222_v34 = vrot.slane %v2110_v2, %v3472_v6 }
 0x152   : > { %v2033_v10 = vpack.c.bf16 %v2017_v18, %v2017_v18  ;;  %v2075_v45 = vrot.slane %v2031_v32, %v3472_v6  ;;  %v2082_v14 = vrot.slane %v2032_v8, %v3472_v6  ;;  %v1749_v53 = vadd.f32 %v3466_v27, %v1734_v54 }
 0x153   : > { %v2229_v63 = vrot.slane %v2117_v16, %v3472_v6  ;;  %v2291_v9 = vunpack.c.l.b16 %v2215_v46  ;;  %v2292_v29 = vunpack.c.l.b16 %v2222_v34  ;;  %v2180_v37 = vrot.slane %v2068_v40, %v3472_v6 }
 0x154   : > { %v2089_v24 = vrot.slane %v2033_v10, %v3472_v6  ;;  %v2187_v48 = vrot.slane %v2075_v45, %v3472_v6  ;;  %v2194_v57 = vrot.slane %v2082_v14, %v3472_v6  ;;  %v1868_v43 = vcombine.high %v3493_v7, %v3493_v7 }
 0x155   : > { %v2290_v20 = vunpack.c.l.b16 %v2208_v26  ;;  %v2293_v17 = vunpack.c.l.b16 %v2229_v63  ;;  %v2311_v39 = vrot.slane %v2291_v9, 7  ;;  %v2313_v54 = vrot.slane %v2292_v29, 6 }
 0x156   : > { %v2201_v58 = vrot.slane %v2089_v24, %v3472_v6  ;;  %v2287_v4 = vunpack.c.l.b16 %v2187_v48  ;;  %v2288_v23 = vunpack.c.l.b16 %v2194_v57  ;;  %v1574_v5 = vadd.f32 %v1557_v55, %v3486_v44  ;;  %v1715_v44 = vpop.f32.mrf.mxu0 }
 0x157   : > { %v2312_v35 = vsel %vm2303_vm9, %v2311_v39, %v2290_v20  ;;  %v2315_v25 = vrot.slane %v2293_v17, 5  ;;  %v2286_v11 = vunpack.c.l.b16 %v2180_v37  ;;  %v1754_v30 = vmax.f32 %v1746_v12, 0.0 }
 0x158   : > { %v2314_v21 = vsel %vm2306_vm10, %v2313_v54, %v2312_v35  ;;  %v2289_v31 = vunpack.c.l.b16 %v2201_v58  ;;  %v2302_v50 = vrot.slane %v2287_v4, 7  ;;  %v2305_v61 = vrot.slane %v2288_v23, 6 }
 0x159   : > { %v2316_v36 = vsel %vm2309_vm11, %v2315_v25, %v2314_v21  ;;  %v1875_v62 = vrot.slane %v3493_v7, %v3472_v6  ;;  %v1882_v60 = vrot.slane %v1868_v43, %v3472_v6  ;;  %v1757_v28 = vmax.f32 %v1749_v53, 0.0 }
 0x15a   : > { %v2330_v38 = vpack.c.b16 %v2316_v36, %v2316_v36  ;;  %v2304_v56 = vsel %vm2303_vm9, %v2302_v50, %v2286_v11  ;;  %v2308_v0 = vrot.slane %v2289_v31, 5  ;;  %v1732_v1 = vadd.f32 %v1715_v44, %v1574_v5 }
 0x15b   : > { %v2307_v15 = vsel %vm2306_vm10, %v2305_v61, %v2304_v56  ;;  %v1834_v19 = vcombine.high %v1754_v30, %v1754_v30  ;;  %v1885_v7 = vcombine.high %v1757_v28, %v1757_v28  ;;  %v1892_v42 = vrot.slane %v1757_v28, %v3472_v6 }
 0x15c   : > { %v2346_v22 = vrot.slane %v2330_v38, %v3472_v6  ;;  %v2310_v41 = vsel %vm2309_vm11, %v2308_v0, %v2307_v15  ;;  %v1747_v13 = vadd.f32 %v3466_v27, %v1732_v1  ;;  %v1883_v47 = vcombine.high %v1875_v62, %v1875_v62 }
 0x15d   : > { %v2329_v51 = vpack.c.b16 %v2310_v41, %v2310_v41  ;;  %v1841_v52 = vrot.slane %v1754_v30, %v3472_v6  ;;  %v1899_v49 = vrot.slane %v1885_v7, %v3472_v6  ;;  %v1884_v33 = vcombine.high %v1882_v60, %v1882_v60 }
 0x15e   : > { %2367 = vst.msk [vmem:[%s3527_s26 + $0x2] sm:$0x3] %vm2365_vm12, %v2346_v22  ;;  %v1900_v59 = vcombine.high %v1892_v42, %v1892_v42  ;;  %v1946_v3 = vmax.f32 %v1875_v62, %v1892_v42  ;;  %v1755_v2 = vmax.f32 %v1747_v13, 0.0  ;;  %v1848_v18 = vrot.slane %v1834_v19, %v3472_v6 }
 0x15f   : > { %v2339_v12 = vrot.slane %v2329_v51, %v3472_v6  ;;  %v1901_v32 = vcombine.high %v1899_v49, %v1899_v49  ;;  %v1948_v8 = vmax.f32 %v1882_v60, %v1899_v49  ;;  %v1849_v46 = vcombine.high %v1841_v52, %v1841_v52 }
 0x160   : > { %v1947_v27 = vmax.f32 %v1883_v47, %v1900_v59  ;;  %v2669_v40 = vrot.slane %v1946_v3, 9  ;;  %v1851_v16 = vcombine.high %v1755_v2, %v1755_v2  ;;  %v1858_v26 = vrot.slane %v1755_v2, %v3472_v6 }
 0x161   : > { %2366 = vst.msk [vmem:[%s3527_s26] sm:$0x3] %vm2365_vm12, %v2339_v12  ;;  %v1949_v34 = vmax.f32 %v1884_v33, %v1901_v32  ;;  %v2671_v10 = vrot.slane %v1948_v8, 9  ;;  %v1850_v9 = vcombine.high %v1848_v18, %v1848_v18 }
 0x162   : > { %v2670_v45 = vrot.slane %v1947_v27, 9  ;;  %v2026_v14 = vmax.f32 %v1946_v3, %v2669_v40  ;;  %v1865_v53 = vrot.slane %v1851_v16, %v3472_v6  ;;  %v1866_v63 = vcombine.high %v1858_v26, %v1858_v26 }
 0x163   : > { %v2672_v29 = vrot.slane %v1949_v34, 9  ;;  %v2028_v37 = vmax.f32 %v1948_v8, %v2671_v10  ;;  %v1942_v55 = vmax.f32 %v1841_v52, %v1858_v26 }
 0x164   : > { %v2027_v24 = vmax.f32 %v1947_v27, %v2670_v45  ;;  %v2042_v48 = vpack.c.bf16 %v2026_v14, %v2026_v14  ;;  %v1867_v57 = vcombine.high %v1865_v53, %v1865_v53  ;;  %v1943_v43 = vmax.f32 %v1849_v46, %v1866_v63 }
 0x165   : > { %v2029_v20 = vmax.f32 %v1949_v34, %v2672_v29  ;;  %v2044_v17 = vpack.c.bf16 %v2028_v37, %v2028_v37  ;;  %v1944_v39 = vmax.f32 %v1848_v18, %v1865_v53  ;;  %v2665_v54 = vrot.slane %v1942_v55, 9 }
 0x166   : > { %v2043_v58 = vpack.c.bf16 %v2027_v24, %v2027_v24  ;;  %v2152_v4 = vrot.slane %v2042_v48, %v3472_v6  ;;  %v1945_v23 = vmax.f32 %v1850_v9, %v1867_v57  ;;  %v2666_v5 = vrot.slane %v1943_v43, 9 }
 0x167   : > { %v2045_v35 = vpack.c.bf16 %v2029_v20, %v2029_v20  ;;  %v2166_v25 = vrot.slane %v2044_v17, %v3472_v6  ;;  %v2667_v11 = vrot.slane %v1944_v39, 9  ;;  %v2022_v30 = vmax.f32 %v1942_v55, %v2665_v54 }
 0x168   : > { %v2159_v21 = vrot.slane %v2043_v58, %v3472_v6  ;;  %v2264_v31 = vrot.slane %v2152_v4, %v3472_v6  ;;  %v2668_v50 = vrot.slane %v1945_v23, 9  ;;  %v2023_v61 = vmax.f32 %v1943_v43, %v2666_v5 }
 0x169   : > { %v2173_v36 = vrot.slane %v2045_v35, %v3472_v6  ;;  %v2278_v62 = vrot.slane %v2166_v25, %v3472_v6  ;;  %v2024_v60 = vmax.f32 %v1944_v39, %v2667_v11  ;;  %v2038_v28 = vpack.c.bf16 %v2022_v30, %v2022_v30 }
 0x16a   : > { %v2271_v44 = vrot.slane %v2159_v21, %v3472_v6  ;;  %v2025_v38 = vmax.f32 %v1945_v23, %v2668_v50  ;;  %v2039_v56 = vpack.c.bf16 %v2023_v61, %v2023_v61  ;;  %v2298_v42 = vunpack.c.l.b16 %v2264_v31 }
 0x16b   : > { %v2285_v0 = vrot.slane %v2173_v36, %v3472_v6  ;;  %v2300_v1 = vunpack.c.l.b16 %v2278_v62  ;;  %v2040_v15 = vpack.c.bf16 %v2024_v60, %v2024_v60  ;;  %v2124_v19 = vrot.slane %v2038_v28, %v3472_v6 }
 0x16c   : > { %v2299_v7 = vunpack.c.l.b16 %v2271_v44  ;;  %v2041_v22 = vpack.c.bf16 %v2025_v38, %v2025_v38  ;;  %v2131_v41 = vrot.slane %v2039_v56, %v3472_v6 }
 0x16d   : > { %v2301_v13 = vunpack.c.l.b16 %v2285_v0  ;;  %v2325_v51 = vrot.slane %v2300_v1, 6  ;;  %v2138_v47 = vrot.slane %v2040_v15, %v3472_v6  ;;  %v2236_v33 = vrot.slane %v2124_v19, %v3472_v6 }
 0x16e   : > { %v2323_v52 = vrot.slane %v2299_v7, 7  ;;  %v2145_v49 = vrot.slane %v2041_v22, %v3472_v6  ;;  %v2243_v59 = vrot.slane %v2131_v41, %v3472_v6 }
 0x16f   : > { %v2327_v3 = vrot.slane %v2301_v13, 5  ;;  %v2250_v2 = vrot.slane %v2138_v47, %v3472_v6  ;;  %v2294_v16 = vunpack.c.l.b16 %v2236_v33 }
 0x170   : > { %v2324_v12 = vsel %vm2303_vm9, %v2323_v52, %v2298_v42  ;;  %v2257_v18 = vrot.slane %v2145_v49, %v3472_v6  ;;  %v2295_v32 = vunpack.c.l.b16 %v2243_v59 }
 0x171   : > { %v2326_v8 = vsel %vm2306_vm10, %v2325_v51, %v2324_v12  ;;  %v2296_v27 = vunpack.c.l.b16 %v2250_v2 }
 0x172   : > { %v2328_v40 = vsel %vm2309_vm11, %v2327_v3, %v2326_v8  ;;  %v2297_v26 = vunpack.c.l.b16 %v2257_v18  ;;  %v2317_v46 = vrot.slane %v2295_v32, 7 }
 0x173   : > { %v2332_v34 = vpack.c.b16 %v2328_v40, %v2328_v40  ;;  %v2319_v10 = vrot.slane %v2296_v27, 6 }
 0x174   : > { %v2318_v45 = vsel %vm2303_vm9, %v2317_v46, %v2294_v16  ;;  %v2321_v14 = vrot.slane %v2297_v26, 5 }
 0x175   : > { %v2360_v53 = vrot.slane %v2332_v34, %v3472_v6  ;;  %v2320_v63 = vsel %vm2306_vm10, %v2319_v10, %v2318_v45 }
 0x176   : > { %v2322_v9 = vsel %vm2309_vm11, %v2321_v14, %v2320_v63 }
 0x177   : > { %2369 = vst.msk [vmem:[%s3527_s26 + $0x6] sm:$0x3] %vm2365_vm12, %v2360_v53  ;;  %v2331_v29 = vpack.c.b16 %v2322_v9, %v2322_v9 }
 0x179   : > { %v2353_v37 = vrot.slane %v2331_v29, %v3472_v6 }
 0x17b   : > { %2368 = vst.msk [vmem:[%s3527_s26 + $0x4] sm:$0x3] %vm2365_vm12, %v2353_v37 }
 0x17c PF: > { %s14_s14 = sadd.s32 1, %s2915_s14   ;;  %s3591_s12 = smov %s2911_s13 }
 0x17d   : > { %p11_p2 = scmp.ge.s32.totalorder %s14_s14, 4   ;;  %s3592_s13 = smov %s3594_s16 }
 0x17f   :  { %13 = sbr.rel (!%p11_p2) target bundleno = 2 (0x2), region = 81 }
 0x184   :  { %2397 = vsyncpa [#allocation3], 1 }
 0x185   :  { %2399 = vsyncpa [#allocation3 + $0x1], 1 }

// kernel: vgg_forward.7
= control target key start
LH: loop header
LB: loop body
LE: loop exit
PB: predicated region body
PF: predicated region fallthrough
CT: control target
= control target key end

     0   :  { %s4042_s1 = inlined_call_operand.vmem [shape: bf16[512,512], index: 1, kind: input, shape index: {}]   ;;  %s4043_s0 = inlined_call_operand.vmem [shape: bf16[8,512], index: 0, kind: input, shape index: {}]   ;;  %s4044_s3 = inlined_call_operand.vmem [shape: bf16[512,512], index: 3, kind: input, shape index: {}]   ;;  %s4045_s2 = inlined_call_operand.vmem [shape: f32[1,512], index: 2, kind: input, shape index: {}]   ;;  %s4046_s5 = inlined_call_operand.vmem [shape: bf16[512,128], index: 5, kind: input, shape index: {}]   ;;  %s4047_s4 = inlined_call_operand.vmem [shape: f32[1,512], index: 4, kind: input, shape index: {}]   ;;  %s4048_s6 = inlined_call_operand.vmem [shape: f32[1,128], index: 6, kind: input, shape index: {}]   ;;  %s4049_s7 = inlined_call_operand.vmem [shape: f32[8,128], index: 7, kind: output, shape index: {}]  }
   0x1   :  { %v2652_v0 = vld [vmem:[%s4042_s1 + $0xe4] ss:$16 sps:$4 sm:$0xff]   ;;  %v2656_v2 = vld [vmem:[%s4042_s1 + $0xe0] ss:$16 sps:$4 sm:$0xff]   ;;  %v28_v48 = vld [vmem:[%s4043_s0 + $0x8] sm:$0xff] }
   0x2   :  { %v2654_v1 = vld [vmem:[%s4042_s1 + $0x2e4] ss:$16 sps:$4 sm:$0xff]   ;;  %833 = vmatprep.subr.bf16.mxu0 %v2652_v0  ;;  %v2657_v3 = vld [vmem:[%s4042_s1 + $0x2e0] ss:$16 sps:$4 sm:$0xff]   ;;  %v2318_v51 = vcombine.high %v28_v48, %v28_v48 }
   0x3   :  { %874 = vmatprep.subr.bf16.mxu1 %v2654_v1  ;;  %v2658_v4 = vld [vmem:[%s4042_s1 + $0xc4] ss:$16 sps:$4 sm:$0xff]   ;;  %834 = vmatpush1.bf16.msra.mxu0 %v2656_v2  ;;  %v2662_v6 = vld [vmem:[%s4042_s1 + $0xc0] ss:$16 sps:$4 sm:$0xff]  }
   0x4   :  { %875 = vmatpush1.bf16.msra.mxu1 %v2657_v3  ;;  %v2660_v5 = vld [vmem:[%s4042_s1 + $0x2c4] ss:$16 sps:$4 sm:$0xff]   ;;  %835 = vmatprep.subr.bf16.mxu0 %v2658_v4  ;;  %v2663_v7 = vld [vmem:[%s4042_s1 + $0x2c0] ss:$16 sps:$4 sm:$0xff]   ;;  %v2754_v4 = vld [vmem:[%s4042_s1 + $0xec] ss:$16 sps:$4 sm:$0xff]  }
   0x5   :  { %876 = vmatprep.subr.bf16.mxu1 %v2660_v5  ;;  %v2664_v8 = vld [vmem:[%s4042_s1 + $0xa4] ss:$16 sps:$4 sm:$0xff]   ;;  %v2668_v10 = vld [vmem:[%s4042_s1 + $0xa0] ss:$16 sps:$4 sm:$0xff]   ;;  %906 = vmatprep.mubr.bf16.mxu1 %v2318_v51  ;;  %v2757_v5 = vld [vmem:[%s4042_s1 + $0x2ec] ss:$16 sps:$4 sm:$0xff]  }
   0x6   :  { %v2666_v9 = vld [vmem:[%s4042_s1 + $0x2a4] ss:$16 sps:$4 sm:$0xff]   ;;  %v2669_v11 = vld [vmem:[%s4042_s1 + $0x2a0] ss:$16 sps:$4 sm:$0xff]  }
   0x7   :  { %836 = vmatpush1.bf16.msra.mxu0 %v2662_v6  ;;  %v2670_v12 = vld [vmem:[%s4042_s1 + $0x84] ss:$16 sps:$4 sm:$0xff]   ;;  %v2674_v14 = vld [vmem:[%s4042_s1 + $0x80] ss:$16 sps:$4 sm:$0xff]  }
   0x8   :  { %877 = vmatpush1.bf16.msra.mxu1 %v2663_v7  ;;  %837 = vmatprep.subr.bf16.mxu0 %v2664_v8  ;;  %v2672_v13 = vld [vmem:[%s4042_s1 + $0x284] ss:$16 sps:$4 sm:$0xff]   ;;  %v2675_v15 = vld [vmem:[%s4042_s1 + $0x280] ss:$16 sps:$4 sm:$0xff]   ;;  %v3321_v7 = vcombine.low %v28_v48, %v28_v48  ;;  %v2752_v8 = vld [vmem:[%s4042_s1 + $0xe8] ss:$16 sps:$4 sm:$0xff]  }
   0x9   :  { %878 = vmatprep.subr.bf16.mxu1 %v2666_v9  ;;  %v2676_v16 = vld [vmem:[%s4042_s1 + $0x64] ss:$16 sps:$4 sm:$0xff]   ;;  %v2680_v18 = vld [vmem:[%s4042_s1 + $0x60] ss:$16 sps:$4 sm:$0xff]   ;;  %v2755_v9 = vld [vmem:[%s4042_s1 + $0x2e8] ss:$16 sps:$4 sm:$0xff]  }
   0xa   :  { %v2678_v17 = vld [vmem:[%s4042_s1 + $0x264] ss:$16 sps:$4 sm:$0xff]   ;;  %v2681_v19 = vld [vmem:[%s4042_s1 + $0x260] ss:$16 sps:$4 sm:$0xff]   ;;  %v2812_v48 = vld [vmem:[%s4042_s1 + $0x1a8] ss:$16 sps:$4 sm:$0xff]  }
   0xb   :  { %838 = vmatpush1.bf16.msra.mxu0 %v2668_v10  ;;  %v2682_v20 = vld [vmem:[%s4042_s1 + $0x44] ss:$16 sps:$4 sm:$0xff]   ;;  %v2686_v22 = vld [vmem:[%s4042_s1 + $0x40] ss:$16 sps:$4 sm:$0xff]   ;;  %v2760_v10 = vld [vmem:[%s4042_s1 + $0xcc] ss:$16 sps:$4 sm:$0xff]  }
   0xc   :  { %879 = vmatpush1.bf16.msra.mxu1 %v2669_v11  ;;  %839 = vmatprep.subr.bf16.mxu0 %v2670_v12  ;;  %v2684_v21 = vld [vmem:[%s4042_s1 + $0x244] ss:$16 sps:$4 sm:$0xff]   ;;  %v2687_v23 = vld [vmem:[%s4042_s1 + $0x240] ss:$16 sps:$4 sm:$0xff]   ;;  %v2763_v11 = vld [vmem:[%s4042_s1 + $0x2cc] ss:$16 sps:$4 sm:$0xff]  }
   0xd   :  { %880 = vmatprep.subr.bf16.mxu1 %v2672_v13  ;;  %v2688_v24 = vld [vmem:[%s4042_s1 + $0x24] ss:$16 sps:$4 sm:$0xff]   ;;  %v2692_v26 = vld [vmem:[%s4042_s1 + $0x20] ss:$16 sps:$4 sm:$0xff]   ;;  %v2758_v12 = vld [vmem:[%s4042_s1 + $0xc8] ss:$16 sps:$4 sm:$0xff]  }
   0xe   :  { %v2690_v25 = vld [vmem:[%s4042_s1 + $0x224] ss:$16 sps:$4 sm:$0xff]   ;;  %v2693_v27 = vld [vmem:[%s4042_s1 + $0x220] ss:$16 sps:$4 sm:$0xff]   ;;  %v2761_v13 = vld [vmem:[%s4042_s1 + $0x2c8] ss:$16 sps:$4 sm:$0xff]  }
   0xf   :  { %840 = vmatpush1.bf16.msra.mxu0 %v2674_v14  ;;  %v2694_v28 = vld [vmem:[%s4042_s1 + $0x4] ss:$16 sps:$4 sm:$0xff]   ;;  %v2698_v30 = vld [vmem:[%s4042_s1] ss:$16 sps:$4 sm:$0xff]   ;;  %v2766_v14 = vld [vmem:[%s4042_s1 + $0xac] ss:$16 sps:$4 sm:$0xff]  }
  0x10   :  { %881 = vmatpush1.bf16.msra.mxu1 %v2675_v15  ;;  %841 = vmatprep.subr.bf16.mxu0 %v2676_v16  ;;  %v2696_v29 = vld [vmem:[%s4042_s1 + $0x204] ss:$16 sps:$4 sm:$0xff]   ;;  %v2699_v31 = vld [vmem:[%s4042_s1 + $0x200] ss:$16 sps:$4 sm:$0xff]   ;;  %v2769_v15 = vld [vmem:[%s4042_s1 + $0x2ac] ss:$16 sps:$4 sm:$0xff]  }
  0x11   :  { %882 = vmatprep.subr.bf16.mxu1 %v2678_v17  ;;  %v2700_v32 = vld [vmem:[%s4042_s1 + $0x1e4] ss:$16 sps:$4 sm:$0xff]   ;;  %v2704_v34 = vld [vmem:[%s4042_s1 + $0x1e0] ss:$16 sps:$4 sm:$0xff]   ;;  %v2764_v16 = vld [vmem:[%s4042_s1 + $0xa8] ss:$16 sps:$4 sm:$0xff]  }
  0x12   :  { %v2702_v33 = vld [vmem:[%s4042_s1 + $0x3e4] ss:$16 sps:$4 sm:$0xff]   ;;  %v2705_v35 = vld [vmem:[%s4042_s1 + $0x3e0] ss:$16 sps:$4 sm:$0xff]   ;;  %v2767_v17 = vld [vmem:[%s4042_s1 + $0x2a8] ss:$16 sps:$4 sm:$0xff]  }
  0x13   :  { %842 = vmatpush1.bf16.msra.mxu0 %v2680_v18  ;;  %v2706_v36 = vld [vmem:[%s4042_s1 + $0x1c4] ss:$16 sps:$4 sm:$0xff]   ;;  %v2710_v38 = vld [vmem:[%s4042_s1 + $0x1c0] ss:$16 sps:$4 sm:$0xff]   ;;  %v2772_v18 = vld [vmem:[%s4042_s1 + $0x8c] ss:$16 sps:$4 sm:$0xff]  }
  0x14   :  { %883 = vmatpush1.bf16.msra.mxu1 %v2681_v19  ;;  %843 = vmatprep.subr.bf16.mxu0 %v2682_v20  ;;  %v2708_v37 = vld [vmem:[%s4042_s1 + $0x3c4] ss:$16 sps:$4 sm:$0xff]   ;;  %v2711_v39 = vld [vmem:[%s4042_s1 + $0x3c0] ss:$16 sps:$4 sm:$0xff]   ;;  %v2775_v19 = vld [vmem:[%s4042_s1 + $0x28c] ss:$16 sps:$4 sm:$0xff]  }
  0x15   :  { %884 = vmatprep.subr.bf16.mxu1 %v2684_v21  ;;  %v2712_v40 = vld [vmem:[%s4042_s1 + $0x1a4] ss:$16 sps:$4 sm:$0xff]   ;;  %v2716_v42 = vld [vmem:[%s4042_s1 + $0x1a0] ss:$16 sps:$4 sm:$0xff]   ;;  %v2770_v20 = vld [vmem:[%s4042_s1 + $0x88] ss:$16 sps:$4 sm:$0xff]  }
  0x16   :  { %v2714_v41 = vld [vmem:[%s4042_s1 + $0x3a4] ss:$16 sps:$4 sm:$0xff]   ;;  %v2717_v43 = vld [vmem:[%s4042_s1 + $0x3a0] ss:$16 sps:$4 sm:$0xff]   ;;  %v2773_v21 = vld [vmem:[%s4042_s1 + $0x288] ss:$16 sps:$4 sm:$0xff]  }
  0x17   :  { %844 = vmatpush1.bf16.msra.mxu0 %v2686_v22  ;;  %v2718_v44 = vld [vmem:[%s4042_s1 + $0x184] ss:$16 sps:$4 sm:$0xff]   ;;  %v2722_v49 = vld [vmem:[%s4042_s1 + $0x180] ss:$16 sps:$4 sm:$0xff]   ;;  %v2778_v22 = vld [vmem:[%s4042_s1 + $0x6c] ss:$16 sps:$4 sm:$0xff]  }
  0x18   :  { %885 = vmatpush1.bf16.msra.mxu1 %v2687_v23  ;;  %845 = vmatprep.subr.bf16.mxu0 %v2688_v24  ;;  %v2720_v45 = vld [vmem:[%s4042_s1 + $0x384] ss:$16 sps:$4 sm:$0xff]   ;;  %v2723_v50 = vld [vmem:[%s4042_s1 + $0x380] ss:$16 sps:$4 sm:$0xff]   ;;  %v2781_v23 = vld [vmem:[%s4042_s1 + $0x26c] ss:$16 sps:$4 sm:$0xff]  }
  0x19   :  { %886 = vmatprep.subr.bf16.mxu1 %v2690_v25  ;;  %v27_v46 = vld [vmem:[%s4043_s0] sm:$0xff]  ;;  %v2776_v24 = vld [vmem:[%s4042_s1 + $0x68] ss:$16 sps:$4 sm:$0xff]  }
  0x1a   :  { %v3253_v47 = vcombine.high %v27_v46, %v27_v46  ;;  %v2724_v52 = vld [vmem:[%s4042_s1 + $0x164] ss:$16 sps:$4 sm:$0xff]   ;;  %v2728_v54 = vld [vmem:[%s4042_s1 + $0x160] ss:$16 sps:$4 sm:$0xff]   ;;  %v3319_v6 = vcombine.low %v27_v46, %v27_v46  ;;  %v2779_v25 = vld [vmem:[%s4042_s1 + $0x268] ss:$16 sps:$4 sm:$0xff]  }
  0x1b   :  { %846 = vmatpush1.bf16.msra.mxu0 %v2692_v26  ;;  %v2726_v53 = vld [vmem:[%s4042_s1 + $0x364] ss:$16 sps:$4 sm:$0xff]   ;;  %v2729_v55 = vld [vmem:[%s4042_s1 + $0x360] ss:$16 sps:$4 sm:$0xff]   ;;  %v2784_v26 = vld [vmem:[%s4042_s1 + $0x4c] ss:$16 sps:$4 sm:$0xff]  }
  0x1c   :  { %887 = vmatpush1.bf16.msra.mxu1 %v2693_v27  ;;  %847 = vmatprep.subr.bf16.mxu0 %v2694_v28  ;;  %v2730_v56 = vld [vmem:[%s4042_s1 + $0x144] ss:$16 sps:$4 sm:$0xff]   ;;  %v2734_v58 = vld [vmem:[%s4042_s1 + $0x140] ss:$16 sps:$4 sm:$0xff]   ;;  %v2787_v27 = vld [vmem:[%s4042_s1 + $0x24c] ss:$16 sps:$4 sm:$0xff]  }
  0x1d   :  { %888 = vmatprep.subr.bf16.mxu1 %v2696_v29  ;;  %865 = vmatprep.mubr.bf16.mxu0 %v3253_v47  ;;  %v2732_v57 = vld [vmem:[%s4042_s1 + $0x344] ss:$16 sps:$4 sm:$0xff]   ;;  %v2735_v59 = vld [vmem:[%s4042_s1 + $0x340] ss:$16 sps:$4 sm:$0xff]   ;;  %v2782_v28 = vld [vmem:[%s4042_s1 + $0x48] ss:$16 sps:$4 sm:$0xff]  }
  0x1e   :  { %v2736_v60 = vld [vmem:[%s4042_s1 + $0x124] ss:$16 sps:$4 sm:$0xff]   ;;  %v2740_v62 = vld [vmem:[%s4042_s1 + $0x120] ss:$16 sps:$4 sm:$0xff]   ;;  %v2785_v29 = vld [vmem:[%s4042_s1 + $0x248] ss:$16 sps:$4 sm:$0xff]  }
  0x1f   :  { %848 = vmatpush1.bf16.msra.mxu0 %v2698_v30  ;;  %v2738_v61 = vld [vmem:[%s4042_s1 + $0x324] ss:$16 sps:$4 sm:$0xff]   ;;  %v2741_v63 = vld [vmem:[%s4042_s1 + $0x320] ss:$16 sps:$4 sm:$0xff]   ;;  %v2790_v30 = vld [vmem:[%s4042_s1 + $0x2c] ss:$16 sps:$4 sm:$0xff]  }
  0x20   :  { %889 = vmatpush1.bf16.msra.mxu1 %v2699_v31  ;;  %849 = vmatprep.subr.bf16.mxu0 %v2700_v32  ;;  %v2742_v0 = vld [vmem:[%s4042_s1 + $0x104] ss:$16 sps:$4 sm:$0xff]   ;;  %v2746_v2 = vld [vmem:[%s4042_s1 + $0x100] ss:$16 sps:$4 sm:$0xff]   ;;  %v2793_v31 = vld [vmem:[%s4042_s1 + $0x22c] ss:$16 sps:$4 sm:$0xff]  }
  0x21   :  { %890 = vmatprep.subr.bf16.mxu1 %v2702_v33  ;;  %v2744_v1 = vld [vmem:[%s4042_s1 + $0x304] ss:$16 sps:$4 sm:$0xff]   ;;  %v2747_v3 = vld [vmem:[%s4042_s1 + $0x300] ss:$16 sps:$4 sm:$0xff]   ;;  %v2788_v32 = vld [vmem:[%s4042_s1 + $0x28] ss:$16 sps:$4 sm:$0xff]  }
  0x22   :  { %v2791_v33 = vld [vmem:[%s4042_s1 + $0x228] ss:$16 sps:$4 sm:$0xff]   ;;  %v2814_v46 = vld [vmem:[%s4042_s1 + $0x1ac] ss:$16 sps:$4 sm:$0xff]  }
  0x23   :  { %850 = vmatpush2.bf16.msra.mxu0 %v2704_v34  ;;  %v2796_v34 = vld [vmem:[%s4042_s1 + $0xc] ss:$16 sps:$4 sm:$0xff]  }
  0x24   :  { %891 = vmatpush2.bf16.msra.mxu1 %v2705_v35  ;;  %851 = vmatprep.subr.bf16.mxu0 %v2706_v36  ;;  %v2799_v35 = vld [vmem:[%s4042_s1 + $0x20c] ss:$16 sps:$4 sm:$0xff]   ;;  %v2794_v36 = vld [vmem:[%s4042_s1 + $0x8] ss:$16 sps:$4 sm:$0xff]  }
  0x25   :  { %892 = vmatprep.subr.bf16.mxu1 %v2708_v37  ;;  %v2797_v37 = vld [vmem:[%s4042_s1 + $0x208] ss:$16 sps:$4 sm:$0xff]  }
  0x27   :  { %852 = vmatpush2.bf16.msra.mxu0 %v2710_v38  ;;  %v2802_v38 = vld [vmem:[%s4042_s1 + $0x1ec] ss:$16 sps:$4 sm:$0xff]  }
  0x28   :  { %893 = vmatpush2.bf16.msra.mxu1 %v2711_v39  ;;  %853 = vmatprep.subr.bf16.mxu0 %v2712_v40  ;;  %v2805_v39 = vld [vmem:[%s4042_s1 + $0x3ec] ss:$16 sps:$4 sm:$0xff]   ;;  %v2800_v40 = vld [vmem:[%s4042_s1 + $0x1e8] ss:$16 sps:$4 sm:$0xff]  }
  0x29   :  { %894 = vmatprep.subr.bf16.mxu1 %v2714_v41  ;;  %v2803_v41 = vld [vmem:[%s4042_s1 + $0x3e8] ss:$16 sps:$4 sm:$0xff]  }
  0x2b   :  { %854 = vmatpush2.bf16.msra.mxu0 %v2716_v42  ;;  %v2808_v42 = vld [vmem:[%s4042_s1 + $0x1cc] ss:$16 sps:$4 sm:$0xff]  }
  0x2c   :  { %895 = vmatpush2.bf16.msra.mxu1 %v2717_v43  ;;  %855 = vmatprep.subr.bf16.mxu0 %v2718_v44  ;;  %v2811_v43 = vld [vmem:[%s4042_s1 + $0x3cc] ss:$16 sps:$4 sm:$0xff]   ;;  %v2806_v44 = vld [vmem:[%s4042_s1 + $0x1c8] ss:$16 sps:$4 sm:$0xff]  }
  0x2d   :  { %896 = vmatprep.subr.bf16.mxu1 %v2720_v45  ;;  %v2809_v45 = vld [vmem:[%s4042_s1 + $0x3c8] ss:$16 sps:$4 sm:$0xff]  }
  0x2f   :  { %856 = vmatpush2.bf16.msra.mxu0 %v2722_v49  ;;  %v2815_v49 = vld [vmem:[%s4042_s1 + $0x3a8] ss:$16 sps:$4 sm:$0xff]  }
  0x30   :  { %897 = vmatpush2.bf16.msra.mxu1 %v2723_v50  ;;  %857 = vmatprep.subr.bf16.mxu0 %v2724_v52  ;;  %v2820_v50 = vld [vmem:[%s4042_s1 + $0x18c] ss:$16 sps:$4 sm:$0xff]   ;;  %v2818_v52 = vld [vmem:[%s4042_s1 + $0x188] ss:$16 sps:$4 sm:$0xff]  }
  0x31   :  { %898 = vmatprep.subr.bf16.mxu1 %v2726_v53  ;;  %v2821_v53 = vld [vmem:[%s4042_s1 + $0x388] ss:$16 sps:$4 sm:$0xff]  }
  0x33   :  { %858 = vmatpush2.bf16.msra.mxu0 %v2728_v54  ;;  %v2826_v54 = vld [vmem:[%s4042_s1 + $0x16c] ss:$16 sps:$4 sm:$0xff]  }
  0x34   :  { %899 = vmatpush2.bf16.msra.mxu1 %v2729_v55  ;;  %859 = vmatprep.subr.bf16.mxu0 %v2730_v56  ;;  %v2829_v55 = vld [vmem:[%s4042_s1 + $0x36c] ss:$16 sps:$4 sm:$0xff]   ;;  %v2824_v56 = vld [vmem:[%s4042_s1 + $0x168] ss:$16 sps:$4 sm:$0xff]  }
  0x35   :  { %900 = vmatprep.subr.bf16.mxu1 %v2732_v57  ;;  %v2827_v57 = vld [vmem:[%s4042_s1 + $0x368] ss:$16 sps:$4 sm:$0xff]  }
  0x37   :  { %860 = vmatpush2.bf16.msra.mxu0 %v2734_v58  ;;  %v2832_v58 = vld [vmem:[%s4042_s1 + $0x14c] ss:$16 sps:$4 sm:$0xff]  }
  0x38   :  { %901 = vmatpush2.bf16.msra.mxu1 %v2735_v59  ;;  %861 = vmatprep.subr.bf16.mxu0 %v2736_v60  ;;  %v2835_v59 = vld [vmem:[%s4042_s1 + $0x34c] ss:$16 sps:$4 sm:$0xff]   ;;  %v2830_v60 = vld [vmem:[%s4042_s1 + $0x148] ss:$16 sps:$4 sm:$0xff]  }
  0x39   :  { %902 = vmatprep.subr.bf16.mxu1 %v2738_v61  ;;  %v2833_v61 = vld [vmem:[%s4042_s1 + $0x348] ss:$16 sps:$4 sm:$0xff]  }
  0x3b   :  { %862 = vmatpush2.bf16.msra.mxu0 %v2740_v62  ;;  %v2838_v62 = vld [vmem:[%s4042_s1 + $0x12c] ss:$16 sps:$4 sm:$0xff]  }
  0x3c   :  { %903 = vmatpush2.bf16.msra.mxu1 %v2741_v63  ;;  %863 = vmatprep.subr.bf16.mxu0 %v2742_v0  ;;  %v2841_v63 = vld [vmem:[%s4042_s1 + $0x32c] ss:$16 sps:$4 sm:$0xff]   ;;  %v2836_v0 = vld [vmem:[%s4042_s1 + $0x128] ss:$16 sps:$4 sm:$0xff]  }
  0x3d   :  { %904 = vmatprep.subr.bf16.mxu1 %v2744_v1  ;;  %v2839_v1 = vld [vmem:[%s4042_s1 + $0x328] ss:$16 sps:$4 sm:$0xff]  }
  0x3f   :  { %864 = vmatpush2.bf16.msra.mxu0 %v2746_v2  ;;  %v2844_v2 = vld [vmem:[%s4042_s1 + $0x10c] ss:$16 sps:$4 sm:$0xff]  }
  0x40   :  { %905 = vmatpush2.bf16.msra.mxu1 %v2747_v3  ;;  %915 = vmatprep.subr.bf16.mxu0 %v2754_v4  ;;  %v2847_v3 = vld [vmem:[%s4042_s1 + $0x30c] ss:$16 sps:$4 sm:$0xff]   ;;  %v2842_v4 = vld [vmem:[%s4042_s1 + $0x108] ss:$16 sps:$4 sm:$0xff]  }
  0x41   :  { %956 = vmatprep.subr.bf16.mxu1 %v2757_v5  ;;  %v2845_v5 = vld [vmem:[%s4042_s1 + $0x308] ss:$16 sps:$4 sm:$0xff]  }
  0x42   :  { %866 = vmatmul.mubr.bf16.vlgmr.msra.gmra.mxu0 %v3319_v6 }
  0x43   :  { %907 = vmatmul.mubr.bf16.vlgmr.msra.gmra.mxu1 %v3321_v7  ;;  %916 = vmatpush1.bf16.msra.mxu0 %v2752_v8  ;;  %v2850_v8 = vld [vmem:[%s4044_s3 + $0xe4] ss:$16 sps:$4 sm:$0xff]  }
  0x44   :  { %957 = vmatpush1.bf16.msra.mxu1 %v2755_v9  ;;  %917 = vmatprep.subr.bf16.mxu0 %v2760_v10  ;;  %v2848_v9 = vld [vmem:[%s4044_s3 + $0xe0] ss:$16 sps:$4 sm:$0xff]   ;;  %v2853_v10 = vld [vmem:[%s4044_s3 + $0xc4] ss:$16 sps:$4 sm:$0xff]  }
  0x45   :  { %958 = vmatprep.subr.bf16.mxu1 %v2763_v11  ;;  %947 = vmatprep.mubr.bf16.mxu0 %v3253_v47  ;;  %v2817_v47 = vld [vmem:[%s4042_s1 + $0x3ac] ss:$16 sps:$4 sm:$0xff]   ;;  %v2851_v11 = vld [vmem:[%s4044_s3 + $0xc0] ss:$16 sps:$4 sm:$0xff]  }
  0x46   :  { %988 = vmatprep.mubr.bf16.mxu1 %v2318_v51  ;;  %v2823_v51 = vld [vmem:[%s4042_s1 + $0x38c] ss:$16 sps:$4 sm:$0xff]  }
  0x47   :  { %918 = vmatpush1.bf16.msra.mxu0 %v2758_v12  ;;  %v2856_v12 = vld [vmem:[%s4044_s3 + $0xa4] ss:$16 sps:$4 sm:$0xff]  }
  0x48   :  { %959 = vmatpush1.bf16.msra.mxu1 %v2761_v13  ;;  %919 = vmatprep.subr.bf16.mxu0 %v2766_v14  ;;  %v2854_v13 = vld [vmem:[%s4044_s3 + $0xa0] ss:$16 sps:$4 sm:$0xff]   ;;  %v2898_v14 = vld [vmem:[%s4044_s3 + $0x2e4] ss:$16 sps:$4 sm:$0xff]  }
  0x49   :  { %960 = vmatprep.subr.bf16.mxu1 %v2769_v15  ;;  %v2862_v15 = vld [vmem:[%s4044_s3 + $0x64] ss:$16 sps:$4 sm:$0xff]  }
  0x4b   :  { %920 = vmatpush1.bf16.msra.mxu0 %v2764_v16  ;;  %v2896_v16 = vld [vmem:[%s4044_s3 + $0x2e0] ss:$16 sps:$4 sm:$0xff]  }
  0x4c   :  { %961 = vmatpush1.bf16.msra.mxu1 %v2767_v17  ;;  %921 = vmatprep.subr.bf16.mxu0 %v2772_v18  ;;  %v2860_v17 = vld [vmem:[%s4044_s3 + $0x60] ss:$16 sps:$4 sm:$0xff]  }
  0x4d   :  { %962 = vmatprep.subr.bf16.mxu1 %v2775_v19  ;;  %v2902_v18 = vld [vmem:[%s4044_s3 + $0x2c0] ss:$16 sps:$4 sm:$0xff]   ;;  %v2904_v19 = vld [vmem:[%s4044_s3 + $0x2c4] ss:$16 sps:$4 sm:$0xff]  }
  0x4f   :  { %922 = vmatpush1.bf16.msra.mxu0 %v2770_v20  ;;  %v2865_v20 = vld [vmem:[%s4044_s3 + $0x44] ss:$16 sps:$4 sm:$0xff]  }
  0x50   :  { %963 = vmatpush1.bf16.msra.mxu1 %v2773_v21  ;;  %923 = vmatprep.subr.bf16.mxu0 %v2778_v22  ;;  %v2863_v21 = vld [vmem:[%s4044_s3 + $0x40] ss:$16 sps:$4 sm:$0xff]  }
  0x51   :  { %964 = vmatprep.subr.bf16.mxu1 %v2781_v23  ;;  %v2908_v22 = vld [vmem:[%s4044_s3 + $0x2a0] ss:$16 sps:$4 sm:$0xff]   ;;  %v2910_v23 = vld [vmem:[%s4044_s3 + $0x2a4] ss:$16 sps:$4 sm:$0xff]  }
  0x53   :  { %924 = vmatpush1.bf16.msra.mxu0 %v2776_v24  ;;  %v2868_v24 = vld [vmem:[%s4044_s3 + $0x24] ss:$16 sps:$4 sm:$0xff]  }
  0x54   :  { %965 = vmatpush1.bf16.msra.mxu1 %v2779_v25  ;;  %925 = vmatprep.subr.bf16.mxu0 %v2784_v26  ;;  %v2866_v25 = vld [vmem:[%s4044_s3 + $0x20] ss:$16 sps:$4 sm:$0xff]  }
  0x55   :  { %966 = vmatprep.subr.bf16.mxu1 %v2787_v27  ;;  %v2914_v26 = vld [vmem:[%s4044_s3 + $0x280] ss:$16 sps:$4 sm:$0xff]   ;;  %v2916_v27 = vld [vmem:[%s4044_s3 + $0x284] ss:$16 sps:$4 sm:$0xff]  }
  0x57   :  { %926 = vmatpush1.bf16.msra.mxu0 %v2782_v28  ;;  %v2871_v28 = vld [vmem:[%s4044_s3 + $0x4] ss:$16 sps:$4 sm:$0xff]  }
  0x58   :  { %967 = vmatpush1.bf16.msra.mxu1 %v2785_v29  ;;  %927 = vmatprep.subr.bf16.mxu0 %v2790_v30  ;;  %v2869_v29 = vld [vmem:[%s4044_s3] ss:$16 sps:$4 sm:$0xff]  }
  0x59   :  { %968 = vmatprep.subr.bf16.mxu1 %v2793_v31  ;;  %v2920_v30 = vld [vmem:[%s4044_s3 + $0x260] ss:$16 sps:$4 sm:$0xff]   ;;  %v2922_v31 = vld [vmem:[%s4044_s3 + $0x264] ss:$16 sps:$4 sm:$0xff]  }
  0x5b   :  { %928 = vmatpush1.bf16.msra.mxu0 %v2788_v32  ;;  %v2874_v32 = vld [vmem:[%s4044_s3 + $0x1e4] ss:$16 sps:$4 sm:$0xff]  }
  0x5c   :  { %969 = vmatpush1.bf16.msra.mxu1 %v2791_v33  ;;  %929 = vmatprep.subr.bf16.mxu0 %v2796_v34  ;;  %v2872_v33 = vld [vmem:[%s4044_s3 + $0x1e0] ss:$16 sps:$4 sm:$0xff]  }
  0x5d   :  { %970 = vmatprep.subr.bf16.mxu1 %v2799_v35  ;;  %v2926_v34 = vld [vmem:[%s4044_s3 + $0x240] ss:$16 sps:$4 sm:$0xff]   ;;  %v2928_v35 = vld [vmem:[%s4044_s3 + $0x244] ss:$16 sps:$4 sm:$0xff]  }
  0x5f   :  { %930 = vmatpush1.bf16.msra.mxu0 %v2794_v36  ;;  %v2877_v36 = vld [vmem:[%s4044_s3 + $0x1c4] ss:$16 sps:$4 sm:$0xff]  }
  0x60   :  { %971 = vmatpush1.bf16.msra.mxu1 %v2797_v37  ;;  %931 = vmatprep.subr.bf16.mxu0 %v2802_v38  ;;  %v2875_v37 = vld [vmem:[%s4044_s3 + $0x1c0] ss:$16 sps:$4 sm:$0xff]  }
  0x61   :  { %972 = vmatprep.subr.bf16.mxu1 %v2805_v39  ;;  %v2932_v38 = vld [vmem:[%s4044_s3 + $0x220] ss:$16 sps:$4 sm:$0xff]   ;;  %v2934_v39 = vld [vmem:[%s4044_s3 + $0x224] ss:$16 sps:$4 sm:$0xff]  }
  0x63   :  { %932 = vmatpush2.bf16.msra.mxu0 %v2800_v40  ;;  %v2880_v40 = vld [vmem:[%s4044_s3 + $0x1a4] ss:$16 sps:$4 sm:$0xff]  }
  0x64   :  { %973 = vmatpush2.bf16.msra.mxu1 %v2803_v41  ;;  %933 = vmatprep.subr.bf16.mxu0 %v2808_v42  ;;  %v2878_v41 = vld [vmem:[%s4044_s3 + $0x1a0] ss:$16 sps:$4 sm:$0xff]  }
  0x65   :  { %974 = vmatprep.subr.bf16.mxu1 %v2811_v43  ;;  %v2938_v42 = vld [vmem:[%s4044_s3 + $0x200] ss:$16 sps:$4 sm:$0xff]   ;;  %v2940_v43 = vld [vmem:[%s4044_s3 + $0x204] ss:$16 sps:$4 sm:$0xff]  }
  0x67   :  { %934 = vmatpush2.bf16.msra.mxu0 %v2806_v44  ;;  %v2883_v44 = vld [vmem:[%s4044_s3 + $0x184] ss:$16 sps:$4 sm:$0xff]  }
  0x68   :  { %975 = vmatpush2.bf16.msra.mxu1 %v2809_v45  ;;  %935 = vmatprep.subr.bf16.mxu0 %v2814_v46  ;;  %v2881_v45 = vld [vmem:[%s4044_s3 + $0x180] ss:$16 sps:$4 sm:$0xff]  }
  0x69   :  { %976 = vmatprep.subr.bf16.mxu1 %v2817_v47  ;;  %v2944_v46 = vld [vmem:[%s4044_s3 + $0x3e0] ss:$16 sps:$4 sm:$0xff]   ;;  %v2946_v47 = vld [vmem:[%s4044_s3 + $0x3e4] ss:$16 sps:$4 sm:$0xff]  }
  0x6b   :  { %936 = vmatpush2.bf16.msra.mxu0 %v2812_v48  ;;  %v2886_v48 = vld [vmem:[%s4044_s3 + $0x164] ss:$16 sps:$4 sm:$0xff]  }
  0x6c   :  { %977 = vmatpush2.bf16.msra.mxu1 %v2815_v49  ;;  %937 = vmatprep.subr.bf16.mxu0 %v2820_v50  ;;  %v2884_v49 = vld [vmem:[%s4044_s3 + $0x160] ss:$16 sps:$4 sm:$0xff]  }
  0x6d   :  { %978 = vmatprep.subr.bf16.mxu1 %v2823_v51  ;;  %v2950_v50 = vld [vmem:[%s4044_s3 + $0x3c0] ss:$16 sps:$4 sm:$0xff]   ;;  %v2952_v51 = vld [vmem:[%s4044_s3 + $0x3c4] ss:$16 sps:$4 sm:$0xff]  }
  0x6f   :  { %938 = vmatpush2.bf16.msra.mxu0 %v2818_v52  ;;  %v2889_v52 = vld [vmem:[%s4044_s3 + $0x144] ss:$16 sps:$4 sm:$0xff]  }
  0x70   :  { %979 = vmatpush2.bf16.msra.mxu1 %v2821_v53  ;;  %939 = vmatprep.subr.bf16.mxu0 %v2826_v54  ;;  %v2887_v53 = vld [vmem:[%s4044_s3 + $0x140] ss:$16 sps:$4 sm:$0xff]  }
  0x71   :  { %980 = vmatprep.subr.bf16.mxu1 %v2829_v55  ;;  %v2956_v54 = vld [vmem:[%s4044_s3 + $0x3a0] ss:$16 sps:$4 sm:$0xff]   ;;  %v2958_v55 = vld [vmem:[%s4044_s3 + $0x3a4] ss:$16 sps:$4 sm:$0xff]  }
  0x73   :  { %940 = vmatpush2.bf16.msra.mxu0 %v2824_v56  ;;  %v2892_v56 = vld [vmem:[%s4044_s3 + $0x124] ss:$16 sps:$4 sm:$0xff]  }
  0x74   :  { %981 = vmatpush2.bf16.msra.mxu1 %v2827_v57  ;;  %941 = vmatprep.subr.bf16.mxu0 %v2832_v58  ;;  %v2890_v57 = vld [vmem:[%s4044_s3 + $0x120] ss:$16 sps:$4 sm:$0xff]  }
  0x75   :  { %982 = vmatprep.subr.bf16.mxu1 %v2835_v59  ;;  %v2962_v58 = vld [vmem:[%s4044_s3 + $0x380] ss:$16 sps:$4 sm:$0xff]   ;;  %v2964_v59 = vld [vmem:[%s4044_s3 + $0x384] ss:$16 sps:$4 sm:$0xff]  }
  0x77   :  { %942 = vmatpush2.bf16.msra.mxu0 %v2830_v60  ;;  %v2895_v60 = vld [vmem:[%s4044_s3 + $0x104] ss:$16 sps:$4 sm:$0xff]  }
  0x78   :  { %983 = vmatpush2.bf16.msra.mxu1 %v2833_v61  ;;  %943 = vmatprep.subr.bf16.mxu0 %v2838_v62  ;;  %v2893_v61 = vld [vmem:[%s4044_s3 + $0x100] ss:$16 sps:$4 sm:$0xff]  }
  0x79   :  { %984 = vmatprep.subr.bf16.mxu1 %v2841_v63  ;;  %v2968_v62 = vld [vmem:[%s4044_s3 + $0x360] ss:$16 sps:$4 sm:$0xff]   ;;  %v2970_v63 = vld [vmem:[%s4044_s3 + $0x364] ss:$16 sps:$4 sm:$0xff]  }
  0x7b   :  { %944 = vmatpush2.bf16.msra.mxu0 %v2836_v0  ;;  %v2901_v0 = vld [vmem:[%s4044_s3 + $0xec] ss:$16 sps:$4 sm:$0xff]  }
  0x7c   :  { %985 = vmatpush2.bf16.msra.mxu1 %v2839_v1  ;;  %945 = vmatprep.subr.bf16.mxu0 %v2844_v2  ;;  %v2974_v1 = vld [vmem:[%s4044_s3 + $0x340] ss:$16 sps:$4 sm:$0xff]   ;;  %v2976_v2 = vld [vmem:[%s4044_s3 + $0x344] ss:$16 sps:$4 sm:$0xff]  }
  0x7d   :  { %986 = vmatprep.subr.bf16.mxu1 %v2847_v3  ;;  %v2982_v3 = vld [vmem:[%s4044_s3 + $0x324] ss:$16 sps:$4 sm:$0xff]  }
  0x7f   :  { %946 = vmatpush2.bf16.msra.mxu0 %v2842_v4  ;;  %v2980_v4 = vld [vmem:[%s4044_s3 + $0x320] ss:$16 sps:$4 sm:$0xff]  }
  0x80   :  { %987 = vmatpush2.bf16.msra.mxu1 %v2845_v5  ;;  %1795 = vmatprep.subr.bf16.mxu0 %v2850_v8  ;;  %v2988_v5 = vld [vmem:[%s4044_s3 + $0x304] ss:$16 sps:$4 sm:$0xff]   ;;  %v2986_v8 = vld [vmem:[%s4044_s3 + $0x300] ss:$16 sps:$4 sm:$0xff]  }
  0x81   :  { %1836 = vmatprep.subr.bf16.mxu1 %v2898_v14 }
  0x82   :  { %948 = vmatmul.mubr.bf16.vlgmr.msra.gmra.mxu0 %v3319_v6  ;;  %v2859_v6 = vld [vmem:[%s4044_s3 + $0x84] ss:$16 sps:$4 sm:$0xff]  }
  0x83   :  { %989 = vmatmul.mubr.bf16.vlgmr.msra.gmra.mxu1 %v3321_v7  ;;  %1796 = vmatpush1.bf16.msra.mxu0 %v2848_v9  ;;  %v2857_v7 = vld [vmem:[%s4044_s3 + $0x80] ss:$16 sps:$4 sm:$0xff]   ;;  %v2994_v9 = vld [vmem:[%s4044_s3 + $0x2ec] ss:$16 sps:$4 sm:$0xff]  }
  0x84   :  { %1797 = vmatprep.subr.bf16.mxu0 %v2853_v10  ;;  %1837 = vmatpush1.bf16.msra.mxu1 %v2896_v16  ;;  %v159_v10 = vlaneseq }
  0x85   :  { %1838 = vmatprep.subr.bf16.mxu1 %v2904_v19 }
  0x87   :  { %1798 = vmatpush1.bf16.msra.mxu0 %v2851_v11  ;;  %v3712_v11 = vshrl.u32 %v159_v10, 7 }
  0x88   :  { %1799 = vmatprep.subr.bf16.mxu0 %v2856_v12  ;;  %1839 = vmatpush1.bf16.msra.mxu1 %v2902_v18 }
  0x89   :  { %1840 = vmatprep.subr.bf16.mxu1 %v2910_v23  ;;  %v161_v12 = vsub.s32 0, %v3712_v11 }
  0x8b   :  { %1800 = vmatpush1.bf16.msra.mxu0 %v2854_v13  ;;  %v3718_v13 = vld [vmem:[%s4045_s2] sm:$0xf] }
  0x8c   :  { %1801 = vmatprep.subr.bf16.mxu0 %v2859_v6  ;;  %1841 = vmatpush1.bf16.msra.mxu1 %v2908_v22  ;;  %v165_v6 = vsub.s32 1, %v3712_v11 }
  0x8d   :  { %1842 = vmatprep.subr.bf16.mxu1 %v2916_v27 }
  0x8e   :  { %v166_v14 = vrot.slane %v3718_v13, %v165_v6 }
  0x8f   :  { %1802 = vmatpush1.bf16.msra.mxu0 %v2857_v7  ;;  %v162_v7 = vrot.slane %v3718_v13, %v161_v12 }
  0x90   :  { %1803 = vmatprep.subr.bf16.mxu0 %v2862_v15  ;;  %1843 = vmatpush1.bf16.msra.mxu1 %v2914_v26 }
  0x91   :  { %1844 = vmatprep.subr.bf16.mxu1 %v2922_v31 }
  0x93   :  { %1804 = vmatpush1.bf16.msra.mxu0 %v2860_v17 }
  0x94   :  { %1805 = vmatprep.subr.bf16.mxu0 %v2865_v20  ;;  %1845 = vmatpush1.bf16.msra.mxu1 %v2920_v30  ;;  %v2899_v30 = vld [vmem:[%s4044_s3 + $0xe8] ss:$16 sps:$4 sm:$0xff]  }
  0x95   :  { %1846 = vmatprep.subr.bf16.mxu1 %v2928_v35  ;;  %v2911_v35 = vld [vmem:[%s4044_s3 + $0xa8] ss:$16 sps:$4 sm:$0xff]  }
  0x97   :  { %1806 = vmatpush1.bf16.msra.mxu0 %v2863_v21 }
  0x98   :  { %1807 = vmatprep.subr.bf16.mxu0 %v2868_v24  ;;  %1847 = vmatpush1.bf16.msra.mxu1 %v2926_v34  ;;  %v2913_v34 = vld [vmem:[%s4044_s3 + $0xac] ss:$16 sps:$4 sm:$0xff]  }
  0x99   :  { %1848 = vmatprep.subr.bf16.mxu1 %v2934_v39  ;;  %v2923_v39 = vld [vmem:[%s4044_s3 + $0x68] ss:$16 sps:$4 sm:$0xff]  }
  0x9b   :  { %1808 = vmatpush1.bf16.msra.mxu0 %v2866_v25 }
  0x9c   :  { %1809 = vmatprep.subr.bf16.mxu0 %v2871_v28  ;;  %1849 = vmatpush1.bf16.msra.mxu1 %v2932_v38  ;;  %v2925_v38 = vld [vmem:[%s4044_s3 + $0x6c] ss:$16 sps:$4 sm:$0xff]  }
  0x9d   :  { %1850 = vmatprep.subr.bf16.mxu1 %v2940_v43  ;;  %v2935_v43 = vld [vmem:[%s4044_s3 + $0x28] ss:$16 sps:$4 sm:$0xff]  }
  0x9f   :  { %1810 = vmatpush1.bf16.msra.mxu0 %v2869_v29 }
  0xa0   :  { %1811 = vmatprep.subr.bf16.mxu0 %v2874_v32  ;;  %1851 = vmatpush1.bf16.msra.mxu1 %v2938_v42  ;;  %v2907_v32 = vld [vmem:[%s4044_s3 + $0xcc] ss:$16 sps:$4 sm:$0xff]  }
  0xa1   :  { %1852 = vmatprep.subr.bf16.mxu1 %v2946_v47  ;;  %v2937_v42 = vld [vmem:[%s4044_s3 + $0x2c] ss:$16 sps:$4 sm:$0xff]   ;;  %v2947_v47 = vld [vmem:[%s4044_s3 + $0x1e8] ss:$16 sps:$4 sm:$0xff]  }
  0xa3   :  { %1812 = vmatpush2.bf16.msra.mxu0 %v2872_v33  ;;  %v2905_v33 = vld [vmem:[%s4044_s3 + $0xc8] ss:$16 sps:$4 sm:$0xff]  }
  0xa4   :  { %1813 = vmatprep.subr.bf16.mxu0 %v2877_v36  ;;  %1853 = vmatpush2.bf16.msra.mxu1 %v2944_v46  ;;  %v2919_v36 = vld [vmem:[%s4044_s3 + $0x8c] ss:$16 sps:$4 sm:$0xff]  }
  0xa5   :  { %1854 = vmatprep.subr.bf16.mxu1 %v2952_v51  ;;  %v2949_v46 = vld [vmem:[%s4044_s3 + $0x1ec] ss:$16 sps:$4 sm:$0xff]   ;;  %v2959_v51 = vld [vmem:[%s4044_s3 + $0x1a8] ss:$16 sps:$4 sm:$0xff]  }
  0xa7   :  { %1814 = vmatpush2.bf16.msra.mxu0 %v2875_v37  ;;  %v2917_v37 = vld [vmem:[%s4044_s3 + $0x88] ss:$16 sps:$4 sm:$0xff]  }
  0xa8   :  { %1815 = vmatprep.subr.bf16.mxu0 %v2880_v40  ;;  %1855 = vmatpush2.bf16.msra.mxu1 %v2950_v50  ;;  %v2931_v40 = vld [vmem:[%s4044_s3 + $0x4c] ss:$16 sps:$4 sm:$0xff]  }
  0xa9   :  { %1856 = vmatprep.subr.bf16.mxu1 %v2958_v55  ;;  %v2961_v50 = vld [vmem:[%s4044_s3 + $0x1ac] ss:$16 sps:$4 sm:$0xff]   ;;  %v2971_v55 = vld [vmem:[%s4044_s3 + $0x168] ss:$16 sps:$4 sm:$0xff]  }
  0xab   :  { %1816 = vmatpush2.bf16.msra.mxu0 %v2878_v41  ;;  %v2929_v41 = vld [vmem:[%s4044_s3 + $0x48] ss:$16 sps:$4 sm:$0xff]  }
  0xac   :  { %1817 = vmatprep.subr.bf16.mxu0 %v2883_v44  ;;  %1857 = vmatpush2.bf16.msra.mxu1 %v2956_v54  ;;  %v2943_v44 = vld [vmem:[%s4044_s3 + $0xc] ss:$16 sps:$4 sm:$0xff]  }
  0xad   :  { %1858 = vmatprep.subr.bf16.mxu1 %v2964_v59  ;;  %v2973_v54 = vld [vmem:[%s4044_s3 + $0x16c] ss:$16 sps:$4 sm:$0xff]   ;;  %v2977_v59 = vld [vmem:[%s4044_s3 + $0x148] ss:$16 sps:$4 sm:$0xff]  }
  0xaf   :  { %1818 = vmatpush2.bf16.msra.mxu0 %v2881_v45  ;;  %v2941_v45 = vld [vmem:[%s4044_s3 + $0x8] ss:$16 sps:$4 sm:$0xff]  }
  0xb0   :  { %1819 = vmatprep.subr.bf16.mxu0 %v2886_v48  ;;  %1859 = vmatpush2.bf16.msra.mxu1 %v2962_v58  ;;  %v2955_v48 = vld [vmem:[%s4044_s3 + $0x1cc] ss:$16 sps:$4 sm:$0xff]   ;;  %v173_v58 = vsub.s32 3, %v3712_v11 }
  0xb1   :  { %1860 = vmatprep.subr.bf16.mxu1 %v2970_v63 }
  0xb3   :  { %1820 = vmatpush2.bf16.msra.mxu0 %v2884_v49  ;;  %v2953_v49 = vld [vmem:[%s4044_s3 + $0x1c8] ss:$16 sps:$4 sm:$0xff]  }
  0xb4   :  { %1821 = vmatprep.subr.bf16.mxu0 %v2889_v52  ;;  %1861 = vmatpush2.bf16.msra.mxu1 %v2968_v62  ;;  %v2967_v52 = vld [vmem:[%s4044_s3 + $0x18c] ss:$16 sps:$4 sm:$0xff]   ;;  %v174_v62 = vrot.slane %v3718_v13, %v173_v58 }
  0xb5   :  { %1862 = vmatprep.subr.bf16.mxu1 %v2976_v2  ;;  %v2983_v2 = vld [vmem:[%s4044_s3 + $0x128] ss:$16 sps:$4 sm:$0xff]  }
  0xb7   :  { %1822 = vmatpush2.bf16.msra.mxu0 %v2887_v53  ;;  %v2965_v53 = vld [vmem:[%s4044_s3 + $0x188] ss:$16 sps:$4 sm:$0xff]  }
  0xb8   :  { %1823 = vmatprep.subr.bf16.mxu0 %v2892_v56  ;;  %1863 = vmatpush2.bf16.msra.mxu1 %v2974_v1  ;;  %v169_v56 = vsub.s32 2, %v3712_v11 }
  0xb9   :  { %1864 = vmatprep.subr.bf16.mxu1 %v2982_v3 }
  0xbb   :  { %1824 = vmatpush2.bf16.msra.mxu0 %v2890_v57  ;;  %v2979_v57 = vld [vmem:[%s4044_s3 + $0x14c] ss:$16 sps:$4 sm:$0xff]  }
  0xbc   :  { %1825 = vmatprep.subr.bf16.mxu0 %v2895_v60  ;;  %1865 = vmatpush2.bf16.msra.mxu1 %v2980_v4  ;;  %v170_v60 = vrot.slane %v3718_v13, %v169_v56 }
  0xbd   :  { %1866 = vmatprep.subr.bf16.mxu1 %v2988_v5  ;;  %v2991_v5 = vld [vmem:[%s4044_s3 + $0x10c] ss:$16 sps:$4 sm:$0xff]  }
  0xbf   :  { %1826 = vmatpush2.bf16.msra.mxu0 %v2893_v61  ;;  %v2985_v61 = vld [vmem:[%s4044_s3 + $0x12c] ss:$16 sps:$4 sm:$0xff]  }
  0xc0   :  { %1877 = vmatprep.subr.bf16.mxu0 %v2901_v0  ;;  %1867 = vmatpush2.bf16.msra.mxu1 %v2986_v8 }
  0xc1   :  { %1918 = vmatprep.subr.bf16.mxu1 %v2994_v9 }
 0x102   :  { %v867_v15 = vpop.f32.mrf.mxu0 }
 0x103   :  { %v908_v16 = vpop.f32.mrf.mxu1  ;;  %v868_v17 = vadd.f32 %v867_v15, %v162_v7 }
 0x104   :  { %v869_v18 = vpop.f32.mrf.mxu0 }
 0x105   :  { %v910_v19 = vpop.f32.mrf.mxu1  ;;  %v909_v20 = vadd.f32 %v908_v16, %v868_v17  ;;  %v870_v21 = vadd.f32 %v869_v18, %v166_v14  ;;  %v2989_v14 = vld [vmem:[%s4044_s3 + $0x108] ss:$16 sps:$4 sm:$0xff]  }
 0x106   :  { %v871_v22 = vpop.f32.mrf.mxu0 }
 0x107   :  { %v912_v23 = vpop.f32.mrf.mxu1  ;;  %v911_v24 = vadd.f32 %v910_v19, %v870_v21  ;;  %v997_v25 = vmax.f32 %v909_v20, 0.0  ;;  %v2992_v20 = vld [vmem:[%s4044_s3 + $0x2e8] ss:$16 sps:$4 sm:$0xff]   ;;  %v2997_v22 = vld [vmem:[%s4044_s3 + $0x2cc] ss:$16 sps:$4 sm:$0xff]  }
 0x108   :  { %v872_v26 = vpop.f32.mrf.mxu0  ;;  %v2995_v23 = vld [vmem:[%s4044_s3 + $0x2c8] ss:$16 sps:$4 sm:$0xff]  }
 0x109   :  { %v913_v27 = vpop.f32.mrf.mxu1  ;;  %v998_v28 = vmax.f32 %v911_v24, 0.0  ;;  %v3730_v31 = vpack.c.bf16 %v997_v25, %v997_v25  ;;  %v3000_v24 = vld [vmem:[%s4044_s3 + $0x2ac] ss:$16 sps:$4 sm:$0xff]   ;;  %v2998_v25 = vld [vmem:[%s4044_s3 + $0x2a8] ss:$16 sps:$4 sm:$0xff]  }
 0x10a   :  { %v3003_v26 = vld [vmem:[%s4044_s3 + $0x28c] ss:$16 sps:$4 sm:$0xff]   ;;  %v3001_v27 = vld [vmem:[%s4044_s3 + $0x288] ss:$16 sps:$4 sm:$0xff]  }
 0x10b   :  { %v1002_v29 = vpack.c.bf16 %v998_v28, %v998_v28  ;;  %v3040_v28 = vld [vmem:[%s4046_s5 + $0x78] sm:$0xff]  }
 0x10d   :  { %1827 = vmatprep.mubr.bf16.mxu0 %v1002_v29 }
 0x10e   :  { %1828 = vmatmul.mubr.bf16.vlgmr.msra.gmra.mxu0 %v3730_v31 }
 0x10f   :  { %1878 = vmatpush1.bf16.msra.mxu0 %v2899_v30  ;;  %1909 = vmatprep.mubr.bf16.mxu0 %v1002_v29  ;;  %v3006_v29 = vld [vmem:[%s4044_s3 + $0x26c] ss:$16 sps:$4 sm:$0xff]  }
 0x110   :  { %1879 = vmatprep.subr.bf16.mxu0 %v2907_v32  ;;  %v3041_v30 = vld [vmem:[%s4046_s5 + $0x38] sm:$0xff]   ;;  %v3043_v32 = vld [vmem:[%s4046_s5 + $0x30] sm:$0xff]  }
 0x113   :  { %1880 = vmatpush1.bf16.msra.mxu0 %v2905_v33  ;;  %v3044_v33 = vld [vmem:[%s4046_s5 + $0x68] sm:$0xff]  }
 0x114   :  { %1881 = vmatprep.subr.bf16.mxu0 %v2913_v34  ;;  %v3004_v34 = vld [vmem:[%s4044_s3 + $0x268] ss:$16 sps:$4 sm:$0xff]  }
 0x117   :  { %1882 = vmatpush1.bf16.msra.mxu0 %v2911_v35  ;;  %v3009_v35 = vld [vmem:[%s4044_s3 + $0x24c] ss:$16 sps:$4 sm:$0xff]  }
 0x118   :  { %1883 = vmatprep.subr.bf16.mxu0 %v2919_v36  ;;  %v3045_v36 = vld [vmem:[%s4046_s5 + $0x28] sm:$0xff]  }
 0x11b   :  { %1884 = vmatpush1.bf16.msra.mxu0 %v2917_v37  ;;  %v3007_v37 = vld [vmem:[%s4044_s3 + $0x248] ss:$16 sps:$4 sm:$0xff]  }
 0x11c   :  { %1885 = vmatprep.subr.bf16.mxu0 %v2925_v38  ;;  %v3046_v38 = vld [vmem:[%s4046_s5 + $0x60] sm:$0xff]  }
 0x11f   :  { %1886 = vmatpush1.bf16.msra.mxu0 %v2923_v39  ;;  %v3012_v39 = vld [vmem:[%s4044_s3 + $0x22c] ss:$16 sps:$4 sm:$0xff]  }
 0x120   :  { %1887 = vmatprep.subr.bf16.mxu0 %v2931_v40  ;;  %v3047_v40 = vld [vmem:[%s4046_s5 + $0x20] sm:$0xff]  }
 0x123   :  { %1888 = vmatpush1.bf16.msra.mxu0 %v2929_v41  ;;  %v3048_v41 = vld [vmem:[%s4046_s5 + $0x58] sm:$0xff]  }
 0x124   :  { %1889 = vmatprep.subr.bf16.mxu0 %v2937_v42  ;;  %v3010_v42 = vld [vmem:[%s4044_s3 + $0x228] ss:$16 sps:$4 sm:$0xff]  }
 0x127   :  { %1890 = vmatpush1.bf16.msra.mxu0 %v2935_v43  ;;  %v3015_v43 = vld [vmem:[%s4044_s3 + $0x20c] ss:$16 sps:$4 sm:$0xff]  }
 0x128   :  { %1891 = vmatprep.subr.bf16.mxu0 %v2943_v44  ;;  %v3049_v44 = vld [vmem:[%s4046_s5 + $0x18] sm:$0xff]  }
 0x12b   :  { %1892 = vmatpush1.bf16.msra.mxu0 %v2941_v45  ;;  %v3050_v45 = vld [vmem:[%s4046_s5 + $0x50] sm:$0xff]  }
 0x12c   :  { %1893 = vmatprep.subr.bf16.mxu0 %v2949_v46  ;;  %v3013_v46 = vld [vmem:[%s4044_s3 + $0x208] ss:$16 sps:$4 sm:$0xff]  }
 0x12f   :  { %1894 = vmatpush2.bf16.msra.mxu0 %v2947_v47  ;;  %v3018_v47 = vld [vmem:[%s4044_s3 + $0x3ec] ss:$16 sps:$4 sm:$0xff]  }
 0x130   :  { %1895 = vmatprep.subr.bf16.mxu0 %v2955_v48  ;;  %v3016_v48 = vld [vmem:[%s4044_s3 + $0x3e8] ss:$16 sps:$4 sm:$0xff]  }
 0x133   :  { %1896 = vmatpush2.bf16.msra.mxu0 %v2953_v49  ;;  %v3021_v49 = vld [vmem:[%s4044_s3 + $0x3cc] ss:$16 sps:$4 sm:$0xff]  }
 0x134   :  { %1897 = vmatprep.subr.bf16.mxu0 %v2961_v50  ;;  %v3019_v50 = vld [vmem:[%s4044_s3 + $0x3c8] ss:$16 sps:$4 sm:$0xff]  }
 0x137   :  { %1898 = vmatpush2.bf16.msra.mxu0 %v2959_v51  ;;  %v3024_v51 = vld [vmem:[%s4044_s3 + $0x3ac] ss:$16 sps:$4 sm:$0xff]  }
 0x138   :  { %1899 = vmatprep.subr.bf16.mxu0 %v2967_v52  ;;  %v3022_v52 = vld [vmem:[%s4044_s3 + $0x3a8] ss:$16 sps:$4 sm:$0xff]  }
 0x13b   :  { %1900 = vmatpush2.bf16.msra.mxu0 %v2965_v53  ;;  %v3027_v53 = vld [vmem:[%s4044_s3 + $0x38c] ss:$16 sps:$4 sm:$0xff]  }
 0x13c   :  { %1901 = vmatprep.subr.bf16.mxu0 %v2973_v54  ;;  %v3025_v54 = vld [vmem:[%s4044_s3 + $0x388] ss:$16 sps:$4 sm:$0xff]  }
 0x13f   :  { %1902 = vmatpush2.bf16.msra.mxu0 %v2971_v55  ;;  %v3030_v55 = vld [vmem:[%s4044_s3 + $0x36c] ss:$16 sps:$4 sm:$0xff]  }
 0x140   :  { %1903 = vmatprep.subr.bf16.mxu0 %v2979_v57  ;;  %v3028_v57 = vld [vmem:[%s4044_s3 + $0x368] ss:$16 sps:$4 sm:$0xff]  }
 0x142   :  { %v949_v63 = vpop.f32.mrf.mxu0 }
 0x143   :  { %v990_v0 = vpop.f32.mrf.mxu1  ;;  %v950_v1 = vadd.f32 %v949_v63, %v170_v60  ;;  %1904 = vmatpush2.bf16.msra.mxu0 %v2977_v59  ;;  %v3033_v59 = vld [vmem:[%s4044_s3 + $0x34c] ss:$16 sps:$4 sm:$0xff]   ;;  %v3031_v60 = vld [vmem:[%s4044_s3 + $0x348] ss:$16 sps:$4 sm:$0xff]  }
 0x144   :  { %v951_v3 = vpop.f32.mrf.mxu0  ;;  %1905 = vmatprep.subr.bf16.mxu0 %v2985_v61  ;;  %v3036_v61 = vld [vmem:[%s4044_s3 + $0x32c] ss:$16 sps:$4 sm:$0xff]  }
 0x145   :  { %v992_v4 = vpop.f32.mrf.mxu1  ;;  %v991_v8 = vadd.f32 %v990_v0, %v950_v1  ;;  %v952_v9 = vadd.f32 %v951_v3, %v174_v62  ;;  %v3034_v62 = vld [vmem:[%s4044_s3 + $0x328] ss:$16 sps:$4 sm:$0xff]   ;;  %v3039_v63 = vld [vmem:[%s4044_s3 + $0x30c] ss:$16 sps:$4 sm:$0xff]   ;;  %v3051_v1 = vld [vmem:[%s4046_s5 + $0x10] sm:$0xff]  }
 0x146   :  { %v953_v10 = vpop.f32.mrf.mxu0  ;;  %v3037_v0 = vld [vmem:[%s4044_s3 + $0x308] ss:$16 sps:$4 sm:$0xff]  }
 0x147   :  { %v994_v7 = vpop.f32.mrf.mxu1  ;;  %v993_v13 = vadd.f32 %v992_v4, %v952_v9  ;;  %1906 = vmatpush2.bf16.msra.mxu0 %v2983_v2  ;;  %v999_v15 = vmax.f32 %v991_v8, 0.0  ;;  %v3052_v2 = vld [vmem:[%s4046_s5 + $0x48] sm:$0xff]   ;;  %v3054_v4 = vld [vmem:[%s4046_s5 + $0x40] sm:$0xff]   ;;  %v3056_v8 = vld [vmem:[%s4046_s5 + $0xf8] sm:$0xff]  }
 0x148   :  { %v954_v16 = vpop.f32.mrf.mxu0  ;;  %1907 = vmatprep.subr.bf16.mxu0 %v2991_v5  ;;  %v3053_v3 = vld [vmem:[%s4046_s5 + $0x8] sm:$0xff]   ;;  %v3055_v5 = vld [vmem:[%s4046_s5] sm:$0xff]   ;;  %v3057_v9 = vld [vmem:[%s4046_s5 + $0xb8] sm:$0xff]  }
 0x149   :  { %v995_v17 = vpop.f32.mrf.mxu1  ;;  %v1000_v18 = vmax.f32 %v993_v13, 0.0  ;;  %v3834_v21 = vpack.c.bf16 %v999_v15, %v999_v15  ;;  %v3058_v10 = vld [vmem:[%s4046_s5 + $0xf0] sm:$0xff]   ;;  %v3060_v13 = vld [vmem:[%s4046_s5 + $0xe8] sm:$0xff]   ;;  %v3062_v15 = vld [vmem:[%s4046_s5 + $0xe0] sm:$0xff]  }
 0x14a   :  { %v3059_v7 = vld [vmem:[%s4046_s5 + $0xb0] sm:$0xff]   ;;  %v3063_v16 = vld [vmem:[%s4046_s5 + $0xa0] sm:$0xff]   ;;  %v3064_v17 = vld [vmem:[%s4046_s5 + $0xd8] sm:$0xff]  }
 0x14b   :  { %v1004_v19 = vpack.c.bf16 %v1000_v18, %v1000_v18  ;;  %1908 = vmatpush2.bf16.msra.mxu0 %v2989_v14  ;;  %v3061_v14 = vld [vmem:[%s4046_s5 + $0xa8] sm:$0xff]   ;;  %v3065_v18 = vld [vmem:[%s4046_s5 + $0x98] sm:$0xff]  }
 0x14c   :  { %2608 = vmatprep.subr.bf16.mxu0 %v3040_v28 }
 0x14d   :  { %1868 = vmatprep.mubr.bf16.mxu1 %v1004_v19 }
 0x14e   :  { %1910 = vmatmul.mubr.bf16.vlgmr.msra.gmra.mxu0 %v3730_v31  ;;  %1869 = vmatmul.mubr.bf16.vlgmr.msra.gmra.mxu1 %v3834_v21  ;;  %v3042_v31 = vld [vmem:[%s4046_s5 + $0x70] sm:$0xff]  }
 0x14f   :  { %1919 = vmatpush1.bf16.msra.mxu1 %v2992_v20  ;;  %1950 = vmatprep.mubr.bf16.mxu1 %v1004_v19  ;;  %v3066_v19 = vld [vmem:[%s4046_s5 + $0xd0] sm:$0xff]  }
 0x150   :  { %1920 = vmatprep.subr.bf16.mxu1 %v2997_v22  ;;  %2609 = vmatpush3.bf16.msra.mxu0 %v3041_v30  ;;  %v3067_v20 = vld [vmem:[%s4046_s5 + $0x90] sm:$0xff]   ;;  %v3068_v22 = vld [vmem:[%s4046_s5 + $0xc8] sm:$0xff]  }
 0x151   :  { %2610 = vmatprep.subr.bf16.mxu0 %v3042_v31 }
 0x153   :  { %1921 = vmatpush1.bf16.msra.mxu1 %v2995_v23  ;;  %v3069_v23 = vld [vmem:[%s4046_s5 + $0x88] sm:$0xff]  }
 0x154   :  { %1922 = vmatprep.subr.bf16.mxu1 %v3000_v24  ;;  %2611 = vmatpush3.bf16.msra.mxu0 %v3043_v32 }
 0x155   :  { %2612 = vmatprep.subr.bf16.mxu0 %v3044_v33 }
 0x157   :  { %1923 = vmatpush1.bf16.msra.mxu1 %v2998_v25 }
 0x158   :  { %1924 = vmatprep.subr.bf16.mxu1 %v3003_v26  ;;  %2613 = vmatpush3.bf16.msra.mxu0 %v3045_v36  ;;  %v3070_v26 = vld [vmem:[%s4046_s5 + $0xc0] sm:$0xff]  }
 0x159   :  { %2614 = vmatprep.subr.bf16.mxu0 %v3046_v38 }
 0x15b   :  { %1925 = vmatpush1.bf16.msra.mxu1 %v3001_v27  ;;  %v3071_v27 = vld [vmem:[%s4046_s5 + $0x80] sm:$0xff]  }
 0x15c   :  { %1926 = vmatprep.subr.bf16.mxu1 %v3006_v29  ;;  %2615 = vmatpush3.bf16.msra.mxu0 %v3047_v40  ;;  %v1133_v29 = vld [vmem:[%s4047_s4] sm:$0xf] }
 0x15d   :  { %2616 = vmatprep.subr.bf16.mxu0 %v3048_v41  ;;  %v1138_v30 = vrot.slane %v1133_v29, %v161_v12  ;;  %v1142_v31 = vrot.slane %v1133_v29, %v165_v6  ;;  %v1146_v12 = vrot.slane %v1133_v29, %v169_v56  ;;  %v1150_v6 = vrot.slane %v1133_v29, %v173_v58  ;;  %v2575_v58 = vld [vmem:[%s4048_s6] ss:$0 sm:$0xff] }
 0x15f   :  { %1927 = vmatpush1.bf16.msra.mxu1 %v3004_v34 }
 0x160   :  { %1928 = vmatprep.subr.bf16.mxu1 %v3009_v35  ;;  %2617 = vmatpush3.bf16.msra.mxu0 %v3049_v44 }
 0x161   :  { %2618 = vmatprep.subr.bf16.mxu0 %v3050_v45 }
 0x163   :  { %1929 = vmatpush1.bf16.msra.mxu1 %v3007_v37 }
 0x164   :  { %1930 = vmatprep.subr.bf16.mxu1 %v3012_v39  ;;  %2619 = vmatpush3.bf16.msra.mxu0 %v3051_v1 }
 0x165   :  { %2620 = vmatprep.subr.bf16.mxu0 %v3052_v2 }
 0x167   :  { %1931 = vmatpush1.bf16.msra.mxu1 %v3010_v42 }
 0x168   :  { %1932 = vmatprep.subr.bf16.mxu1 %v3015_v43  ;;  %2621 = vmatpush3.bf16.msra.mxu0 %v3053_v3 }
 0x169   :  { %2622 = vmatprep.subr.bf16.mxu0 %v3054_v4 }
 0x16b   :  { %1933 = vmatpush1.bf16.msra.mxu1 %v3013_v46 }
 0x16c   :  { %1934 = vmatprep.subr.bf16.mxu1 %v3018_v47  ;;  %2623 = vmatpush3.bf16.msra.mxu0 %v3055_v5 }
 0x16f   :  { %1935 = vmatpush2.bf16.msra.mxu1 %v3016_v48 }
 0x170   :  { %1936 = vmatprep.subr.bf16.mxu1 %v3021_v49 }
 0x173   :  { %1937 = vmatpush2.bf16.msra.mxu1 %v3019_v50 }
 0x174   :  { %1938 = vmatprep.subr.bf16.mxu1 %v3024_v51 }
 0x177   :  { %1939 = vmatpush2.bf16.msra.mxu1 %v3022_v52 }
 0x178   :  { %1940 = vmatprep.subr.bf16.mxu1 %v3027_v53 }
 0x17b   :  { %1941 = vmatpush2.bf16.msra.mxu1 %v3025_v54 }
 0x17c   :  { %1942 = vmatprep.subr.bf16.mxu1 %v3030_v55 }
 0x17f   :  { %1943 = vmatpush2.bf16.msra.mxu1 %v3028_v57 }
 0x180   :  { %1944 = vmatprep.subr.bf16.mxu1 %v3033_v59 }
 0x183   :  { %1945 = vmatpush2.bf16.msra.mxu1 %v3031_v60 }
 0x184   :  { %1946 = vmatprep.subr.bf16.mxu1 %v3036_v61 }
 0x187   :  { %1947 = vmatpush2.bf16.msra.mxu1 %v3034_v62 }
 0x188   :  { %1948 = vmatprep.subr.bf16.mxu1 %v3039_v63 }
 0x18b   :  { %1949 = vmatpush2.bf16.msra.mxu1 %v3037_v0 }
 0x18c   :  { %2630 = vmatprep.subr.bf16.mxu1 %v3056_v8 }
 0x18e   :  { %1951 = vmatmul.mubr.bf16.vlgmr.msra.gmra.mxu1 %v3834_v21 }
 0x18f   :  { %2631 = vmatpush3.bf16.msra.mxu1 %v3057_v9 }
 0x190   :  { %2632 = vmatprep.subr.bf16.mxu1 %v3058_v10 }
 0x193   :  { %2633 = vmatpush3.bf16.msra.mxu1 %v3059_v7 }
 0x194   :  { %2634 = vmatprep.subr.bf16.mxu1 %v3060_v13 }
 0x197   :  { %2635 = vmatpush3.bf16.msra.mxu1 %v3061_v14 }
 0x198   :  { %2636 = vmatprep.subr.bf16.mxu1 %v3062_v15 }
 0x19b   :  { %2637 = vmatpush3.bf16.msra.mxu1 %v3063_v16 }
 0x19c   :  { %2638 = vmatprep.subr.bf16.mxu1 %v3064_v17 }
 0x19f   :  { %2639 = vmatpush3.bf16.msra.mxu1 %v3065_v18 }
 0x1a0   :  { %2640 = vmatprep.subr.bf16.mxu1 %v3066_v19 }
 0x1a3   :  { %2641 = vmatpush3.bf16.msra.mxu1 %v3067_v20 }
 0x1a4   :  { %2642 = vmatprep.subr.bf16.mxu1 %v3068_v22 }
 0x1a7   :  { %2643 = vmatpush3.bf16.msra.mxu1 %v3069_v23 }
 0x1a8   :  { %2644 = vmatprep.subr.bf16.mxu1 %v3070_v26 }
 0x1ab   :  { %2645 = vmatpush3.bf16.msra.mxu1 %v3071_v27 }
 0x1ce   :  { %v1829_v21 = vpop.f32.mrf.mxu0 }
 0x1cf   :  { %v1830_v32 = vadd.f32 %v1829_v21, %v1138_v30 }
 0x1d0   :  { %v1831_v24 = vpop.f32.mrf.mxu0 }
 0x1d1   :  { %v1832_v35 = vadd.f32 %v1831_v24, %v1142_v31 }
 0x1d2   :  { %v1833_v25 = vpop.f32.mrf.mxu0 }
 0x1d4   :  { %v1834_v28 = vpop.f32.mrf.mxu0 }
 0x20e   :  { %v1911_v33 = vpop.f32.mrf.mxu0  ;;  %v1870_v34 = vpop.f32.mrf.mxu1 }
 0x20f   :  { %v1871_v36 = vadd.f32 %v1870_v34, %v1830_v32  ;;  %v1912_v48 = vadd.f32 %v1911_v33, %v1146_v12 }
 0x210   :  { %v1913_v37 = vpop.f32.mrf.mxu0  ;;  %v1872_v38 = vpop.f32.mrf.mxu1 }
 0x211   :  { %v1873_v39 = vadd.f32 %v1872_v38, %v1832_v35  ;;  %v1959_v40 = vmax.f32 %v1871_v36, 0.0  ;;  %v1914_v50 = vadd.f32 %v1913_v37, %v1150_v6 }
 0x212   :  { %v1915_v41 = vpop.f32.mrf.mxu0  ;;  %v1874_v42 = vpop.f32.mrf.mxu1 }
 0x213   :  { %v1960_v43 = vmax.f32 %v1873_v39, 0.0  ;;  %v1963_v47 = vpack.c.bf16 %v1959_v40, %v1959_v40 }
 0x214   :  { %v1916_v44 = vpop.f32.mrf.mxu0  ;;  %v1875_v45 = vpop.f32.mrf.mxu1 }
 0x215   :  { %v1964_v46 = vpack.c.bf16 %v1960_v43, %v1960_v43 }
 0x217   :  { %2262 = vmatprep.mubr.bf16.mxu0 %v1964_v46 }
 0x218   :  { %2263 = vmatmul.mubr.bf16.vlgmr.msra.gmra.mxu0 %v1963_v47 }
 0x24e   :  { %v1952_v49 = vpop.f32.mrf.mxu1 }
 0x24f   :  { %v1953_v51 = vadd.f32 %v1952_v49, %v1912_v48 }
 0x250   :  { %v1954_v52 = vpop.f32.mrf.mxu1 }
 0x251   :  { %v1955_v53 = vadd.f32 %v1954_v52, %v1914_v50  ;;  %v1961_v54 = vmax.f32 %v1953_v51, 0.0 }
 0x252   :  { %v1956_v55 = vpop.f32.mrf.mxu1 }
 0x253   :  { %v1962_v57 = vmax.f32 %v1955_v53, 0.0  ;;  %v1965_v61 = vpack.c.bf16 %v1961_v54, %v1961_v54 }
 0x254   :  { %v1957_v59 = vpop.f32.mrf.mxu1 }
 0x255   :  { %v1966_v60 = vpack.c.bf16 %v1962_v57, %v1962_v57 }
 0x257   :  { %2302 = vmatprep.mubr.bf16.mxu1 %v1966_v60 }
 0x258   :  { %2303 = vmatmul.mubr.bf16.vlgmr.msra.gmra.mxu1 %v1965_v61 }
 0x2d8   :  { %v2624_v62 = vpop.f32.mrf.mxu0 }
 0x2da   :  { %v2625_v63 = vpop.f32.mrf.mxu0 }
 0x2db   :  { %v2626_v11 = vadd.f32 %v2625_v63, %v2624_v62 }
 0x2dc   :  { %v2627_v56 = vpop.f32.mrf.mxu0 }
 0x2dd   :  { %v2265_v3 = vadd.f32 %v2626_v11, %v2575_v58 }
 0x2de   :  { %v2628_v0 = vpop.f32.mrf.mxu0 }
 0x318   :  { %v2646_v1 = vpop.f32.mrf.mxu1 }
 0x31a   :  { %v2647_v2 = vpop.f32.mrf.mxu1 }
 0x31b   :  { %v2648_v4 = vadd.f32 %v2647_v2, %v2646_v1 }
 0x31c   :  { %v2649_v5 = vpop.f32.mrf.mxu1 }
 0x31d   :  { %v2305_v8 = vadd.f32 %v2648_v4, %v2265_v3 }
 0x31e   :  { %v2650_v9 = vpop.f32.mrf.mxu1 }
 0x31f   :  { %2310 = vst [vmem:[%s4049_s7] sm:$0xff] %v2305_v8 }

</bundles_post_ra>
